<compile_context>
chip_gen: v5e
topology: v5e:2x2
jax: 0.10.0
libtpu: 0.0.40
codegen_flags: <defaults>
</compile_context>

<pallas_src>
import functools

import jax
import jax.numpy as jnp
from jax.experimental import pallas as pl
from jax.experimental.pallas import tpu as pltpu


COMPUTE_DTYPE = jnp.bfloat16   # MXU input dtype
HP = 128                       # per-head padded width (lane-aligned)

CFG = dict(
    image_size=32,
    patch_size=8,
    channels=3,
    hidden=128,                # lane-dense last dim
    heads=4,
    mlp=256,
    layers=3,
    select_layer=-2,           # args.mm_vision_select_layer
    select_feature="patch",    # drop CLS token
    ln_eps=1e-5,
)


# ----------------------------------------------------------------------------
# Fused tower kernel: grid axis = encoder layer, residual resident in VMEM.
# ----------------------------------------------------------------------------
def _clip_tower_kernel(patches_ref, pw_ref, tok_ref, pre_g_ref, pre_b_ref,
                       wqkv_ref, bqkv_ref, wo_ref, bo_ref,
                       w1_ref, b1_ref, w2_ref, b2_ref,
                       h_ref, *, batch, t_pad, t_valid, heads, eps):
    layer = pl.program_id(0)
    D = h_ref.shape[-1]
    inv_d = 1.0 / D
    cdt = wqkv_ref.dtype

    def layer_norm(x):
        # One-pass stats: E[x], E[x^2]; affine is folded into the next matmul.
        s1 = jnp.sum(x, axis=-1, keepdims=True)
        s2 = jnp.sum(x * x, axis=-1, keepdims=True)
        mean = s1 * inv_d
        var = s2 * inv_d - mean * mean
        return (x - mean) * jax.lax.rsqrt(var + eps)

    # --- grid step 0: patch-embed matmul + CLS/pos add + pre-LayerNorm -------
    # (pre-LN affine feeds the residual stream directly, so it is kept here.)
    @pl.when(layer == 0)
    def _():
        x = jnp.dot(patches_ref[...], pw_ref[...],
                    preferred_element_type=jnp.float32)          # (B*T, D) f32
        for b in range(batch):
            r0 = b * t_pad
            xb = x[r0:r0 + t_pad, :] + tok_ref[...]
            yb = layer_norm(xb)
            h_ref[r0:r0 + t_pad, :] = yb * pre_g_ref[...] + pre_b_ref[...]

    # --- attention block: LN1(folded) + fused QKV + per-head attn + o-proj ---
    h = h_ref[...]                                               # (B*T, D) f32
    xn = layer_norm(h)
    qkv = jnp.dot(xn.astype(cdt), wqkv_ref[0],
                  preferred_element_type=jnp.float32) + bqkv_ref[0]

    key_mask = jax.lax.broadcasted_iota(jnp.int32, (t_pad, t_pad), 1) < t_valid
    wo_all = wo_ref[0]                                           # (heads*128, D)

    # TODO(synk): for real CLIP-L (16 heads, T~584) use lax.fori_loop over heads
    # and a flash-style key-block loop instead of this full unroll.
    for b in range(batch):
        r0 = b * t_pad
        out_b = jnp.zeros((t_pad, D), jnp.float32)
        for hi in range(heads):
            c0 = hi * 3 * HP
            qh = qkv[r0:r0 + t_pad, c0:c0 + HP].astype(cdt)
            kh = qkv[r0:r0 + t_pad, c0 + HP:c0 + 2 * HP].astype(cdt)
            vh = qkv[r0:r0 + t_pad, c0 + 2 * HP:c0 + 3 * HP].astype(cdt)
            # q @ k^T without materializing a transpose: contract last dims.
            s = jax.lax.dot_general(qh, kh, (((1,), (1,)), ((), ())),
                                    preferred_element_type=jnp.float32)
            s = jnp.where(key_mask, s, -1e30)                    # keep f32
            m = jnp.max(s, axis=-1, keepdims=True)
            p = jnp.exp(s - m)
            p = p * pl.reciprocal(jnp.sum(p, axis=-1, keepdims=True),
                                  approx=True)
            ctx = jnp.dot(p.astype(cdt), vh,
                          preferred_element_type=jnp.float32)    # (T, 128)
            out_b = out_b + jnp.dot(ctx.astype(cdt),
                                    wo_all[hi * HP:(hi + 1) * HP, :],
                                    preferred_element_type=jnp.float32)
        h_ref[r0:r0 + t_pad, :] = h[r0:r0 + t_pad, :] + out_b + bo_ref[0]

    # --- MLP block: LN2(folded) + fc1 + quickGELU + fc2 + residual add -------
    h2 = h_ref[...]
    xn2 = layer_norm(h2)
    a = jnp.dot(xn2.astype(cdt), w1_ref[0],
                preferred_element_type=jnp.float32) + b1_ref[0]
    a = a * jax.nn.sigmoid(1.702 * a)
    y = jnp.dot(a.astype(cdt), w2_ref[0],
                preferred_element_type=jnp.float32) + b2_ref[0]
    h_ref[...] = h2 + y


# ----------------------------------------------------------------------------
# Pallas wrapper: one call for the whole tower.
# ----------------------------------------------------------------------------
def pallas_clip_tower(patches_flat, prep, *, batch, heads, eps):
    T_pad, T_valid = prep["T_pad"], prep["T_valid"]
    CPP = patches_flat.shape[1]
    D = prep["patch_w"].shape[1]
    n_run = prep["wqkv"].shape[0]
    Hq = prep["wqkv"].shape[2]
    HO = prep["wo"].shape[1]
    F = prep["w1"].shape[2]

    kernel = functools.partial(_clip_tower_kernel, batch=batch, t_pad=T_pad,
                               t_valid=T_valid, heads=heads, eps=eps)

    return pl.pallas_call(
        kernel,
        out_shape=jax.ShapeDtypeStruct((batch * T_pad, D), jnp.float32),
        grid=(n_run,),
        in_specs=[
            pl.BlockSpec((batch * T_pad, CPP), lambda l: (0, 0)),   # patches
            pl.BlockSpec((CPP, D), lambda l: (0, 0)),               # patch_w
            pl.BlockSpec((T_pad, D), lambda l: (0, 0)),             # cls+pos
            pl.BlockSpec((1, D), lambda l: (0, 0)),                 # pre_ln g
            pl.BlockSpec((1, D), lambda l: (0, 0)),                 # pre_ln b
            pl.BlockSpec((1, D, Hq), lambda l: (l, 0, 0)),          # wqkv (per layer)
            pl.BlockSpec((1, 1, Hq), lambda l: (l, 0, 0)),          # bqkv
            pl.BlockSpec((1, HO, D), lambda l: (l, 0, 0)),          # wo
            pl.BlockSpec((1, 1, D), lambda l: (l, 0, 0)),           # bo
            pl.BlockSpec((1, D, F), lambda l: (l, 0, 0)),           # w1
            pl.BlockSpec((1, 1, F), lambda l: (l, 0, 0)),           # b1
            pl.BlockSpec((1, F, D), lambda l: (l, 0, 0)),           # w2
            pl.BlockSpec((1, 1, D), lambda l: (l, 0, 0)),           # b2
        ],
        out_specs=pl.BlockSpec((batch * T_pad, D), lambda l: (0, 0)),
        compiler_params=pltpu.CompilerParams(
            dimension_semantics=("arbitrary",)),
        # TODO(synk): set vmem_limit_bytes and K/N-tile MLP weights at CLIP-L sizes.
    )(patches_flat, prep["patch_w"], prep["tok_table"],
      prep["pre_ln_g"], prep["pre_ln_b"],
      prep["wqkv"], prep["bqkv"], prep["wo"], prep["bo"],
      prep["w1"], prep["b1"], prep["w2"], prep["b2"])


# ----------------------------------------------------------------------------
# Synthetic CLIP vision tower weights + zero-runtime-cost parameter prep.
# ----------------------------------------------------------------------------
def init_params(key, cfg):
    D, C, P, F, L = (cfg["hidden"], cfg["channels"], cfg["patch_size"],
                     cfg["mlp"], cfg["layers"])
    g = cfg["image_size"] // P
    T = g * g + 1
    keys = iter(jax.random.split(key, 8 + 12 * L))
    nrm = lambda k, shape: (jax.random.normal(k, shape, jnp.float32) * 0.02)

    params = {
        "patch_w": nrm(next(keys), (C * P * P, D)),     # conv weight, reshaped
        "cls": nrm(next(keys), (D,)),
        "pos": nrm(next(keys), (T, D)),
        "pre_ln_g": jnp.ones((D,), jnp.float32),
        "pre_ln_b": jnp.zeros((D,), jnp.float32),
        "layers": [],
    }
    for _ in range(L):
        params["layers"].append({
            "ln1_g": jnp.ones((D,), jnp.float32),
            "ln1_b": jnp.zeros((D,), jnp.float32),
            "q_w": nrm(next(keys), (D, D)), "q_b": nrm(next(keys), (D,)),
            "k_w": nrm(next(keys), (D, D)), "k_b": nrm(next(keys), (D,)),
            "v_w": nrm(next(keys), (D, D)), "v_b": nrm(next(keys), (D,)),
            "o_w": nrm(next(keys), (D, D)), "o_b": nrm(next(keys), (D,)),
            "ln2_g": jnp.ones((D,), jnp.float32),
            "ln2_b": jnp.zeros((D,), jnp.float32),
            "fc1_w": nrm(next(keys), (D, F)), "fc1_b": nrm(next(keys), (F,)),
            "fc2_w": nrm(next(keys), (F, D)), "fc2_b": nrm(next(keys), (D,)),
        })
    return params


def prepare_params(raw, cfg):
    """Fold q-scale + LN affines into projections, pack per-head QKV padded to
    128 lanes, pad the o-proj to 128-row head blocks, build the CLS+pos table,
    pad T to a multiple of 16, stack layer weights, cast to bf16."""
    D, heads, P, F, L = (cfg["hidden"], cfg["heads"], cfg["patch_size"],
                         cfg["mlp"], cfg["layers"])
    dh = D // heads
    g = cfg["image_size"] // P
    Np = g * g
    T_valid = Np + 1
    T_pad = ((T_valid + 15) // 16) * 16          # bf16 packs 16 rows per vreg
    scale = dh ** -0.5
    cdt = COMPUTE_DTYPE

    sel = cfg["select_layer"]
    n_run = L + 1 + sel if sel < 0 else sel      # HF hidden_states indexing
    assert 1 <= n_run <= L

    tok = jnp.zeros((T_pad, D), jnp.float32)
    tok = tok.at[0].set(raw["cls"] + raw["pos"][0])
    tok = tok.at[1:T_valid].set(raw["pos"][1:])

    wqkv_l, bqkv_l, wo_l, bo_l, w1_l, b1_l, w2_l, b2_l = ([] for _ in range(8))
    for lp in raw["layers"][:n_run]:
        g1, b1 = lp["ln1_g"], lp["ln1_b"]
        # LN1 affine + dh**-0.5 q-scale folded into the QKV projection.
        qw = g1[:, None] * lp["q_w"] * scale
        qb = (b1 @ lp["q_w"] + lp["q_b"]) * scale
        kw = g1[:, None] * lp["k_w"]
        kb = b1 @ lp["k_w"] + lp["k_b"]
        vw = g1[:, None] * lp["v_w"]
        vb = b1 @ lp["v_w"] + lp["v_b"]

        # Per-head [Q|K|V] groups, each padded dh -> 128 lanes (vreg-aligned).
        wqkv = jnp.zeros((D, heads * 3 * HP), jnp.float32)
        bqkv = jnp.zeros((heads * 3 * HP,), jnp.float32)
        wo = jnp.zeros((heads * HP, D), jnp.float32)
        for hi in range(heads):
            c0 = hi * 3 * HP
            hs = slice(hi * dh, (hi + 1) * dh)
            wqkv = wqkv.at[:, c0:c0 + dh].set(qw[:, hs])
            wqkv = wqkv.at[:, c0 + HP:c0 + HP + dh].set(kw[:, hs])
            wqkv = wqkv.at[:, c0 + 2 * HP:c0 + 2 * HP + dh].set(vw[:, hs])
            bqkv = bqkv.at[c0:c0 + dh].set(qb[hs])
            bqkv = bqkv.at[c0 + HP:c0 + HP + dh].set(kb[hs])
            bqkv = bqkv.at[c0 + 2 * HP:c0 + 2 * HP + dh].set(vb[hs])
            wo = wo.at[hi * HP:hi * HP + dh, :].set(lp["o_w"][hs, :])

        # LN2 affine folded into fc1.
        g2, b2 = lp["ln2_g"], lp["ln2_b"]
        w1 = g2[:, None] * lp["fc1_w"]
        b1f = b2 @ lp["fc1_w"] + lp["fc1_b"]

        wqkv_l.append(wqkv.astype(cdt))
        bqkv_l.append(bqkv.reshape(1, -1))
        wo_l.append(wo.astype(cdt))
        bo_l.append(lp["o_b"].reshape(1, D))
        w1_l.append(w1.astype(cdt))
        b1_l.append(b1f.reshape(1, F))
        w2_l.append(lp["fc2_w"].astype(cdt))
        b2_l.append(lp["fc2_b"].reshape(1, D))

    return {
        "patch_w": raw["patch_w"].astype(cdt),          # CLIP conv has no bias
        "tok_table": tok,
        "pre_ln_g": raw["pre_ln_g"].reshape(1, D),
        "pre_ln_b": raw["pre_ln_b"].reshape(1, D),
        "wqkv": jnp.stack(wqkv_l), "bqkv": jnp.stack(bqkv_l),
        "wo": jnp.stack(wo_l), "bo": jnp.stack(bo_l),
        "w1": jnp.stack(w1_l), "b1": jnp.stack(b1_l),
        "w2": jnp.stack(w2_l), "b2": jnp.stack(b2_l),
        "Np": Np, "T_valid": T_valid, "T_pad": T_pad, "n_run": n_run,
    }


def clip_vision_tower_forward(images, prep, cfg):
    """Matches CLIPVisionTower.forward with select_feature='patch' and
    token_reduce_func=None: returns (image_features, actual_dims)."""
    B, C, H, W = images.shape
    P = cfg["patch_size"]
    gh, gw = H // P, W // P
    Np = gh * gw
    T_pad = prep["T_pad"]

    # NCHW -> (B, Np, C*P*P) patch extraction; pad row 0 (CLS slot) and the
    # trailing rows so T is a multiple of 16; flatten batch*tokens (lane-dense).
    x = images.reshape(B, C, gh, P, gw, P).transpose(0, 2, 4, 1, 3, 5)
    x = x.reshape(B, Np, C * P * P)
    x = jnp.pad(x, ((0, 0), (1, T_pad - Np - 1), (0, 0)))
    x = x.reshape(B * T_pad, C * P * P).astype(COMPUTE_DTYPE)

    # Single fused pallas_call: embeddings + pre-LN + n_run encoder layers.
    h = pallas_clip_tower(x, prep, batch=B, heads=cfg["heads"],
                          eps=cfg["ln_eps"])
    h = h.reshape(B, T_pad, -1)

    # feature_select 'patch': drop CLS (row 0) and the padding rows.
    image_features = h[:, 1:1 + Np, :].astype(images.dtype)

    # token_reduce_func is None -> actual_dims = [num_tokens] * batch
    actual_dims = [Np] * B
    return image_features, actual_dims


# TODO(synk): the 'TRIM' token-reduction branch (text tower + IQR outlier
# detection + data-dependent top-k) is not exercised here (token_reduce_func=None).


if __name__ == "__main__":
    key = jax.random.PRNGKey(0)
    k_param, k_img = jax.random.split(key)

    raw_params = init_params(k_param, CFG)
    params = prepare_params(raw_params, CFG)

    images = jax.random.normal(
        k_img,
        (2, CFG["channels"], CFG["image_size"], CFG["image_size"]),
        jnp.float32,
    )  # NCHW, like the PyTorch module

    fwd = jax.jit(lambda imgs: clip_vision_tower_forward(imgs, params, CFG))
    image_features, actual_dims = fwd(images)
    jax.block_until_ready(image_features)

    num_patches = (CFG["image_size"] // CFG["patch_size"]) ** 2
    assert image_features.shape == (2, num_patches, CFG["hidden"])
    assert actual_dims == [num_patches, num_patches]
    assert bool(jnp.all(jnp.isfinite(image_features)))
    print("KERNEL_OK")
</pallas_src>

<mosaic_0001>
module attributes {stable_mosaic.version = 11 : i64} {
  func.func @_clip_tower_kernel(%arg0: i32, %arg1: memref<64x192xbf16, #tpu.memory_space<vmem>>, %arg2: memref<192x128xbf16, #tpu.memory_space<vmem>>, %arg3: memref<32x128xf32, #tpu.memory_space<vmem>>, %arg4: memref<1x128xf32, #tpu.memory_space<vmem>>, %arg5: memref<1x128xf32, #tpu.memory_space<vmem>>, %arg6: memref<1x128x1536xbf16, #tpu.memory_space<vmem>>, %arg7: memref<1x1x1536xf32, #tpu.memory_space<vmem>>, %arg8: memref<1x512x128xbf16, #tpu.memory_space<vmem>>, %arg9: memref<1x1x128xf32, #tpu.memory_space<vmem>>, %arg10: memref<1x128x256xbf16, #tpu.memory_space<vmem>>, %arg11: memref<1x1x256xf32, #tpu.memory_space<vmem>>, %arg12: memref<1x256x128xbf16, #tpu.memory_space<vmem>>, %arg13: memref<1x1x128xf32, #tpu.memory_space<vmem>>, %arg14: memref<64x128xf32, #tpu.memory_space<vmem>>) attributes {dimension_semantics = [#tpu.dimension_semantics<arbitrary>], iteration_bounds = array<i64: 2>, scalar_prefetch = 0 : i64, scratch_operands = 0 : i64, tpu.core_type = #tpu.core_type<tc>, window_params = [{pipeline_mode = #tpu.pipeline_mode<synchronous>, transform_indices = @transform_0, window_bounds = array<i64: 64, 192>}, {pipeline_mode = #tpu.pipeline_mode<synchronous>, transform_indices = @transform_1, window_bounds = array<i64: 192, 128>}, {pipeline_mode = #tpu.pipeline_mode<synchronous>, transform_indices = @transform_2, window_bounds = array<i64: 32, 128>}, {pipeline_mode = #tpu.pipeline_mode<synchronous>, transform_indices = @transform_3, window_bounds = array<i64: 1, 128>}, {pipeline_mode = #tpu.pipeline_mode<synchronous>, transform_indices = @transform_4, window_bounds = array<i64: 1, 128>}, {transform_indices = @transform_5, window_bounds = array<i64: 1, 128, 1536>}, {transform_indices = @transform_6, window_bounds = array<i64: 1, 1, 1536>}, {transform_indices = @transform_7, window_bounds = array<i64: 1, 512, 128>}, {transform_indices = @transform_8, window_bounds = array<i64: 1, 1, 128>}, {transform_indices = @transform_9, window_bounds = array<i64: 1, 128, 256>}, {transform_indices = @transform_10, window_bounds = array<i64: 1, 1, 256>}, {transform_indices = @transform_11, window_bounds = array<i64: 1, 256, 128>}, {transform_indices = @transform_12, window_bounds = array<i64: 1, 1, 128>}, {pipeline_mode = #tpu.pipeline_mode<synchronous>, transform_indices = @transform_13, window_bounds = array<i64: 64, 128>}]} {
    %c0_i32 = arith.constant 0 : i32
    %0 = arith.cmpi eq, %arg0, %c0_i32 : i32
    %1 = arith.extui %0 : i1 to i32
    %c0_i32_0 = arith.constant 0 : i32
    %2 = arith.cmpi ne, %1, %c0_i32_0 : i32
    scf.if %2 {
      %c0_100 = arith.constant 0 : index
      %c0_101 = arith.constant 0 : index
      %296 = vector.load %arg1[%c0_100, %c0_101] : memref<64x192xbf16, #tpu.memory_space<vmem>>, vector<64x192xbf16>
      %c0_102 = arith.constant 0 : index
      %c0_103 = arith.constant 0 : index
      %297 = vector.load %arg2[%c0_102, %c0_103] : memref<192x128xbf16, #tpu.memory_space<vmem>>, vector<192x128xbf16>
      %cst_104 = arith.constant dense<0.000000e+00> : vector<64x128xf32>
      %298 = tpu.matmul %296, %297, %cst_104 {dimension_numbers = #tpu.dot_dimension_numbers<[1], [0], [0], [1], [0, 0, 1, 1], [], []>} : vector<64x192xbf16>, vector<192x128xbf16>, vector<64x128xf32> -> vector<64x128xf32>
      %299 = vector.extract_strided_slice %298 {offsets = [0, 0], sizes = [32, 128], strides = [1, 1]} : vector<64x128xf32> to vector<32x128xf32>
      %c0_105 = arith.constant 0 : index
      %c0_106 = arith.constant 0 : index
      %300 = vector.load %arg3[%c0_105, %c0_106] : memref<32x128xf32, #tpu.memory_space<vmem>>, vector<32x128xf32>
      %301 = arith.addf %299, %300 : vector<32x128xf32>
      %cst_107 = arith.constant dense<0.000000e+00> : vector<32xf32>
      %302 = vector.multi_reduction <add>, %301, %cst_107 [1] : vector<32x128xf32> to vector<32xf32>
      %303 = vector.shape_cast %302 : vector<32xf32> to vector<32x1xf32>
      %304 = arith.mulf %301, %301 : vector<32x128xf32>
      %cst_108 = arith.constant dense<0.000000e+00> : vector<32xf32>
      %305 = vector.multi_reduction <add>, %304, %cst_108 [1] : vector<32x128xf32> to vector<32xf32>
      %306 = vector.shape_cast %305 : vector<32xf32> to vector<32x1xf32>
      %cst_109 = arith.constant 7.812500e-03 : f32
      %307 = vector.broadcast %cst_109 : f32 to vector<32x1xf32>
      %308 = arith.mulf %303, %307 : vector<32x1xf32>
      %cst_110 = arith.constant 7.812500e-03 : f32
      %309 = vector.broadcast %cst_110 : f32 to vector<32x1xf32>
      %310 = arith.mulf %306, %309 : vector<32x1xf32>
      %311 = arith.mulf %308, %308 : vector<32x1xf32>
      %312 = arith.subf %310, %311 : vector<32x1xf32>
      %313 = vector.broadcast %308 : vector<32x1xf32> to vector<32x128xf32>
      %314 = arith.subf %301, %313 : vector<32x128xf32>
      %cst_111 = arith.constant 9.99999974E-6 : f32
      %315 = vector.broadcast %cst_111 : f32 to vector<32x1xf32>
      %316 = arith.addf %312, %315 : vector<32x1xf32>
      %317 = math.rsqrt %316 : vector<32x1xf32>
      %318 = vector.broadcast %317 : vector<32x1xf32> to vector<32x128xf32>
      %319 = arith.mulf %314, %318 : vector<32x128xf32>
      %c0_112 = arith.constant 0 : index
      %c0_113 = arith.constant 0 : index
      %320 = vector.load %arg4[%c0_112, %c0_113] : memref<1x128xf32, #tpu.memory_space<vmem>>, vector<1x128xf32>
      %321 = vector.broadcast %320 : vector<1x128xf32> to vector<32x128xf32>
      %322 = arith.mulf %319, %321 : vector<32x128xf32>
      %c0_114 = arith.constant 0 : index
      %c0_115 = arith.constant 0 : index
      %323 = vector.load %arg5[%c0_114, %c0_115] : memref<1x128xf32, #tpu.memory_space<vmem>>, vector<1x128xf32>
      %324 = vector.broadcast %323 : vector<1x128xf32> to vector<32x128xf32>
      %325 = arith.addf %322, %324 : vector<32x128xf32>
      %c0_116 = arith.constant 0 : index
      %c0_117 = arith.constant 0 : index
      %326 = vector.load %arg14[%c0_116, %c0_117] : memref<64x128xf32, #tpu.memory_space<vmem>>, vector<32x128xf32>
      tpu.vector_store %arg14[%c0_116, %c0_117], %325 {strides = array<i32>} : memref<64x128xf32, #tpu.memory_space<vmem>>, vector<32x128xf32>,
      %327 = vector.extract_strided_slice %298 {offsets = [32, 0], sizes = [32, 128], strides = [1, 1]} : vector<64x128xf32> to vector<32x128xf32>
      %c0_118 = arith.constant 0 : index
      %c0_119 = arith.constant 0 : index
      %328 = vector.load %arg3[%c0_118, %c0_119] : memref<32x128xf32, #tpu.memory_space<vmem>>, vector<32x128xf32>
      %329 = arith.addf %327, %328 : vector<32x128xf32>
      %cst_120 = arith.constant dense<0.000000e+00> : vector<32xf32>
      %330 = vector.multi_reduction <add>, %329, %cst_120 [1] : vector<32x128xf32> to vector<32xf32>
      %331 = vector.shape_cast %330 : vector<32xf32> to vector<32x1xf32>
      %332 = arith.mulf %329, %329 : vector<32x128xf32>
      %cst_121 = arith.constant dense<0.000000e+00> : vector<32xf32>
      %333 = vector.multi_reduction <add>, %332, %cst_121 [1] : vector<32x128xf32> to vector<32xf32>
      %334 = vector.shape_cast %333 : vector<32xf32> to vector<32x1xf32>
      %cst_122 = arith.constant 7.812500e-03 : f32
      %335 = vector.broadcast %cst_122 : f32 to vector<32x1xf32>
      %336 = arith.mulf %331, %335 : vector<32x1xf32>
      %cst_123 = arith.constant 7.812500e-03 : f32
      %337 = vector.broadcast %cst_123 : f32 to vector<32x1xf32>
      %338 = arith.mulf %334, %337 : vector<32x1xf32>
      %339 = arith.mulf %336, %336 : vector<32x1xf32>
      %340 = arith.subf %338, %339 : vector<32x1xf32>
      %341 = vector.broadcast %336 : vector<32x1xf32> to vector<32x128xf32>
      %342 = arith.subf %329, %341 : vector<32x128xf32>
      %cst_124 = arith.constant 9.99999974E-6 : f32
      %343 = vector.broadcast %cst_124 : f32 to vector<32x1xf32>
      %344 = arith.addf %340, %343 : vector<32x1xf32>
      %345 = math.rsqrt %344 : vector<32x1xf32>
      %346 = vector.broadcast %345 : vector<32x1xf32> to vector<32x128xf32>
      %347 = arith.mulf %342, %346 : vector<32x128xf32>
      %c0_125 = arith.constant 0 : index
      %c0_126 = arith.constant 0 : index
      %348 = vector.load %arg4[%c0_125, %c0_126] : memref<1x128xf32, #tpu.memory_space<vmem>>, vector<1x128xf32>
      %349 = vector.broadcast %348 : vector<1x128xf32> to vector<32x128xf32>
      %350 = arith.mulf %347, %349 : vector<32x128xf32>
      %c0_127 = arith.constant 0 : index
      %c0_128 = arith.constant 0 : index
      %351 = vector.load %arg5[%c0_127, %c0_128] : memref<1x128xf32, #tpu.memory_space<vmem>>, vector<1x128xf32>
      %352 = vector.broadcast %351 : vector<1x128xf32> to vector<32x128xf32>
      %353 = arith.addf %350, %352 : vector<32x128xf32>
      %c32_129 = arith.constant 32 : index
      %c0_130 = arith.constant 0 : index
      %354 = vector.load %arg14[%c32_129, %c0_130] : memref<64x128xf32, #tpu.memory_space<vmem>>, vector<32x128xf32>
      tpu.vector_store %arg14[%c32_129, %c0_130], %353 {strides = array<i32>} : memref<64x128xf32, #tpu.memory_space<vmem>>, vector<32x128xf32>,
    } else {
    }
    %c0 = arith.constant 0 : index
    %c0_1 = arith.constant 0 : index
    %3 = vector.load %arg14[%c0, %c0_1] : memref<64x128xf32, #tpu.memory_space<vmem>>, vector<64x128xf32>
    %cst = arith.constant dense<0.000000e+00> : vector<64xf32>
    %4 = vector.multi_reduction <add>, %3, %cst [1] : vector<64x128xf32> to vector<64xf32>
    %5 = vector.shape_cast %4 : vector<64xf32> to vector<64x1xf32>
    %6 = arith.mulf %3, %3 : vector<64x128xf32>
    %cst_2 = arith.constant dense<0.000000e+00> : vector<64xf32>
    %7 = vector.multi_reduction <add>, %6, %cst_2 [1] : vector<64x128xf32> to vector<64xf32>
    %8 = vector.shape_cast %7 : vector<64xf32> to vector<64x1xf32>
    %cst_3 = arith.constant 7.812500e-03 : f32
    %9 = vector.broadcast %cst_3 : f32 to vector<64x1xf32>
    %10 = arith.mulf %5, %9 : vector<64x1xf32>
    %cst_4 = arith.constant 7.812500e-03 : f32
    %11 = vector.broadcast %cst_4 : f32 to vector<64x1xf32>
    %12 = arith.mulf %8, %11 : vector<64x1xf32>
    %13 = arith.mulf %10, %10 : vector<64x1xf32>
    %14 = arith.subf %12, %13 : vector<64x1xf32>
    %15 = vector.broadcast %10 : vector<64x1xf32> to vector<64x128xf32>
    %16 = arith.subf %3, %15 : vector<64x128xf32>
    %cst_5 = arith.constant 9.99999974E-6 : f32
    %17 = vector.broadcast %cst_5 : f32 to vector<64x1xf32>
    %18 = arith.addf %14, %17 : vector<64x1xf32>
    %19 = math.rsqrt %18 : vector<64x1xf32>
    %20 = vector.broadcast %19 : vector<64x1xf32> to vector<64x128xf32>
    %21 = arith.mulf %16, %20 : vector<64x128xf32>
    %22 = arith.truncf %21 : vector<64x128xf32> to vector<64x128xbf16>
    %c0_6 = arith.constant 0 : index
    %c0_7 = arith.constant 0 : index
    %c0_8 = arith.constant 0 : index
    %23 = vector.load %arg6[%c0_6, %c0_7, %c0_8] : memref<1x128x1536xbf16, #tpu.memory_space<vmem>>, vector<1x128x1536xbf16>
    %24 = vector.shape_cast %23 : vector<1x128x1536xbf16> to vector<128x1536xbf16>
    %cst_9 = arith.constant dense<0.000000e+00> : vector<64x1536xf32>
    %25 = tpu.matmul %22, %24, %cst_9 {dimension_numbers = #tpu.dot_dimension_numbers<[1], [0], [0], [1], [0, 0, 1, 1], [], []>} : vector<64x128xbf16>, vector<128x1536xbf16>, vector<64x1536xf32> -> vector<64x1536xf32>
    %c0_10 = arith.constant 0 : index
    %c0_11 = arith.constant 0 : index
    %c0_12 = arith.constant 0 : index
    %26 = vector.load %arg7[%c0_10, %c0_11, %c0_12] : memref<1x1x1536xf32, #tpu.memory_space<vmem>>, vector<1x1x1536xf32>
    %27 = vector.shape_cast %26 : vector<1x1x1536xf32> to vector<1x1536xf32>
    %28 = vector.broadcast %27 : vector<1x1536xf32> to vector<64x1536xf32>
    %29 = arith.addf %25, %28 : vector<64x1536xf32>
    %30 = tpu.iota {dimensions = array<i32: 1>} : vector<32x32xi32>
    %c17_i32 = arith.constant 17 : i32
    %31 = vector.broadcast %c17_i32 : i32 to vector<32x32xi32>
    %32 = arith.cmpi slt, %30, %31 : vector<32x32xi32>
    %c0_13 = arith.constant 0 : index
    %c0_14 = arith.constant 0 : index
    %c0_15 = arith.constant 0 : index
    %33 = vector.load %arg8[%c0_13, %c0_14, %c0_15] : memref<1x512x128xbf16, #tpu.memory_space<vmem>>, vector<1x512x128xbf16>
    %34 = vector.shape_cast %33 : vector<1x512x128xbf16> to vector<512x128xbf16>
    %cst_16 = arith.constant 0.000000e+00 : f32
    %35 = vector.broadcast %cst_16 : f32 to vector<32x128xf32>
    %36 = vector.extract_strided_slice %29 {offsets = [0, 0], sizes = [32, 128], strides = [1, 1]} : vector<64x1536xf32> to vector<32x128xf32>
    %37 = arith.truncf %36 : vector<32x128xf32> to vector<32x128xbf16>
    %38 = vector.extract_strided_slice %29 {offsets = [0, 128], sizes = [32, 128], strides = [1, 1]} : vector<64x1536xf32> to vector<32x128xf32>
    %39 = arith.truncf %38 : vector<32x128xf32> to vector<32x128xbf16>
    %40 = vector.extract_strided_slice %29 {offsets = [0, 256], sizes = [32, 128], strides = [1, 1]} : vector<64x1536xf32> to vector<32x128xf32>
    %41 = arith.truncf %40 : vector<32x128xf32> to vector<32x128xbf16>
    %cst_17 = arith.constant dense<0.000000e+00> : vector<32x32xf32>
    %42 = tpu.matmul %37, %39, %cst_17 {dimension_numbers = #tpu.dot_dimension_numbers<[1], [1], [0], [0], [0, 0, 1, 0], [], []>} : vector<32x128xbf16>, vector<32x128xbf16>, vector<32x32xf32> -> vector<32x32xf32>
    %cst_18 = arith.constant -1.000000e+30 : f32
    %43 = vector.broadcast %cst_18 : f32 to vector<32x32xf32>
    %44 = arith.select %32, %42, %43 : vector<32x32xi1>, vector<32x32xf32>
    %cst_19 = arith.constant dense<0xFF800000> : vector<32xf32>
    %45 = vector.multi_reduction <maximumf>, %44, %cst_19 [1] : vector<32x32xf32> to vector<32xf32>
    %46 = vector.shape_cast %45 : vector<32xf32> to vector<32x1xf32>
    %47 = vector.broadcast %46 : vector<32x1xf32> to vector<32x32xf32>
    %48 = arith.subf %44, %47 : vector<32x32xf32>
    %49 = math.exp %48 : vector<32x32xf32>
    %cst_20 = arith.constant dense<0.000000e+00> : vector<32xf32>
    %50 = vector.multi_reduction <add>, %49, %cst_20 [1] : vector<32x32xf32> to vector<32xf32>
    %51 = vector.shape_cast %50 : vector<32xf32> to vector<32x1xf32>
    %52 = tpu.reciprocal %51 {approx = true} : vector<32x1xf32> -> vector<32x1xf32>
    %53 = vector.broadcast %52 : vector<32x1xf32> to vector<32x32xf32>
    %54 = arith.mulf %49, %53 : vector<32x32xf32>
    %55 = arith.truncf %54 : vector<32x32xf32> to vector<32x32xbf16>
    %cst_21 = arith.constant dense<0.000000e+00> : vector<32x128xf32>
    %56 = tpu.matmul %55, %41, %cst_21 {dimension_numbers = #tpu.dot_dimension_numbers<[1], [0], [0], [1], [0, 0, 1, 1], [], []>} : vector<32x32xbf16>, vector<32x128xbf16>, vector<32x128xf32> -> vector<32x128xf32>
    %57 = arith.truncf %56 : vector<32x128xf32> to vector<32x128xbf16>
    %58 = vector.extract_strided_slice %34 {offsets = [0, 0], sizes = [128, 128], strides = [1, 1]} : vector<512x128xbf16> to vector<128x128xbf16>
    %cst_22 = arith.constant dense<0.000000e+00> : vector<32x128xf32>
    %59 = tpu.matmul %57, %58, %cst_22 {dimension_numbers = #tpu.dot_dimension_numbers<[1], [0], [0], [1], [0, 0, 1, 1], [], []>} : vector<32x128xbf16>, vector<128x128xbf16>, vector<32x128xf32> -> vector<32x128xf32>
    %60 = arith.addf %35, %59 : vector<32x128xf32>
    %61 = vector.extract_strided_slice %29 {offsets = [0, 384], sizes = [32, 128], strides = [1, 1]} : vector<64x1536xf32> to vector<32x128xf32>
    %62 = arith.truncf %61 : vector<32x128xf32> to vector<32x128xbf16>
    %63 = vector.extract_strided_slice %29 {offsets = [0, 512], sizes = [32, 128], strides = [1, 1]} : vector<64x1536xf32> to vector<32x128xf32>
    %64 = arith.truncf %63 : vector<32x128xf32> to vector<32x128xbf16>
    %65 = vector.extract_strided_slice %29 {offsets = [0, 640], sizes = [32, 128], strides = [1, 1]} : vector<64x1536xf32> to vector<32x128xf32>
    %66 = arith.truncf %65 : vector<32x128xf32> to vector<32x128xbf16>
    %cst_23 = arith.constant dense<0.000000e+00> : vector<32x32xf32>
    %67 = tpu.matmul %62, %64, %cst_23 {dimension_numbers = #tpu.dot_dimension_numbers<[1], [1], [0], [0], [0, 0, 1, 0], [], []>} : vector<32x128xbf16>, vector<32x128xbf16>, vector<32x32xf32> -> vector<32x32xf32>
    %cst_24 = arith.constant -1.000000e+30 : f32
    %68 = vector.broadcast %cst_24 : f32 to vector<32x32xf32>
    %69 = arith.select %32, %67, %68 : vector<32x32xi1>, vector<32x32xf32>
    %cst_25 = arith.constant dense<0xFF800000> : vector<32xf32>
    %70 = vector.multi_reduction <maximumf>, %69, %cst_25 [1] : vector<32x32xf32> to vector<32xf32>
    %71 = vector.shape_cast %70 : vector<32xf32> to vector<32x1xf32>
    %72 = vector.broadcast %71 : vector<32x1xf32> to vector<32x32xf32>
    %73 = arith.subf %69, %72 : vector<32x32xf32>
    %74 = math.exp %73 : vector<32x32xf32>
    %cst_26 = arith.constant dense<0.000000e+00> : vector<32xf32>
    %75 = vector.multi_reduction <add>, %74, %cst_26 [1] : vector<32x32xf32> to vector<32xf32>
    %76 = vector.shape_cast %75 : vector<32xf32> to vector<32x1xf32>
    %77 = tpu.reciprocal %76 {approx = true} : vector<32x1xf32> -> vector<32x1xf32>
    %78 = vector.broadcast %77 : vector<32x1xf32> to vector<32x32xf32>
    %79 = arith.mulf %74, %78 : vector<32x32xf32>
    %80 = arith.truncf %79 : vector<32x32xf32> to vector<32x32xbf16>
    %cst_27 = arith.constant dense<0.000000e+00> : vector<32x128xf32>
    %81 = tpu.matmul %80, %66, %cst_27 {dimension_numbers = #tpu.dot_dimension_numbers<[1], [0], [0], [1], [0, 0, 1, 1], [], []>} : vector<32x32xbf16>, vector<32x128xbf16>, vector<32x128xf32> -> vector<32x128xf32>
    %82 = arith.truncf %81 : vector<32x128xf32> to vector<32x128xbf16>
    %83 = vector.extract_strided_slice %34 {offsets = [128, 0], sizes = [128, 128], strides = [1, 1]} : vector<512x128xbf16> to vector<128x128xbf16>
    %cst_28 = arith.constant dense<0.000000e+00> : vector<32x128xf32>
    %84 = tpu.matmul %82, %83, %cst_28 {dimension_numbers = #tpu.dot_dimension_numbers<[1], [0], [0], [1], [0, 0, 1, 1], [], []>} : vector<32x128xbf16>, vector<128x128xbf16>, vector<32x128xf32> -> vector<32x128xf32>
    %85 = arith.addf %60, %84 : vector<32x128xf32>
    %86 = vector.extract_strided_slice %29 {offsets = [0, 768], sizes = [32, 128], strides = [1, 1]} : vector<64x1536xf32> to vector<32x128xf32>
    %87 = arith.truncf %86 : vector<32x128xf32> to vector<32x128xbf16>
    %88 = vector.extract_strided_slice %29 {offsets = [0, 896], sizes = [32, 128], strides = [1, 1]} : vector<64x1536xf32> to vector<32x128xf32>
    %89 = arith.truncf %88 : vector<32x128xf32> to vector<32x128xbf16>
    %90 = vector.extract_strided_slice %29 {offsets = [0, 1024], sizes = [32, 128], strides = [1, 1]} : vector<64x1536xf32> to vector<32x128xf32>
    %91 = arith.truncf %90 : vector<32x128xf32> to vector<32x128xbf16>
    %cst_29 = arith.constant dense<0.000000e+00> : vector<32x32xf32>
    %92 = tpu.matmul %87, %89, %cst_29 {dimension_numbers = #tpu.dot_dimension_numbers<[1], [1], [0], [0], [0, 0, 1, 0], [], []>} : vector<32x128xbf16>, vector<32x128xbf16>, vector<32x32xf32> -> vector<32x32xf32>
    %cst_30 = arith.constant -1.000000e+30 : f32
    %93 = vector.broadcast %cst_30 : f32 to vector<32x32xf32>
    %94 = arith.select %32, %92, %93 : vector<32x32xi1>, vector<32x32xf32>
    %cst_31 = arith.constant dense<0xFF800000> : vector<32xf32>
    %95 = vector.multi_reduction <maximumf>, %94, %cst_31 [1] : vector<32x32xf32> to vector<32xf32>
    %96 = vector.shape_cast %95 : vector<32xf32> to vector<32x1xf32>
    %97 = vector.broadcast %96 : vector<32x1xf32> to vector<32x32xf32>
    %98 = arith.subf %94, %97 : vector<32x32xf32>
    %99 = math.exp %98 : vector<32x32xf32>
    %cst_32 = arith.constant dense<0.000000e+00> : vector<32xf32>
    %100 = vector.multi_reduction <add>, %99, %cst_32 [1] : vector<32x32xf32> to vector<32xf32>
    %101 = vector.shape_cast %100 : vector<32xf32> to vector<32x1xf32>
    %102 = tpu.reciprocal %101 {approx = true} : vector<32x1xf32> -> vector<32x1xf32>
    %103 = vector.broadcast %102 : vector<32x1xf32> to vector<32x32xf32>
    %104 = arith.mulf %99, %103 : vector<32x32xf32>
    %105 = arith.truncf %104 : vector<32x32xf32> to vector<32x32xbf16>
    %cst_33 = arith.constant dense<0.000000e+00> : vector<32x128xf32>
    %106 = tpu.matmul %105, %91, %cst_33 {dimension_numbers = #tpu.dot_dimension_numbers<[1], [0], [0], [1], [0, 0, 1, 1], [], []>} : vector<32x32xbf16>, vector<32x128xbf16>, vector<32x128xf32> -> vector<32x128xf32>
    %107 = arith.truncf %106 : vector<32x128xf32> to vector<32x128xbf16>
    %108 = vector.extract_strided_slice %34 {offsets = [256, 0], sizes = [128, 128], strides = [1, 1]} : vector<512x128xbf16> to vector<128x128xbf16>
    %cst_34 = arith.constant dense<0.000000e+00> : vector<32x128xf32>
    %109 = tpu.matmul %107, %108, %cst_34 {dimension_numbers = #tpu.dot_dimension_numbers<[1], [0], [0], [1], [0, 0, 1, 1], [], []>} : vector<32x128xbf16>, vector<128x128xbf16>, vector<32x128xf32> -> vector<32x128xf32>
    %110 = arith.addf %85, %109 : vector<32x128xf32>
    %111 = vector.extract_strided_slice %29 {offsets = [0, 1152], sizes = [32, 128], strides = [1, 1]} : vector<64x1536xf32> to vector<32x128xf32>
    %112 = arith.truncf %111 : vector<32x128xf32> to vector<32x128xbf16>
    %113 = vector.extract_strided_slice %29 {offsets = [0, 1280], sizes = [32, 128], strides = [1, 1]} : vector<64x1536xf32> to vector<32x128xf32>
    %114 = arith.truncf %113 : vector<32x128xf32> to vector<32x128xbf16>
    %115 = vector.extract_strided_slice %29 {offsets = [0, 1408], sizes = [32, 128], strides = [1, 1]} : vector<64x1536xf32> to vector<32x128xf32>
    %116 = arith.truncf %115 : vector<32x128xf32> to vector<32x128xbf16>
    %cst_35 = arith.constant dense<0.000000e+00> : vector<32x32xf32>
    %117 = tpu.matmul %112, %114, %cst_35 {dimension_numbers = #tpu.dot_dimension_numbers<[1], [1], [0], [0], [0, 0, 1, 0], [], []>} : vector<32x128xbf16>, vector<32x128xbf16>, vector<32x32xf32> -> vector<32x32xf32>
    %cst_36 = arith.constant -1.000000e+30 : f32
    %118 = vector.broadcast %cst_36 : f32 to vector<32x32xf32>
    %119 = arith.select %32, %117, %118 : vector<32x32xi1>, vector<32x32xf32>
    %cst_37 = arith.constant dense<0xFF800000> : vector<32xf32>
    %120 = vector.multi_reduction <maximumf>, %119, %cst_37 [1] : vector<32x32xf32> to vector<32xf32>
    %121 = vector.shape_cast %120 : vector<32xf32> to vector<32x1xf32>
    %122 = vector.broadcast %121 : vector<32x1xf32> to vector<32x32xf32>
    %123 = arith.subf %119, %122 : vector<32x32xf32>
    %124 = math.exp %123 : vector<32x32xf32>
    %cst_38 = arith.constant dense<0.000000e+00> : vector<32xf32>
    %125 = vector.multi_reduction <add>, %124, %cst_38 [1] : vector<32x32xf32> to vector<32xf32>
    %126 = vector.shape_cast %125 : vector<32xf32> to vector<32x1xf32>
    %127 = tpu.reciprocal %126 {approx = true} : vector<32x1xf32> -> vector<32x1xf32>
    %128 = vector.broadcast %127 : vector<32x1xf32> to vector<32x32xf32>
    %129 = arith.mulf %124, %128 : vector<32x32xf32>
    %130 = arith.truncf %129 : vector<32x32xf32> to vector<32x32xbf16>
    %cst_39 = arith.constant dense<0.000000e+00> : vector<32x128xf32>
    %131 = tpu.matmul %130, %116, %cst_39 {dimension_numbers = #tpu.dot_dimension_numbers<[1], [0], [0], [1], [0, 0, 1, 1], [], []>} : vector<32x32xbf16>, vector<32x128xbf16>, vector<32x128xf32> -> vector<32x128xf32>
    %132 = arith.truncf %131 : vector<32x128xf32> to vector<32x128xbf16>
    %133 = vector.extract_strided_slice %34 {offsets = [384, 0], sizes = [128, 128], strides = [1, 1]} : vector<512x128xbf16> to vector<128x128xbf16>
    %cst_40 = arith.constant dense<0.000000e+00> : vector<32x128xf32>
    %134 = tpu.matmul %132, %133, %cst_40 {dimension_numbers = #tpu.dot_dimension_numbers<[1], [0], [0], [1], [0, 0, 1, 1], [], []>} : vector<32x128xbf16>, vector<128x128xbf16>, vector<32x128xf32> -> vector<32x128xf32>
    %135 = arith.addf %110, %134 : vector<32x128xf32>
    %136 = vector.extract_strided_slice %3 {offsets = [0, 0], sizes = [32, 128], strides = [1, 1]} : vector<64x128xf32> to vector<32x128xf32>
    %137 = arith.addf %136, %135 : vector<32x128xf32>
    %c0_41 = arith.constant 0 : index
    %c0_42 = arith.constant 0 : index
    %c0_43 = arith.constant 0 : index
    %138 = vector.load %arg9[%c0_41, %c0_42, %c0_43] : memref<1x1x128xf32, #tpu.memory_space<vmem>>, vector<1x1x128xf32>
    %139 = vector.shape_cast %138 : vector<1x1x128xf32> to vector<1x128xf32>
    %140 = vector.broadcast %139 : vector<1x128xf32> to vector<32x128xf32>
    %141 = arith.addf %137, %140 : vector<32x128xf32>
    %c0_44 = arith.constant 0 : index
    %c0_45 = arith.constant 0 : index
    %142 = vector.load %arg14[%c0_44, %c0_45] : memref<64x128xf32, #tpu.memory_space<vmem>>, vector<32x128xf32>
    tpu.vector_store %arg14[%c0_44, %c0_45], %141 {strides = array<i32>} : memref<64x128xf32, #tpu.memory_space<vmem>>, vector<32x128xf32>,
    %cst_46 = arith.constant 0.000000e+00 : f32
    %143 = vector.broadcast %cst_46 : f32 to vector<32x128xf32>
    %144 = vector.extract_strided_slice %29 {offsets = [32, 0], sizes = [32, 128], strides = [1, 1]} : vector<64x1536xf32> to vector<32x128xf32>
    %145 = arith.truncf %144 : vector<32x128xf32> to vector<32x128xbf16>
    %146 = vector.extract_strided_slice %29 {offsets = [32, 128], sizes = [32, 128], strides = [1, 1]} : vector<64x1536xf32> to vector<32x128xf32>
    %147 = arith.truncf %146 : vector<32x128xf32> to vector<32x128xbf16>
    %148 = vector.extract_strided_slice %29 {offsets = [32, 256], sizes = [32, 128], strides = [1, 1]} : vector<64x1536xf32> to vector<32x128xf32>
    %149 = arith.truncf %148 : vector<32x128xf32> to vector<32x128xbf16>
    %cst_47 = arith.constant dense<0.000000e+00> : vector<32x32xf32>
    %150 = tpu.matmul %145, %147, %cst_47 {dimension_numbers = #tpu.dot_dimension_numbers<[1], [1], [0], [0], [0, 0, 1, 0], [], []>} : vector<32x128xbf16>, vector<32x128xbf16>, vector<32x32xf32> -> vector<32x32xf32>
    %cst_48 = arith.constant -1.000000e+30 : f32
    %151 = vector.broadcast %cst_48 : f32 to vector<32x32xf32>
    %152 = arith.select %32, %150, %151 : vector<32x32xi1>, vector<32x32xf32>
    %cst_49 = arith.constant dense<0xFF800000> : vector<32xf32>
    %153 = vector.multi_reduction <maximumf>, %152, %cst_49 [1] : vector<32x32xf32> to vector<32xf32>
    %154 = vector.shape_cast %153 : vector<32xf32> to vector<32x1xf32>
    %155 = vector.broadcast %154 : vector<32x1xf32> to vector<32x32xf32>
    %156 = arith.subf %152, %155 : vector<32x32xf32>
    %157 = math.exp %156 : vector<32x32xf32>
    %cst_50 = arith.constant dense<0.000000e+00> : vector<32xf32>
    %158 = vector.multi_reduction <add>, %157, %cst_50 [1] : vector<32x32xf32> to vector<32xf32>
    %159 = vector.shape_cast %158 : vector<32xf32> to vector<32x1xf32>
    %160 = tpu.reciprocal %159 {approx = true} : vector<32x1xf32> -> vector<32x1xf32>
    %161 = vector.broadcast %160 : vector<32x1xf32> to vector<32x32xf32>
    %162 = arith.mulf %157, %161 : vector<32x32xf32>
    %163 = arith.truncf %162 : vector<32x32xf32> to vector<32x32xbf16>
    %cst_51 = arith.constant dense<0.000000e+00> : vector<32x128xf32>
    %164 = tpu.matmul %163, %149, %cst_51 {dimension_numbers = #tpu.dot_dimension_numbers<[1], [0], [0], [1], [0, 0, 1, 1], [], []>} : vector<32x32xbf16>, vector<32x128xbf16>, vector<32x128xf32> -> vector<32x128xf32>
    %165 = arith.truncf %164 : vector<32x128xf32> to vector<32x128xbf16>
    %166 = vector.extract_strided_slice %34 {offsets = [0, 0], sizes = [128, 128], strides = [1, 1]} : vector<512x128xbf16> to vector<128x128xbf16>
    %cst_52 = arith.constant dense<0.000000e+00> : vector<32x128xf32>
    %167 = tpu.matmul %165, %166, %cst_52 {dimension_numbers = #tpu.dot_dimension_numbers<[1], [0], [0], [1], [0, 0, 1, 1], [], []>} : vector<32x128xbf16>, vector<128x128xbf16>, vector<32x128xf32> -> vector<32x128xf32>
    %168 = arith.addf %143, %167 : vector<32x128xf32>
    %169 = vector.extract_strided_slice %29 {offsets = [32, 384], sizes = [32, 128], strides = [1, 1]} : vector<64x1536xf32> to vector<32x128xf32>
    %170 = arith.truncf %169 : vector<32x128xf32> to vector<32x128xbf16>
    %171 = vector.extract_strided_slice %29 {offsets = [32, 512], sizes = [32, 128], strides = [1, 1]} : vector<64x1536xf32> to vector<32x128xf32>
    %172 = arith.truncf %171 : vector<32x128xf32> to vector<32x128xbf16>
    %173 = vector.extract_strided_slice %29 {offsets = [32, 640], sizes = [32, 128], strides = [1, 1]} : vector<64x1536xf32> to vector<32x128xf32>
    %174 = arith.truncf %173 : vector<32x128xf32> to vector<32x128xbf16>
    %cst_53 = arith.constant dense<0.000000e+00> : vector<32x32xf32>
    %175 = tpu.matmul %170, %172, %cst_53 {dimension_numbers = #tpu.dot_dimension_numbers<[1], [1], [0], [0], [0, 0, 1, 0], [], []>} : vector<32x128xbf16>, vector<32x128xbf16>, vector<32x32xf32> -> vector<32x32xf32>
    %cst_54 = arith.constant -1.000000e+30 : f32
    %176 = vector.broadcast %cst_54 : f32 to vector<32x32xf32>
    %177 = arith.select %32, %175, %176 : vector<32x32xi1>, vector<32x32xf32>
    %cst_55 = arith.constant dense<0xFF800000> : vector<32xf32>
    %178 = vector.multi_reduction <maximumf>, %177, %cst_55 [1] : vector<32x32xf32> to vector<32xf32>
    %179 = vector.shape_cast %178 : vector<32xf32> to vector<32x1xf32>
    %180 = vector.broadcast %179 : vector<32x1xf32> to vector<32x32xf32>
    %181 = arith.subf %177, %180 : vector<32x32xf32>
    %182 = math.exp %181 : vector<32x32xf32>
    %cst_56 = arith.constant dense<0.000000e+00> : vector<32xf32>
    %183 = vector.multi_reduction <add>, %182, %cst_56 [1] : vector<32x32xf32> to vector<32xf32>
    %184 = vector.shape_cast %183 : vector<32xf32> to vector<32x1xf32>
    %185 = tpu.reciprocal %184 {approx = true} : vector<32x1xf32> -> vector<32x1xf32>
    %186 = vector.broadcast %185 : vector<32x1xf32> to vector<32x32xf32>
    %187 = arith.mulf %182, %186 : vector<32x32xf32>
    %188 = arith.truncf %187 : vector<32x32xf32> to vector<32x32xbf16>
    %cst_57 = arith.constant dense<0.000000e+00> : vector<32x128xf32>
    %189 = tpu.matmul %188, %174, %cst_57 {dimension_numbers = #tpu.dot_dimension_numbers<[1], [0], [0], [1], [0, 0, 1, 1], [], []>} : vector<32x32xbf16>, vector<32x128xbf16>, vector<32x128xf32> -> vector<32x128xf32>
    %190 = arith.truncf %189 : vector<32x128xf32> to vector<32x128xbf16>
    %191 = vector.extract_strided_slice %34 {offsets = [128, 0], sizes = [128, 128], strides = [1, 1]} : vector<512x128xbf16> to vector<128x128xbf16>
    %cst_58 = arith.constant dense<0.000000e+00> : vector<32x128xf32>
    %192 = tpu.matmul %190, %191, %cst_58 {dimension_numbers = #tpu.dot_dimension_numbers<[1], [0], [0], [1], [0, 0, 1, 1], [], []>} : vector<32x128xbf16>, vector<128x128xbf16>, vector<32x128xf32> -> vector<32x128xf32>
    %193 = arith.addf %168, %192 : vector<32x128xf32>
    %194 = vector.extract_strided_slice %29 {offsets = [32, 768], sizes = [32, 128], strides = [1, 1]} : vector<64x1536xf32> to vector<32x128xf32>
    %195 = arith.truncf %194 : vector<32x128xf32> to vector<32x128xbf16>
    %196 = vector.extract_strided_slice %29 {offsets = [32, 896], sizes = [32, 128], strides = [1, 1]} : vector<64x1536xf32> to vector<32x128xf32>
    %197 = arith.truncf %196 : vector<32x128xf32> to vector<32x128xbf16>
    %198 = vector.extract_strided_slice %29 {offsets = [32, 1024], sizes = [32, 128], strides = [1, 1]} : vector<64x1536xf32> to vector<32x128xf32>
    %199 = arith.truncf %198 : vector<32x128xf32> to vector<32x128xbf16>
    %cst_59 = arith.constant dense<0.000000e+00> : vector<32x32xf32>
    %200 = tpu.matmul %195, %197, %cst_59 {dimension_numbers = #tpu.dot_dimension_numbers<[1], [1], [0], [0], [0, 0, 1, 0], [], []>} : vector<32x128xbf16>, vector<32x128xbf16>, vector<32x32xf32> -> vector<32x32xf32>
    %cst_60 = arith.constant -1.000000e+30 : f32
    %201 = vector.broadcast %cst_60 : f32 to vector<32x32xf32>
    %202 = arith.select %32, %200, %201 : vector<32x32xi1>, vector<32x32xf32>
    %cst_61 = arith.constant dense<0xFF800000> : vector<32xf32>
    %203 = vector.multi_reduction <maximumf>, %202, %cst_61 [1] : vector<32x32xf32> to vector<32xf32>
    %204 = vector.shape_cast %203 : vector<32xf32> to vector<32x1xf32>
    %205 = vector.broadcast %204 : vector<32x1xf32> to vector<32x32xf32>
    %206 = arith.subf %202, %205 : vector<32x32xf32>
    %207 = math.exp %206 : vector<32x32xf32>
    %cst_62 = arith.constant dense<0.000000e+00> : vector<32xf32>
    %208 = vector.multi_reduction <add>, %207, %cst_62 [1] : vector<32x32xf32> to vector<32xf32>
    %209 = vector.shape_cast %208 : vector<32xf32> to vector<32x1xf32>
    %210 = tpu.reciprocal %209 {approx = true} : vector<32x1xf32> -> vector<32x1xf32>
    %211 = vector.broadcast %210 : vector<32x1xf32> to vector<32x32xf32>
    %212 = arith.mulf %207, %211 : vector<32x32xf32>
    %213 = arith.truncf %212 : vector<32x32xf32> to vector<32x32xbf16>
    %cst_63 = arith.constant dense<0.000000e+00> : vector<32x128xf32>
    %214 = tpu.matmul %213, %199, %cst_63 {dimension_numbers = #tpu.dot_dimension_numbers<[1], [0], [0], [1], [0, 0, 1, 1], [], []>} : vector<32x32xbf16>, vector<32x128xbf16>, vector<32x128xf32> -> vector<32x128xf32>
    %215 = arith.truncf %214 : vector<32x128xf32> to vector<32x128xbf16>
    %216 = vector.extract_strided_slice %34 {offsets = [256, 0], sizes = [128, 128], strides = [1, 1]} : vector<512x128xbf16> to vector<128x128xbf16>
    %cst_64 = arith.constant dense<0.000000e+00> : vector<32x128xf32>
    %217 = tpu.matmul %215, %216, %cst_64 {dimension_numbers = #tpu.dot_dimension_numbers<[1], [0], [0], [1], [0, 0, 1, 1], [], []>} : vector<32x128xbf16>, vector<128x128xbf16>, vector<32x128xf32> -> vector<32x128xf32>
    %218 = arith.addf %193, %217 : vector<32x128xf32>
    %219 = vector.extract_strided_slice %29 {offsets = [32, 1152], sizes = [32, 128], strides = [1, 1]} : vector<64x1536xf32> to vector<32x128xf32>
    %220 = arith.truncf %219 : vector<32x128xf32> to vector<32x128xbf16>
    %221 = vector.extract_strided_slice %29 {offsets = [32, 1280], sizes = [32, 128], strides = [1, 1]} : vector<64x1536xf32> to vector<32x128xf32>
    %222 = arith.truncf %221 : vector<32x128xf32> to vector<32x128xbf16>
    %223 = vector.extract_strided_slice %29 {offsets = [32, 1408], sizes = [32, 128], strides = [1, 1]} : vector<64x1536xf32> to vector<32x128xf32>
    %224 = arith.truncf %223 : vector<32x128xf32> to vector<32x128xbf16>
    %cst_65 = arith.constant dense<0.000000e+00> : vector<32x32xf32>
    %225 = tpu.matmul %220, %222, %cst_65 {dimension_numbers = #tpu.dot_dimension_numbers<[1], [1], [0], [0], [0, 0, 1, 0], [], []>} : vector<32x128xbf16>, vector<32x128xbf16>, vector<32x32xf32> -> vector<32x32xf32>
    %cst_66 = arith.constant -1.000000e+30 : f32
    %226 = vector.broadcast %cst_66 : f32 to vector<32x32xf32>
    %227 = arith.select %32, %225, %226 : vector<32x32xi1>, vector<32x32xf32>
    %cst_67 = arith.constant dense<0xFF800000> : vector<32xf32>
    %228 = vector.multi_reduction <maximumf>, %227, %cst_67 [1] : vector<32x32xf32> to vector<32xf32>
    %229 = vector.shape_cast %228 : vector<32xf32> to vector<32x1xf32>
    %230 = vector.broadcast %229 : vector<32x1xf32> to vector<32x32xf32>
    %231 = arith.subf %227, %230 : vector<32x32xf32>
    %232 = math.exp %231 : vector<32x32xf32>
    %cst_68 = arith.constant dense<0.000000e+00> : vector<32xf32>
    %233 = vector.multi_reduction <add>, %232, %cst_68 [1] : vector<32x32xf32> to vector<32xf32>
    %234 = vector.shape_cast %233 : vector<32xf32> to vector<32x1xf32>
    %235 = tpu.reciprocal %234 {approx = true} : vector<32x1xf32> -> vector<32x1xf32>
    %236 = vector.broadcast %235 : vector<32x1xf32> to vector<32x32xf32>
    %237 = arith.mulf %232, %236 : vector<32x32xf32>
    %238 = arith.truncf %237 : vector<32x32xf32> to vector<32x32xbf16>
    %cst_69 = arith.constant dense<0.000000e+00> : vector<32x128xf32>
    %239 = tpu.matmul %238, %224, %cst_69 {dimension_numbers = #tpu.dot_dimension_numbers<[1], [0], [0], [1], [0, 0, 1, 1], [], []>} : vector<32x32xbf16>, vector<32x128xbf16>, vector<32x128xf32> -> vector<32x128xf32>
    %240 = arith.truncf %239 : vector<32x128xf32> to vector<32x128xbf16>
    %241 = vector.extract_strided_slice %34 {offsets = [384, 0], sizes = [128, 128], strides = [1, 1]} : vector<512x128xbf16> to vector<128x128xbf16>
    %cst_70 = arith.constant dense<0.000000e+00> : vector<32x128xf32>
    %242 = tpu.matmul %240, %241, %cst_70 {dimension_numbers = #tpu.dot_dimension_numbers<[1], [0], [0], [1], [0, 0, 1, 1], [], []>} : vector<32x128xbf16>, vector<128x128xbf16>, vector<32x128xf32> -> vector<32x128xf32>
    %243 = arith.addf %218, %242 : vector<32x128xf32>
    %244 = vector.extract_strided_slice %3 {offsets = [32, 0], sizes = [32, 128], strides = [1, 1]} : vector<64x128xf32> to vector<32x128xf32>
    %245 = arith.addf %244, %243 : vector<32x128xf32>
    %c0_71 = arith.constant 0 : index
    %c0_72 = arith.constant 0 : index
    %c0_73 = arith.constant 0 : index
    %246 = vector.load %arg9[%c0_71, %c0_72, %c0_73] : memref<1x1x128xf32, #tpu.memory_space<vmem>>, vector<1x1x128xf32>
    %247 = vector.shape_cast %246 : vector<1x1x128xf32> to vector<1x128xf32>
    %248 = vector.broadcast %247 : vector<1x128xf32> to vector<32x128xf32>
    %249 = arith.addf %245, %248 : vector<32x128xf32>
    %c32 = arith.constant 32 : index
    %c0_74 = arith.constant 0 : index
    %250 = vector.load %arg14[%c32, %c0_74] : memref<64x128xf32, #tpu.memory_space<vmem>>, vector<32x128xf32>
    tpu.vector_store %arg14[%c32, %c0_74], %249 {strides = array<i32>} : memref<64x128xf32, #tpu.memory_space<vmem>>, vector<32x128xf32>,
    %c0_75 = arith.constant 0 : index
    %c0_76 = arith.constant 0 : index
    %251 = vector.load %arg14[%c0_75, %c0_76] : memref<64x128xf32, #tpu.memory_space<vmem>>, vector<64x128xf32>
    %cst_77 = arith.constant dense<0.000000e+00> : vector<64xf32>
    %252 = vector.multi_reduction <add>, %251, %cst_77 [1] : vector<64x128xf32> to vector<64xf32>
    %253 = vector.shape_cast %252 : vector<64xf32> to vector<64x1xf32>
    %254 = arith.mulf %251, %251 : vector<64x128xf32>
    %cst_78 = arith.constant dense<0.000000e+00> : vector<64xf32>
    %255 = vector.multi_reduction <add>, %254, %cst_78 [1] : vector<64x128xf32> to vector<64xf32>
    %256 = vector.shape_cast %255 : vector<64xf32> to vector<64x1xf32>
    %cst_79 = arith.constant 7.812500e-03 : f32
    %257 = vector.broadcast %cst_79 : f32 to vector<64x1xf32>
    %258 = arith.mulf %253, %257 : vector<64x1xf32>
    %cst_80 = arith.constant 7.812500e-03 : f32
    %259 = vector.broadcast %cst_80 : f32 to vector<64x1xf32>
    %260 = arith.mulf %256, %259 : vector<64x1xf32>
    %261 = arith.mulf %258, %258 : vector<64x1xf32>
    %262 = arith.subf %260, %261 : vector<64x1xf32>
    %263 = vector.broadcast %258 : vector<64x1xf32> to vector<64x128xf32>
    %264 = arith.subf %251, %263 : vector<64x128xf32>
    %cst_81 = arith.constant 9.99999974E-6 : f32
    %265 = vector.broadcast %cst_81 : f32 to vector<64x1xf32>
    %266 = arith.addf %262, %265 : vector<64x1xf32>
    %267 = math.rsqrt %266 : vector<64x1xf32>
    %268 = vector.broadcast %267 : vector<64x1xf32> to vector<64x128xf32>
    %269 = arith.mulf %264, %268 : vector<64x128xf32>
    %270 = arith.truncf %269 : vector<64x128xf32> to vector<64x128xbf16>
    %c0_82 = arith.constant 0 : index
    %c0_83 = arith.constant 0 : index
    %c0_84 = arith.constant 0 : index
    %271 = vector.load %arg10[%c0_82, %c0_83, %c0_84] : memref<1x128x256xbf16, #tpu.memory_space<vmem>>, vector<1x128x256xbf16>
    %272 = vector.shape_cast %271 : vector<1x128x256xbf16> to vector<128x256xbf16>
    %cst_85 = arith.constant dense<0.000000e+00> : vector<64x256xf32>
    %273 = tpu.matmul %270, %272, %cst_85 {dimension_numbers = #tpu.dot_dimension_numbers<[1], [0], [0], [1], [0, 0, 1, 1], [], []>} : vector<64x128xbf16>, vector<128x256xbf16>, vector<64x256xf32> -> vector<64x256xf32>
    %c0_86 = arith.constant 0 : index
    %c0_87 = arith.constant 0 : index
    %c0_88 = arith.constant 0 : index
    %274 = vector.load %arg11[%c0_86, %c0_87, %c0_88] : memref<1x1x256xf32, #tpu.memory_space<vmem>>, vector<1x1x256xf32>
    %275 = vector.shape_cast %274 : vector<1x1x256xf32> to vector<1x256xf32>
    %276 = vector.broadcast %275 : vector<1x256xf32> to vector<64x256xf32>
    %277 = arith.addf %273, %276 : vector<64x256xf32>
    %cst_89 = arith.constant 1.702000e+00 : f32
    %278 = vector.broadcast %cst_89 : f32 to vector<64x256xf32>
    %279 = arith.mulf %278, %277 : vector<64x256xf32>
    %280 = arith.negf %279 : vector<64x256xf32>
    %281 = math.exp %280 : vector<64x256xf32>
    %cst_90 = arith.constant 1.000000e+00 : f32
    %282 = vector.broadcast %cst_90 : f32 to vector<64x256xf32>
    %283 = arith.addf %282, %281 : vector<64x256xf32>
    %284 = arith.divf %282, %283 : vector<64x256xf32>
    %285 = arith.mulf %277, %284 : vector<64x256xf32>
    %286 = arith.truncf %285 : vector<64x256xf32> to vector<64x256xbf16>
    %c0_91 = arith.constant 0 : index
    %c0_92 = arith.constant 0 : index
    %c0_93 = arith.constant 0 : index
    %287 = vector.load %arg12[%c0_91, %c0_92, %c0_93] : memref<1x256x128xbf16, #tpu.memory_space<vmem>>, vector<1x256x128xbf16>
    %288 = vector.shape_cast %287 : vector<1x256x128xbf16> to vector<256x128xbf16>
    %cst_94 = arith.constant dense<0.000000e+00> : vector<64x128xf32>
    %289 = tpu.matmul %286, %288, %cst_94 {dimension_numbers = #tpu.dot_dimension_numbers<[1], [0], [0], [1], [0, 0, 1, 1], [], []>} : vector<64x256xbf16>, vector<256x128xbf16>, vector<64x128xf32> -> vector<64x128xf32>
    %c0_95 = arith.constant 0 : index
    %c0_96 = arith.constant 0 : index
    %c0_97 = arith.constant 0 : index
    %290 = vector.load %arg13[%c0_95, %c0_96, %c0_97] : memref<1x1x128xf32, #tpu.memory_space<vmem>>, vector<1x1x128xf32>
    %291 = vector.shape_cast %290 : vector<1x1x128xf32> to vector<1x128xf32>
    %292 = vector.broadcast %291 : vector<1x128xf32> to vector<64x128xf32>
    %293 = arith.addf %289, %292 : vector<64x128xf32>
    %294 = arith.addf %251, %293 : vector<64x128xf32>
    %c0_98 = arith.constant 0 : index
    %c0_99 = arith.constant 0 : index
    %295 = vector.load %arg14[%c0_98, %c0_99] : memref<64x128xf32, #tpu.memory_space<vmem>>, vector<64x128xf32>
    tpu.vector_store %arg14[%c0_98, %c0_99], %294 {strides = array<i32>} : memref<64x128xf32, #tpu.memory_space<vmem>>, vector<64x128xf32>,
    return
  }
  func.func @transform_0(%arg0: i32) -> (i32, i32) {
    %c0_i32 = arith.constant 0 : i32
    %c0_i32_0 = arith.constant 0 : i32
    %c0_i32_1 = arith.constant 0 : i32
    return %c0_i32, %c0_i32_0 : i32, i32
  }
  func.func @transform_1(%arg0: i32) -> (i32, i32) {
    %c0_i32 = arith.constant 0 : i32
    %c0_i32_0 = arith.constant 0 : i32
    %c0_i32_1 = arith.constant 0 : i32
    return %c0_i32, %c0_i32_0 : i32, i32
  }
  func.func @transform_2(%arg0: i32) -> (i32, i32) {
    %c0_i32 = arith.constant 0 : i32
    %c0_i32_0 = arith.constant 0 : i32
    %c0_i32_1 = arith.constant 0 : i32
    return %c0_i32, %c0_i32_0 : i32, i32
  }
  func.func @transform_3(%arg0: i32) -> (i32, i32) {
    %c0_i32 = arith.constant 0 : i32
    %c0_i32_0 = arith.constant 0 : i32
    %c0_i32_1 = arith.constant 0 : i32
    return %c0_i32, %c0_i32_0 : i32, i32
  }
  func.func @transform_4(%arg0: i32) -> (i32, i32) {
    %c0_i32 = arith.constant 0 : i32
    %c0_i32_0 = arith.constant 0 : i32
    %c0_i32_1 = arith.constant 0 : i32
    return %c0_i32, %c0_i32_0 : i32, i32
  }
  func.func @transform_5(%arg0: i32) -> (i32, i32, i32) {
    %c0_i32 = arith.constant 0 : i32
    %c0_i32_0 = arith.constant 0 : i32
    %c0_i32_1 = arith.constant 0 : i32
    return %arg0, %c0_i32, %c0_i32_0 : i32, i32, i32
  }
  func.func @transform_6(%arg0: i32) -> (i32, i32, i32) {
    %c0_i32 = arith.constant 0 : i32
    %c0_i32_0 = arith.constant 0 : i32
    %c0_i32_1 = arith.constant 0 : i32
    return %arg0, %c0_i32, %c0_i32_0 : i32, i32, i32
  }
  func.func @transform_7(%arg0: i32) -> (i32, i32, i32) {
    %c0_i32 = arith.constant 0 : i32
    %c0_i32_0 = arith.constant 0 : i32
    %c0_i32_1 = arith.constant 0 : i32
    return %arg0, %c0_i32, %c0_i32_0 : i32, i32, i32
  }
  func.func @transform_8(%arg0: i32) -> (i32, i32, i32) {
    %c0_i32 = arith.constant 0 : i32
    %c0_i32_0 = arith.constant 0 : i32
    %c0_i32_1 = arith.constant 0 : i32
    return %arg0, %c0_i32, %c0_i32_0 : i32, i32, i32
  }
  func.func @transform_9(%arg0: i32) -> (i32, i32, i32) {
    %c0_i32 = arith.constant 0 : i32
    %c0_i32_0 = arith.constant 0 : i32
    %c0_i32_1 = arith.constant 0 : i32
    return %arg0, %c0_i32, %c0_i32_0 : i32, i32, i32
  }
  func.func @transform_10(%arg0: i32) -> (i32, i32, i32) {
    %c0_i32 = arith.constant 0 : i32
    %c0_i32_0 = arith.constant 0 : i32
    %c0_i32_1 = arith.constant 0 : i32
    return %arg0, %c0_i32, %c0_i32_0 : i32, i32, i32
  }
  func.func @transform_11(%arg0: i32) -> (i32, i32, i32) {
    %c0_i32 = arith.constant 0 : i32
    %c0_i32_0 = arith.constant 0 : i32
    %c0_i32_1 = arith.constant 0 : i32
    return %arg0, %c0_i32, %c0_i32_0 : i32, i32, i32
  }
  func.func @transform_12(%arg0: i32) -> (i32, i32, i32) {
    %c0_i32 = arith.constant 0 : i32
    %c0_i32_0 = arith.constant 0 : i32
    %c0_i32_1 = arith.constant 0 : i32
    return %arg0, %c0_i32, %c0_i32_0 : i32, i32, i32
  }
  func.func @transform_13(%arg0: i32) -> (i32, i32) {
    %c0_i32 = arith.constant 0 : i32
    %c0_i32_0 = arith.constant 0 : i32
    %c0_i32_1 = arith.constant 0 : i32
    return %c0_i32, %c0_i32_0 : i32, i32
  }
}

</mosaic_0001>

<bundles_post_ra>
// kernel: _lambda_.1
= control target key start
LH: loop header
LB: loop body
LE: loop exit
PB: predicated region body
PF: predicated region fallthrough
CT: control target
= control target key end

     0   :  { %s8277_s0 = inlined_call_operand.vmem [shape: bf16[64,192], index: 0, kind: input, shape index: {}]   ;;  %s8278_s1 = inlined_call_operand.hbm [shape: bf16[192,128], index: 1, kind: input, shape index: {}]   ;;  %s8279_s2 = inlined_call_operand.hbm [shape: f32[32,128], index: 2, kind: input, shape index: {}]   ;;  %s8280_s3 = inlined_call_operand.vmem [shape: f32[1,128], index: 3, kind: input, shape index: {}]   ;;  %s8281_s4 = inlined_call_operand.vmem [shape: f32[1,128], index: 4, kind: input, shape index: {}]   ;;  %s8282_s5 = inlined_call_operand.vmem [shape: bf16[2,128,1536], index: 5, kind: input, shape index: {}]   ;;  %s8283_s6 = inlined_call_operand.hbm [shape: f32[2,1,1536], index: 6, kind: input, shape index: {}]   ;;  %s8284_s7 = inlined_call_operand.vmem [shape: bf16[2,512,128], index: 7, kind: input, shape index: {}]   ;;  %s8285_s8 = inlined_call_operand.vmem [shape: f32[2,1,128], index: 8, kind: input, shape index: {}]   ;;  %s8286_s9 = inlined_call_operand.hbm [shape: bf16[2,128,256], index: 9, kind: input, shape index: {}]   ;;  %s8287_s10 = inlined_call_operand.vmem [shape: f32[2,1,256], index: 10, kind: input, shape index: {}]   ;;  %s8288_s11 = inlined_call_operand.hbm [shape: bf16[2,256,128], index: 11, kind: input, shape index: {}]   ;;  %s8289_s12 = inlined_call_operand.vmem [shape: f32[2,1,128], index: 12, kind: input, shape index: {}]   ;;  %s8290_s13 = inlined_call_operand.vmem [shape: f32[64,128], index: 13, kind: output, shape index: {}]  }
   0x1   :  { %8326 = sst [smem:[#allocation41_spill]] %s8278_s1 }
   0x2   :  { %8327 = sst [smem:[#allocation42_spill]] %s8279_s2 }
   0x3   :  { %8328 = sst [smem:[#allocation43_spill]] %s8280_s3 }
   0x4   :  { %8329 = sst [smem:[#allocation44_spill]] %s8281_s4 }
   0x5   :  { %8330 = sst [smem:[#allocation45_spill]] %s8283_s6 }
   0x6   :  { %8331 = sst [smem:[#allocation46_spill]] %s8290_s13 }
   0x7   :  { %18 = vsyncpa [#allocation3], 0 }
   0x8   :  { %19 = vsyncpa [#allocation5], 0  ;;  %s6138_s25 = smov 0   ;;  %s6140_s26 = smov 0  }
   0x9   :  { %s6142_s27 = smov 0   ;;  %s6144_s28 = smov 0  }
   0xa LB: > { %8332 = sst [smem:[#allocation12_spill]] %s6056_s27  ;;  %s6157_s29 = sadd.s32 4294967295, %s6060_s28   ;;  %s6060_s28 = sphi %s6144_s28, %s8448_s28   ;;  %s6056_s27 = sphi %s6142_s27, %s8450_s27   ;;  %s6052_s26 = sphi %s6140_s26, %s8452_s26   ;;  %s6048_s25 = sphi %s6138_s25, %s8451_s25  }
   0xb   : > { %p176_p0 = scmp.ne.s32.totalorder %s6052_s26, %s6048_s25  ;;  %p177_p1 = scmp.eq.s32.totalorder %s6157_s29, 0 }
   0xc   : > { %p4554_p2 = scmp.ge.s32.totalorder %s6060_s28, 1  ;;  %p364_p3 = scmp.lt.s32.totalorder %s6060_s28, 3 }
   0xd   : > { %p4555_p4 = scmp.ne.s32.totalorder %s6157_s29, 0  ;;  %p6166_p5 = por %p177_p1, %p176_p0 }
   0xe   : > { %s8334_s1 = sld [smem:[#allocation41_spill]]  ;;  %p6173_p6 = pnand %p4554_p2, %p364_p3 }
   0xf   : > { %s6062_s18 = smov [#allocation2]   ;;  %s6186_s21 = sadd.s32 1, %s6060_s28  }
  0x10   : > { %p5545_p7 = pneg %p6173_p6  ;;  %s380_s19 = sshll.u32 %s6062_s18, 4  ;;  %s381_s19 = int_to_ptr.vmem [resolvable:$true] %s380_s19 }
  0x11   : > { %8337 = sst [smem:[#allocation13_spill]] %s6186_s21  ;;  %s8294_s22 = smov 64  }
  0x12   : > { %p6181_p8 = pnand %p5545_p7, %p177_p1  ;;  %s8295_s23 = smov 4  }
  0x13   : > { %s160_s24 = ssub.s32 %s6060_s28, %s6186_s21  ;;  %s163_s25 = sadd.s32 1, %s6056_s27 }
  0x14   : > { %s378_s16 = sshll.u32 %s8334_s1, 4  ;;  %p161_p9 = scmp.eq.s32.totalorder %s160_s24, 0  ;;  %s379_s16 = int_to_ptr.hbm [resolvable:$true] %s378_s16 }
  0x15   : > { %5548 = dma.hbm_to_vmem [thread:$0]  (!%p6181_p8), %s379_s16, 1536, %s381_s19, [#allocation3], %s8294_s22, %s8294_s22, %s8295_s23  }
  0x16   : > { %p170_p10 = scmp.ne.s32.totalorder %s6056_s27, %s6052_s26  ;;  %p171_p11 = scmp.eq.s32.totalorder %s6060_s28, 0 }
  0x17   : > { %p5564_p12 = scmp.lt.s32.totalorder %s6060_s28, 2  ;;  %s422_s15 = sand.u32 1, %s6060_s28  }
  0x18   : > { %s6201_s14 = scalar_select %p161_p9, %s6056_s27, %s163_s25  }
  0x19   : > { %p172_p13 = por %p171_p11, %p170_p10  ;;  %s424_s18 = sand.u32 1, %s6056_s27  }
  0x1a   : > { %8338 = sst [smem:[#allocation14_spill]] %s6201_s14  ;;  %s5527_s1 = smul.u32 12, %s424_s18 }
  0x1b   : > { %p6205_p0 = pnand %p5564_p12, %p172_p13  ;;  %s5528_s4 = smul.u32 12, %s6060_s28 }
  0x1c   : > { %s4558_s16 = sshll.u32 %s424_s18, 7  ;;  %s8340_s6 = sld [smem:[#allocation45_spill]] }
  0x1d   : > { %s426_s23 = scalar_lea.vmem [#allocation6], %s5527_s1  ;;  %s6213_s14 = scalar_lea.sflag [#allocation3], %s422_s15 }
  0x1e   : > { %s434_s21 = sshll.u32 %s426_s23, 4  ;;  %p5902_p3 = pneg %p6205_p0  ;;  %s435_s21 = int_to_ptr.vmem [resolvable:$true] %s434_s21 }
  0x22   : > { %s430_s24 = scalar_lea.hbm %s8340_s6, %s5528_s4  ;;  %s5905_s1 = scalar_lea.hbm %s8340_s6, 24 }
  0x23   : > { %s432_s25 = sshll.u32 %s430_s24, 4  ;;  %s433_s25 = int_to_ptr.hbm [resolvable:$true] %s432_s25 }
  0x24   : > { %s5898_s27 = sshra.s32 %s433_s25, 4  ;;  %s5899_s27 = int_to_ptr.hbm [resolvable:$true] %s5898_s27 }
  0x25   : > { %s5900_s3 = scalar_lea.hbm %s5899_s27, 12  ;;  %p5906_p10 = scmp.lt.s32.totalorder %s5899_s27, %s8340_s6 }
  0x26   : > { %p5901_p2 = scmp.ne.s32.totalorder %s5899_s27, %s5900_s3  ;;  %p5907_p11 = scmp.lt.s32.totalorder %s5905_s1, %s5900_s3 }
  0x28   : > { %p5903_p7 = pnand %p5902_p3, %p5901_p2  ;;  %p5908_p12 = por %p5907_p11, %p5906_p10 }
  0x2a   : > { %p5904_p9 = pneg %p5903_p7 }
  0x2c   : > { %p5909_p13 = pnand %p5908_p12, %p5904_p9 }
  0x2e   : > { %5912 = shalt.err (!%p5909_p13)
}
  0x2f   : > { %5555 = dma.hbm_to_vmem [thread:$0]  (!%p6205_p0), %s433_s25, 192, %s435_s21, %s6213_s14  }
  0x30   : > { %s459_s15 = scalar_lea.vmem [#allocation7], %s4558_s16  ;;  %s488_s24 = scalar_lea.vmem [#allocation8], %s4558_s16 }
  0x31   : > { %s6229_s19 = sshll.u32 %s459_s15, 4  ;;  %s6232_s18 = sshll.u32 %s488_s24, 4  ;;  %s468_s19 = int_to_ptr.vmem [resolvable:$true] %s6229_s19 }
  0x32   : > { %8341 = sst [smem:[#allocation15_spill]] %s6232_s18  ;;  %s5332_s3 = sshll.u32 %s6060_s28, 7 }
  0x33   : > { %s464_s1 = scalar_lea.hbm %s8286_s9, %s5332_s3  ;;  %s8342_s2 = sld [smem:[#allocation42_spill]] }
  0x34   : > { %s465_s25 = sshll.u32 %s464_s1, 4  ;;  %s5935_s24 = scalar_lea.hbm %s8286_s9, 256  ;;  %s466_s25 = int_to_ptr.hbm [resolvable:$true] %s465_s25 }
  0x35   : > { %s5928_s15 = sshra.s32 %s466_s25, 4  ;;  %s5929_s15 = int_to_ptr.hbm [resolvable:$true] %s5928_s15 }
  0x36   : > { %s5930_s6 = scalar_lea.hbm %s5929_s15, 128  ;;  %p5936_p10 = scmp.lt.s32.totalorder %s5929_s15, %s8286_s9 }
  0x37   : > { %p5931_p2 = scmp.ne.s32.totalorder %s5929_s15, %s5930_s6  ;;  %p5937_p11 = scmp.lt.s32.totalorder %s5935_s24, %s5930_s6 }
  0x39   : > { %s392_s21 = sshll.u32 %s8342_s2, 4  ;;  %p5933_p7 = pnand %p5931_p2, %p5902_p3  ;;  %s393_s21 = int_to_ptr.hbm [resolvable:$true] %s392_s21 }
  0x3a   : > { %p5938_p12 = por %p5937_p11, %p5936_p10 }
  0x3b   : > { %p5934_p9 = pneg %p5933_p7 }
  0x3d   : > { %p5939_p13 = pnand %p5938_p12, %p5934_p9 }
  0x3f   : > { %5942 = shalt.err (!%p5939_p13)
}
  0x40   : > { %s6065_s1 = smov 128   ;;  %s6066_s4 = smov 8  }
  0x41   : > { %5558 = dma.hbm_to_vmem [thread:$0]  (!%p6205_p0), %s466_s25, 2048, %s468_s19, %s6213_s14, %s6065_s1, %s6065_s1, %s6066_s4  }
  0x42   : > { %s6067_s23 = smov [#allocation4]   ;;  %s493_s2 = scalar_lea.hbm %s8288_s11, %s5332_s3 }
  0x43   : > { %s394_s18 = sshll.u32 %s6067_s23, 4  ;;  %s494_s15 = sshll.u32 %s493_s2, 4  ;;  %s395_s18 = int_to_ptr.vmem [resolvable:$true] %s394_s18  ;;  %s495_s15 = int_to_ptr.hbm [resolvable:$true] %s494_s15 }
  0x44   : > { %5551 = dma.hbm_to_vmem [thread:$0]  (!%p6181_p8), %s393_s21, 512, %s395_s18, [#allocation5], %s6065_s1, %s6065_s1, %s6066_s4  }
  0x45   : > { %s5988_s6 = sshra.s32 %s495_s15, 4  ;;  %s5995_s27 = scalar_lea.hbm %s8288_s11, 256  ;;  %s5989_s6 = int_to_ptr.hbm [resolvable:$true] %s5988_s6 }
  0x46   : > { %s5990_s24 = scalar_lea.hbm %s5989_s6, 128  ;;  %p5996_p10 = scmp.lt.s32.totalorder %s5989_s6, %s8288_s11 }
  0x47   : > { %p5991_p2 = scmp.ne.s32.totalorder %s5989_s6, %s5990_s24  ;;  %p5997_p11 = scmp.lt.s32.totalorder %s5995_s27, %s5990_s24 }
  0x49   : > { %p5993_p7 = pnand %p5991_p2, %p5902_p3  ;;  %p5998_p12 = por %p5997_p11, %p5996_p10 }
  0x4b   : > { %p5994_p9 = pneg %p5993_p7 }
  0x4d   : > { %p5999_p8 = pnand %p5998_p12, %p5994_p9 }
  0x4f   : > { %6002 = shalt.err (!%p5999_p8)
}
  0x50   : > { %s8343_s2 = smov 4   ;;  %s8344_s20 = smov 64  }
  0x51   : > { %s8345_s18 = sld [smem:[#allocation15_spill]] }
  0x54   : > { %514 = sbr.rel (%p6173_p6) target bundleno = 3223 (0xc97), region = 72 }
  0x57   : > { %s8346_s3 = int_to_ptr.vmem [resolvable:$true] %s8345_s18 }
  0x58   : > { %5561 = dma.hbm_to_vmem [thread:$0]  (!%p6205_p0), %s495_s15, 2048, %s8346_s3, %s6213_s14, %s8344_s20, %s8344_s20, %s8343_s2  }
  0x59   : > { %6035 = dma.done.wait (%p177_p1), [#allocation3], 1536  }
  0x5a   : > { %6037 = vsyncadd (%p177_p1), [#allocation3], 4294965760 }
  0x5b   : > { %6039 = dma.done.wait (%p177_p1), [#allocation5], 512  }
  0x5c   : > { %6041 = vsyncadd (%p177_p1), [#allocation5], 4294966784  ;;  %s526_s13 = sand.u32 1, %s6157_s29   ;;  %s528_s14 = sand.u32 1, %s6052_s26  }
  0x5d   : > { %s6288_s21 = smul.u32 12, %s528_s14  ;;  %s527_s17 = scalar_lea.sflag [#allocation3], %s526_s13 }
  0x5f   : > { %s530_s1 = scalar_lea.vmem [#allocation6], %s6288_s21 }
  0x60   : > { %6043 = dma.done.wait (%p6166_p5), %s527_s17, 4288  }
  0x61   : > { %6045 = vsyncadd (%p6166_p5), %s527_s17, 4294963008  ;;  %s4567_s4 = sshll.u32 %s528_s14, 7  ;;  %p619_p6 = scmp.lt.s32.totalorder %s6157_s29, 1 }
  0x62   : > { %s6327_s6 = scalar_lea.vmem [#allocation7], %s4567_s4  ;;  %s6329_s24 = scalar_lea.vmem [#allocation8], %s4567_s4 }
  0x63   : > { %s6297_s28 = scalar_select %p619_p6, %s6157_s29, 1 }
  0x64   : > { %643 = sbr.rel (%p4555_p4) target bundleno = 463 (0x1cf), region = 96  ;;  %s8347_s14 = sld [smem:[#allocation43_spill]] (!%p4555_p4) }
  0x65   : > { %s5530_s16 = smul.u32 768, %s6297_s28  ;;  %s5334_s15 = sshll.u32 %s6297_s28, 8 }
  0x66   : > { %s6304_s19 = scalar_lea.vmem %s8284_s7, %s5334_s15  ;;  %s6310_s27 = scalar_lea.vmem %s8285_s8, %s6297_s28 }
  0x67   : > { %s6315_s2 = scalar_lea.vmem %s8282_s5, %s5530_s16  ;;  %s4572_s20 = sshll.u32 %s6297_s28, 1 }
  0x68   : > { %s6321_s13 = scalar_lea.vmem %s8287_s10, %s4572_s20  ;;  %s638_s15 = scalar_lea.vmem %s8289_s12, %s6297_s28 }
  0x69   : > { %v5350_v0 = vld [vmem:[#allocation2 + $0x38] sm:$0xff]  ;;  %v5349_v2 = vld [vmem:[#allocation2 + $0x30] sm:$0xff]  ;;  %v5348_v4 = vld [vmem:[#allocation2 + $0x28] sm:$0xff]  ;;  %vm784_vm0 = vcmask 523264   ;;  %s8348_s4 = sld [smem:[#allocation44_spill]] }
  0x6a   : > { %v5354_v1 = vld [vmem:[#allocation2 + $0x58] sm:$0xff]  ;;  %797 = vmatpush.bf16.msra.mxu0 %v5350_v0  ;;  %5515 = vmatpush.bf16.msra.mxu2 %v5350_v0  ;;  %v5353_v3 = vld [vmem:[#allocation2 + $0x50] sm:$0xff]  ;;  %v5352_v5 = vld [vmem:[#allocation2 + $0x48] sm:$0xff]  ;;  %s8349_s25 = sld [smem:[#allocation46_spill]] }
  0x6b   : > { %5523 = vmatpush.bf16.msra.mxu3 %v5354_v1  ;;  %830 = vmatpush.bf16.msra.mxu1 %v5354_v1  ;;  %v5347_v6 = vld [vmem:[#allocation2 + $0x20] sm:$0xff]  ;;  %v5337_v8 = vld [vmem:[%s8277_s0 + $0x14] sm:$0xf]  ;;  %v4586_v9 = vld [vmem:[%s8277_s0 + $0x18] sm:$0xf0] }
  0x6c   : > { %v5351_v7 = vld [vmem:[#allocation2 + $0x40] sm:$0xff]  ;;  %v4578_v11 = vld [vmem:[%s8277_s0 + $0x8] sm:$0xf0]  ;;  %v5346_v12 = vld [vmem:[#allocation2 + $0x18] sm:$0xff]  ;;  %v4589_v13 = vor.u32 %v5337_v8, %v4586_v9 }
  0x6d   : > { %v5335_v10 = vld [vmem:[%s8277_s0 + $0x4] sm:$0xf]  ;;  %v5345_v15 = vld [vmem:[#allocation2 + $0x10] sm:$0xff]  ;;  %v5344_v16 = vld [vmem:[#allocation2 + $0x8] sm:$0xff] }
  0x6e   : > { %798 = vmatpush.bf16.msra.mxu0 %v5349_v2  ;;  %5516 = vmatpush.bf16.msra.mxu2 %v5349_v2  ;;  %v4581_v14 = vor.u32 %v5335_v10, %v4578_v11  ;;  %v5343_v17 = vld [vmem:[#allocation2] sm:$0xff]  ;;  %v5336_v19 = vld [vmem:[%s8277_s0 + $0x4] sm:$0xf0]  ;;  %v4594_v23 = vld [vmem:[%s8277_s0 + $0x28] sm:$0xf0] }
  0x6f   : > { %5524 = vmatpush.bf16.msra.mxu3 %v5353_v3  ;;  %831 = vmatpush.bf16.msra.mxu1 %v5353_v3  ;;  %v4576_v18 = vld [vmem:[%s8277_s0] sm:$0xf]  ;;  %v5340_v21 = vld [vmem:[%s8277_s0 + $0x24] sm:$0xf0]  ;;  %v5339_v22 = vld [vmem:[%s8277_s0 + $0x24] sm:$0xf] }
  0x70   : > { %v4592_v20 = vld [vmem:[%s8277_s0 + $0x20] sm:$0xf]  ;;  %v4577_v24 = vor.u32 %v5336_v19, %v4576_v18  ;;  %v4597_v26 = vor.u32 %v5339_v22, %v4594_v23  ;;  %v4584_v27 = vld [vmem:[%s8277_s0 + $0x10] sm:$0xf]  ;;  %v5338_v28 = vld [vmem:[%s8277_s0 + $0x14] sm:$0xf0] }
  0x71   : > { %v4593_v25 = vor.u32 %v5340_v21, %v4592_v20  ;;  %v4600_v29 = vld [vmem:[%s8277_s0 + $0x30] sm:$0xf]  ;;  %v5342_v30 = vld [vmem:[%s8277_s0 + $0x34] sm:$0xf0]  ;;  %v5341_v31 = vld [vmem:[%s8277_s0 + $0x34] sm:$0xf]  ;;  %v4585_v33 = vor.u32 %v5338_v28, %v4584_v27 }
  0x72   : > { %799 = vmatpush.bf16.msra.mxu0 %v5348_v4  ;;  %5517 = vmatpush.bf16.msra.mxu2 %v5348_v4  ;;  %v4602_v32 = vld [vmem:[%s8277_s0 + $0x38] sm:$0xf0]  ;;  %v4601_v34 = vor.u32 %v5342_v30, %v4600_v29  ;;  %v855_v40 = vld [vmem:[#allocation4] sm:$0xff]  ;;  %v856_v48 = vld [vmem:[#allocation4 + $0x8] sm:$0xff] }
  0x73   : > { %5525 = vmatpush.bf16.msra.mxu3 %v5352_v5  ;;  %832 = vmatpush.bf16.msra.mxu1 %v5352_v5  ;;  %v4605_v35 = vor.u32 %v5341_v31, %v4602_v32  ;;  %v857_v56 = vld [vmem:[#allocation4 + $0x10] sm:$0xff]  ;;  %v858_v1 = vld [vmem:[#allocation4 + $0x18] sm:$0xff] }
  0x76   : > { %800 = vmatpush.bf16.msra.mxu0 %v5347_v6  ;;  %5518 = vmatpush.bf16.msra.mxu2 %v5347_v6 }
  0x77   : > { %5526 = vmatpush.bf16.msra.mxu3 %v5351_v7  ;;  %833 = vmatpush.bf16.msra.mxu1 %v5351_v7 }
  0x7a   : > { %801 = vmatpush.bf16.msra.mxu0 %v5346_v12  ;;  %4655 = vmatmul.msk.bf16.vlgmr.msra.gmra.mxu3 %vm784_vm0, %v4589_v13 }
  0x7b   : > { %5519 = vmatpush.bf16.msra.mxu2 %v5346_v12  ;;  %4654 = vmatmul.msk.bf16.vlgmr.msra.gmra.mxu1 %vm784_vm0, %v4581_v14 }
  0x7e   : > { %802 = vmatpush.bf16.msra.mxu0 %v5345_v15 }
  0x7f   : > { %5520 = vmatpush.bf16.msra.mxu2 %v5345_v15 }
  0x82   : > { %803 = vmatpush.bf16.msra.mxu0 %v5344_v16 }
  0x83   : > { %5521 = vmatpush.bf16.msra.mxu2 %v5344_v16 }
  0x86   : > { %804 = vmatpush.bf16.msra.mxu0 %v5343_v17 }
  0x87   : > { %5522 = vmatpush.bf16.msra.mxu2 %v5343_v17 }
  0x89   : > { %805 = vmatmul.bf16.vlgmr.msra.gmra.mxu0 %v4577_v24 }
  0x8a   : > { %815 = vmatmul.bf16.vlgmr.msra.gmra.mxu2 %v4593_v25  ;;  %4656 = vmatmul.msk.bf16.gmra.mxu3 %vm784_vm0, %v4597_v26 }
  0x99   : > { %810 = vmatmul.bf16.gmra.mxu0 %v4585_v33 }
  0x9a   : > { %820 = vmatmul.bf16.gmra.mxu2 %v4601_v34  ;;  %4657 = vmatmul.msk.bf16.gmra.mxu3 %vm784_vm0, %v4605_v35 }
  0xf8   : > { %v835_v37 = vpop.f32.mrf.mxu1 }
  0xfd   : > { %v840_v36 = vpop.f32.mrf.mxu3 }
 0x100   : > { %v837_v44 = vpop.f32.mrf.mxu1 }
 0x105   : > { %v842_v38 = vpop.f32.mrf.mxu3 }
 0x106   : > { %v806_v39 = vpop.f32.mrf.mxu0 }
 0x107   : > { %v836_v41 = vadd.f32 %v835_v37, %v806_v39 }
 0x109   : > { %v6385_v42 = vadd.f32 %v855_v40, %v836_v41 }
 0x10b   : > { %863 = vadd.xlane.f32.xlu0 %v6385_v42  ;;  %v871_v43 = vmul.f32 %v6385_v42, %v6385_v42 }
 0x10d   : > { %875 = vadd.xlane.f32.xlu2 %v871_v43  ;;  %v816_v45 = vpop.f32.mrf.mxu2  ;;  %v845_v46 = vpop.f32.mrf.mxu3 }
 0x10e   : > { %v808_v47 = vpop.f32.mrf.mxu0  ;;  %v846_v49 = vadd.f32 %v845_v46, %v816_v45  ;;  %v6439_v45 = vld [vmem:[%s8347_s14] ss:$0 sm:$0xff] }
 0x10f   : > { %v838_v50 = vadd.f32 %v837_v44, %v808_v47 }
 0x110   : > { %v6392_v52 = vadd.f32 %v855_v40, %v846_v49 }
 0x111   : > { %v6390_v51 = vadd.f32 %v856_v48, %v838_v50 }
 0x112   : > { %v987_v59 = vmul.f32 %v6392_v52, %v6392_v52 }
 0x113   : > { %865 = vadd.xlane.f32.xlu0 %v6390_v51  ;;  %v872_v6 = vmul.f32 %v6390_v51, %v6390_v51 }
 0x115   : > { %979 = vadd.xlane.f32.xlu2 %v6392_v52  ;;  %v818_v53 = vpop.f32.mrf.mxu2  ;;  %v847_v54 = vpop.f32.mrf.mxu3 }
 0x116   : > { %v811_v55 = vpop.f32.mrf.mxu0  ;;  %v848_v58 = vadd.f32 %v847_v54, %v818_v53  ;;  %v6448_v53 = vld [vmem:[%s8348_s4] ss:$0 sm:$0xff] }
 0x117   : > { %v841_v57 = vadd.f32 %v840_v36, %v811_v55 }
 0x118   : > { %v6400_v61 = vadd.f32 %v856_v48, %v848_v58 }
 0x119   : > { %v6398_v60 = vadd.f32 %v857_v56, %v841_v57 }
 0x11a   : > { %v988_v15 = vmul.f32 %v6400_v61, %v6400_v61 }
 0x11b   : > { %867 = vadd.xlane.f32.xlu1 %v6398_v60  ;;  %991 = vadd.xlane.f32.xlu0 %v987_v59  ;;  %v873_v5 = vmul.f32 %v6398_v60, %v6398_v60 }
 0x11d   : > { %981 = vadd.xlane.f32.xlu2 %v6400_v61  ;;  %v821_v62 = vpop.f32.mrf.mxu2  ;;  %v850_v63 = vpop.f32.mrf.mxu3 }
 0x11e   : > { %v813_v0 = vpop.f32.mrf.mxu0  ;;  %v851_v4 = vadd.f32 %v850_v63, %v821_v62 }
 0x11f   : > { %v843_v2 = vadd.f32 %v842_v38, %v813_v0 }
 0x120   : > { %v6412_v8 = vadd.f32 %v857_v56, %v851_v4 }
 0x121   : > { %v6404_v3 = vadd.f32 %v858_v1, %v843_v2 }
 0x122   : > { %v989_v12 = vmul.f32 %v6412_v8, %v6412_v8 }
 0x123   : > { %879 = vadd.xlane.f32.xlu1 %v873_v5  ;;  %877 = vadd.xlane.f32.xlu0 %v872_v6  ;;  %v874_v7 = vmul.f32 %v6404_v3, %v6404_v3 }
 0x125   : > { %881 = vadd.xlane.f32.xlu2 %v874_v7  ;;  %v823_v9 = vpop.f32.mrf.mxu2  ;;  %v852_v10 = vpop.f32.mrf.mxu3 }
 0x126   : > { %v853_v11 = vadd.f32 %v852_v10, %v823_v9 }
 0x128   : > { %v6418_v13 = vadd.f32 %v858_v1, %v853_v11 }
 0x12a   : > { %v990_v14 = vmul.f32 %v6418_v13, %v6418_v13 }
 0x12b   : > { %869 = vadd.xlane.f32.xlu1 %v6404_v3  ;;  %983 = vadd.xlane.f32.xlu0 %v6412_v8 }
 0x12d   : > { %995 = vadd.xlane.f32.xlu2 %v989_v12 }
 0x133   : > { %985 = vadd.xlane.f32.xlu1 %v6418_v13  ;;  %997 = vadd.xlane.f32.xlu0 %v990_v14 }
 0x13b   : > { %993 = vadd.xlane.f32.xlu1 %v988_v15 }
 0x17e   : > { %v864_v16 = vpop.xlane.xlu0 %863 }
 0x17f   : > { %v883_v17 = vmul.f32 0.0078125, %v864_v16 }
 0x180   : > { %v876_v18 = vpop.xlane.xlu2 %875 }
 0x181   : > { %v891_v19 = vmul.f32 %v883_v17, %v883_v17  ;;  %v887_v20 = vmul.f32 0.0078125, %v876_v18  ;;  %v899_v40 = vsub.f32 %v6385_v42, %v883_v17 }
 0x183   : > { %v895_v21 = vsub.f32 %v887_v20, %v891_v19 }
 0x185   : > { %v903_v22 = vadd.f32 1e-05, %v895_v21 }
 0x186   : > { %v866_v23 = vpop.xlane.xlu0 %865 }
 0x187   : > { %5609 = vrsqrt.f32 %v903_v22  ;;  %v6431_v36 = vmul.f32 0.0078125, %v866_v23  ;;  %vm913_vm2 = vweird.f32 %v903_v22  ;;  %v6471_v23 = vld [vmem:[%s8347_s14] ss:$0 sm:$0xff] }
 0x188   : > { %v980_v24 = vpop.xlane.xlu2 %979 }
 0x189   : > { %v6425_v25 = vmul.f32 0.0078125, %v980_v24  ;;  %v892_v46 = vmul.f32 %v6431_v36, %v6431_v36 }
 0x18b   : > { %v1007_v27 = vmul.f32 %v6425_v25, %v6425_v25 }
 0x18d   : > { %v5610_v26 = vpop.eup %5609 }
 0x18e   : > { %v908_v28 = vmul.f32 %v5610_v26, %v903_v22  ;;  %v868_v29 = vpop.xlane.xlu1 %867  ;;  %v992_v30 = vpop.xlane.xlu0 %991  ;;  %vm914_vm1 = vweird.f32 %v5610_v26  ;;  %v1015_v22 = vsub.f32 %v6392_v52, %v6425_v25 }
 0x18f   : > { %v1003_v31 = vmul.f32 0.0078125, %v992_v30  ;;  %v6433_v37 = vmul.f32 0.0078125, %v868_v29  ;;  %vm915_vm3 = vmor %vm913_vm2, %vm914_vm1 }
 0x190   : > { %v909_v32 = vmul.f32 %v5610_v26, %v908_v28  ;;  %v6429_v33 = vpop.xlane.xlu2 %981 }
 0x191   : > { %v1011_v34 = vsub.f32 %v1003_v31, %v1007_v27  ;;  %v893_v47 = vmul.f32 %v6433_v37, %v6433_v37  ;;  %v6481_v31 = vld [vmem:[%s8348_s4] ss:$0 sm:$0xff] }
 0x192   : > { %v910_v35 = vmul.f32 0.5, %v909_v32 }
 0x193   : > { %v1019_v38 = vadd.f32 1e-05, %v1011_v34 }
 0x194   : > { %v911_v39 = vsub.f32 1.5, %v910_v35 }
 0x195   : > { %5611 = vrsqrt.f32 %v1019_v38  ;;  %vm1029_vm5 = vweird.f32 %v1019_v38 }
 0x196   : > { %v912_v41 = vmul.f32 %v5610_v26, %v911_v39  ;;  %v880_v43 = vpop.xlane.xlu1 %879  ;;  %v878_v44 = vpop.xlane.xlu0 %877 }
 0x197   : > { %v889_v48 = vmul.f32 0.0078125, %v880_v43  ;;  %v888_v49 = vmul.f32 0.0078125, %v878_v44 }
 0x198   : > { %v916_v50 = vsel %vm915_vm3, %v5610_v26, %v912_v41  ;;  %v882_v42 = vpop.xlane.xlu2 %881 }
 0x199   : > { %v947_v54 = vmul.f32 %v916_v50, %v899_v40  ;;  %v897_v55 = vsub.f32 %v889_v48, %v893_v47  ;;  %v896_v56 = vsub.f32 %v888_v49, %v892_v46  ;;  %v890_v10 = vmul.f32 0.0078125, %v882_v42 }
 0x19a   : > { %v901_v50 = vsub.f32 %v6398_v60, %v6433_v37  ;;  %v6497_v42 = vmul.f32 0.0078125, %v6429_v33 }
 0x19b   : > { %v5612_v57 = vpop.eup %5611  ;;  %v955_v58 = vmul.f32 %v6439_v45, %v947_v54  ;;  %v905_v59 = vadd.f32 1e-05, %v897_v55  ;;  %v6451_v62 = vadd.f32 1e-05, %v896_v56  ;;  %v900_v56 = vsub.f32 %v6390_v51, %v6431_v36 }
 0x19c   : > { %v1024_v63 = vmul.f32 %v5612_v57, %v1019_v38  ;;  %vm1030_vm4 = vweird.f32 %v5612_v57 }
 0x19d   : > { %v963_v0 = vadd.f32 %v6448_v53, %v955_v58  ;;  %5613 = vrsqrt.f32 %v905_v59  ;;  %vm1031_vm6 = vmor %vm1029_vm5, %vm1030_vm4  ;;  %vm933_vm9 = vweird.f32 %v905_v59  ;;  %vm923_vm11 = vweird.f32 %v6451_v62 }
 0x19e   : > { %v1025_v1 = vmul.f32 %v5612_v57, %v1024_v63  ;;  %5615 = vrsqrt.f32 %v6451_v62  ;;  %v870_v2 = vpop.xlane.xlu1 %869  ;;  %v984_v4 = vpop.xlane.xlu0 %983 }
 0x19f   : > { %967 = vst [vmem:[%s8349_s25] sm:$0xff] %v963_v0  ;;  %v6458_v5 = vmul.f32 0.0078125, %v870_v2  ;;  %v6460_v6 = vmul.f32 0.0078125, %v984_v4 }
 0x1a0   : > { %v1026_v7 = vmul.f32 0.5, %v1025_v1  ;;  %v996_v9 = vpop.xlane.xlu2 %995 }
 0x1a1   : > { %v894_v11 = vmul.f32 %v6458_v5, %v6458_v5  ;;  %v1009_v12 = vmul.f32 %v6460_v6, %v6460_v6  ;;  %v1005_v15 = vmul.f32 0.0078125, %v996_v9 }
 0x1a2   : > { %v1027_v14 = vsub.f32 1.5, %v1026_v7 }
 0x1a3   : > { %v5614_v16 = vpop.eup %5613  ;;  %v898_v17 = vsub.f32 %v890_v10, %v894_v11  ;;  %v1013_v21 = vsub.f32 %v1005_v15, %v1009_v12 }
 0x1a4   : > { %v5616_v18 = vpop.eup %5615  ;;  %v1028_v19 = vmul.f32 %v5612_v57, %v1027_v14  ;;  %v928_v20 = vmul.f32 %v5614_v16, %v905_v59  ;;  %vm934_vm7 = vweird.f32 %v5614_v16 }
 0x1a5   : > { %v918_v24 = vmul.f32 %v5616_v18, %v6451_v62  ;;  %v6474_v26 = vadd.f32 1e-05, %v898_v17  ;;  %v6476_v29 = vadd.f32 1e-05, %v1013_v21  ;;  %vm924_vm8 = vweird.f32 %v5616_v18  ;;  %vm935_vm10 = vmor %vm933_vm9, %vm934_vm7 }
 0x1a6   : > { %v1032_v27 = vsel %vm1031_vm6, %v5612_v57, %v1028_v19  ;;  %v929_v28 = vmul.f32 %v5614_v16, %v928_v20  ;;  %v986_v30 = vpop.xlane.xlu1 %985  ;;  %v998_v32 = vpop.xlane.xlu0 %997  ;;  %vm925_vm12 = vmor %vm923_vm11, %vm924_vm8  ;;  %v1008_v62 = vmul.f32 %v6497_v42, %v6497_v42 }
 0x1a7   : > { %v1063_v52 = vmul.f32 %v1032_v27, %v1015_v22  ;;  %v919_v25 = vmul.f32 %v5616_v18, %v918_v24  ;;  %5617 = vrsqrt.f32 %v6474_v26  ;;  %v6485_v35 = vmul.f32 0.0078125, %v986_v30 }
 0x1a8   : > { %v930_v34 = vmul.f32 0.5, %v929_v28  ;;  %5619 = vrsqrt.f32 %v6476_v29  ;;  %v1006_v43 = vmul.f32 0.0078125, %v998_v32  ;;  %vm943_vm15 = vweird.f32 %v6474_v26 }
 0x1a9   : > { %v1071_v38 = vmul.f32 %v6471_v23, %v1063_v52  ;;  %v920_v39 = vmul.f32 0.5, %v919_v25  ;;  %v1010_v41 = vmul.f32 %v6485_v35, %v6485_v35  ;;  %vm1049_vm1 = vweird.f32 %v6476_v29 }
 0x1aa   : > { %v931_v40 = vsub.f32 1.5, %v930_v34  ;;  %v1017_v24 = vsub.f32 %v6412_v8, %v6460_v6 }
 0x1ab   : > { %v1079_v44 = vadd.f32 %v6481_v31, %v1071_v38  ;;  %v921_v46 = vsub.f32 1.5, %v920_v39  ;;  %v1014_v48 = vsub.f32 %v1006_v43, %v1010_v41 }
 0x1ac   : > { %v932_v47 = vmul.f32 %v5614_v16, %v931_v40 }
 0x1ad   : > { %v5618_v49 = vpop.eup %5617  ;;  %1083 = vst [vmem:[%s8349_s25 + $0x20] sm:$0xff] %v1079_v44  ;;  %v922_v54 = vmul.f32 %v5616_v18, %v921_v46  ;;  %v1022_v60 = vadd.f32 1e-05, %v1014_v48 }
 0x1ae   : > { %v5620_v55 = vpop.eup %5619  ;;  %v936_v57 = vsel %vm935_vm10, %v5614_v16, %v932_v47  ;;  %v938_v58 = vmul.f32 %v5618_v49, %v6474_v26  ;;  %v994_v37 = vpop.xlane.xlu1 %993  ;;  %vm944_vm13 = vweird.f32 %v5618_v49  ;;  %v1016_v47 = vsub.f32 %v6400_v61, %v6497_v42 }
 0x1af   : > { %v949_v59 = vmul.f32 %v936_v57, %v901_v50  ;;  %v926_v63 = vsel %vm925_vm12, %v5616_v18, %v922_v54  ;;  %v1044_v0 = vmul.f32 %v5620_v55, %v6476_v29  ;;  %5621 = vrsqrt.f32 %v1022_v60  ;;  %vm945_vm0 = vmor %vm943_vm15, %vm944_vm13 }
 0x1b0   : > { %v948_v33 = vmul.f32 %v926_v63, %v900_v56  ;;  %v939_v1 = vmul.f32 %v5618_v49, %v938_v58  ;;  %v1004_v51 = vmul.f32 0.0078125, %v994_v37  ;;  %vm1050_vm14 = vweird.f32 %v5620_v55 }
 0x1b1   : > { %v957_v2 = vmul.f32 %v6439_v45, %v949_v59  ;;  %v1045_v4 = vmul.f32 %v5620_v55, %v1044_v0  ;;  %v902_v18 = vsub.f32 %v6404_v3, %v6458_v5  ;;  %vm1051_vm2 = vmor %vm1049_vm1, %vm1050_vm14  ;;  %vm1059_vm4 = vweird.f32 %v1022_v60 }
 0x1b2   : > { %v956_v36 = vmul.f32 %v6439_v45, %v948_v33  ;;  %v940_v7 = vmul.f32 0.5, %v939_v1  ;;  %v1012_v11 = vsub.f32 %v1004_v51, %v1008_v62 }
 0x1b3   : > { %v965_v9 = vadd.f32 %v6448_v53, %v957_v2  ;;  %v1046_v10 = vmul.f32 0.5, %v1045_v4 }
 0x1b4   : > { %v964_v12 = vadd.f32 %v6448_v53, %v956_v36  ;;  %v941_v14 = vsub.f32 1.5, %v940_v7  ;;  %v1020_v16 = vadd.f32 1e-05, %v1012_v11 }
 0x1b5   : > { %969 = vst [vmem:[%s8349_s25 + $0x10] sm:$0xff] %v965_v9  ;;  %v1047_v15 = vsub.f32 1.5, %v1046_v10  ;;  %v5622_v17 = vpop.eup %5621 }
 0x1b6   : > { %968 = vst [vmem:[%s8349_s25 + $0x8] sm:$0xff] %v964_v12  ;;  %v942_v19 = vmul.f32 %v5618_v49, %v941_v14  ;;  %v1054_v21 = vmul.f32 %v5622_v17, %v1022_v60  ;;  %5623 = vrsqrt.f32 %v1020_v16  ;;  %vm1060_vm3 = vweird.f32 %v5622_v17 }
 0x1b7   : > { %v1048_v20 = vmul.f32 %v5620_v55, %v1047_v15  ;;  %vm1061_vm5 = vmor %vm1059_vm4, %vm1060_vm3  ;;  %vm1039_vm7 = vweird.f32 %v1020_v16 }
 0x1b8   : > { %v946_v22 = vsel %vm945_vm0, %v5618_v49, %v942_v19  ;;  %v1055_v30 = vmul.f32 %v5622_v17, %v1054_v21 }
 0x1b9   : > { %v950_v27 = vmul.f32 %v946_v22, %v902_v18  ;;  %v1052_v28 = vsel %vm1051_vm2, %v5620_v55, %v1048_v20 }
 0x1ba   : > { %v1065_v52 = vmul.f32 %v1052_v28, %v1017_v24  ;;  %v1056_v5 = vmul.f32 0.5, %v1055_v30 }
 0x1bb   : > { %v958_v3 = vmul.f32 %v6439_v45, %v950_v27  ;;  %v1018_v45 = vsub.f32 %v6418_v13, %v6485_v35 }
 0x1bc   : > { %v1073_v26 = vmul.f32 %v6471_v23, %v1065_v52  ;;  %v5624_v25 = vpop.eup %5623  ;;  %v1057_v29 = vsub.f32 1.5, %v1056_v5 }
 0x1bd   : > { %v966_v32 = vadd.f32 %v6448_v53, %v958_v3  ;;  %v1034_v38 = vmul.f32 %v5624_v25, %v1020_v16  ;;  %vm1040_vm6 = vweird.f32 %v5624_v25 }
 0x1be   : > { %v1081_v34 = vadd.f32 %v6481_v31, %v1073_v26  ;;  %v1058_v8 = vmul.f32 %v5622_v17, %v1057_v29  ;;  %vm1041_vm8 = vmor %vm1039_vm7, %vm1040_vm6 }
 0x1bf   : > { %970 = vst [vmem:[%s8349_s25 + $0x18] sm:$0xff] %v966_v32  ;;  %v1035_v53 = vmul.f32 %v5624_v25, %v1034_v38 }
 0x1c0   : > { %1085 = vst [vmem:[%s8349_s25 + $0x30] sm:$0xff] %v1081_v34  ;;  %v1062_v6 = vsel %vm1061_vm5, %v5622_v17, %v1058_v8 }
 0x1c1   : > { %v1066_v39 = vmul.f32 %v1062_v6, %v1018_v45  ;;  %v1036_v40 = vmul.f32 0.5, %v1035_v53 }
 0x1c3   : > { %v1074_v41 = vmul.f32 %v6471_v23, %v1066_v39  ;;  %v1037_v43 = vsub.f32 1.5, %v1036_v40 }
 0x1c5   : > { %v1082_v44 = vadd.f32 %v6481_v31, %v1074_v41  ;;  %v1038_v46 = vmul.f32 %v5624_v25, %v1037_v43 }
 0x1c7   : > { %1086 = vst [vmem:[%s8349_s25 + $0x38] sm:$0xff] %v1082_v44  ;;  %v1042_v13 = vsel %vm1041_vm8, %v5624_v25, %v1038_v46 }
 0x1c8   : > { %v1064_v35 = vmul.f32 %v1042_v13, %v1016_v47 }
 0x1ca   : > { %v1072_v48 = vmul.f32 %v6471_v23, %v1064_v35 }
 0x1cc   : > { %v1080_v49 = vadd.f32 %v6481_v31, %v1072_v48 }
 0x1ce   : > { %1084 = vst [vmem:[%s8349_s25 + $0x28] sm:$0xff] %v1080_v49 }
 0x1cf PF: > { %s8350_s20 = sld [smem:[#allocation46_spill]]  ;;  %v4996_v1 = vld [vmem:[%s6315_s2 + $0x2a0] sm:$0xf]  ;;  %v5445_v62 = vld [vmem:[%s6315_s2 + $0x2cc] sm:$0xf0] }
 0x1d0   : > { %v5439_v2 = vld [vmem:[%s6315_s2 + $0x2a4] sm:$0xf]  ;;  %v4997_v4 = vor.u32 %v5445_v62, %v4996_v1  ;;  %v4998_v51 = vld [vmem:[%s6315_s2 + $0x2d0] sm:$0xf0]  ;;  %v5004_v36 = vld [vmem:[%s6315_s2 + $0x2a8] sm:$0xf] }
 0x1d1   : > { %v5446_v7 = vld [vmem:[%s6315_s2 + $0x2d4] sm:$0xf0]  ;;  %v5001_v9 = vor.u32 %v5439_v2, %v4998_v51  ;;  %v5440_v11 = vld [vmem:[%s6315_s2 + $0x2ac] sm:$0xf]  ;;  %v5006_v12 = vld [vmem:[%s6315_s2 + $0x2d8] sm:$0xf0] }
 0x1d2   : > { %v5005_v10 = vor.u32 %v5446_v7, %v5004_v36  ;;  %1879 = vmatpush.bf16.msra.mxu0 %v4997_v4  ;;  %v5009_v14 = vor.u32 %v5440_v11, %v5006_v12  ;;  %v4948_v15 = vld [vmem:[%s6315_s2 + $0x240] sm:$0xf]  ;;  %v5433_v16 = vld [vmem:[%s6315_s2 + $0x26c] sm:$0xf0]  ;;  %v5427_v17 = vld [vmem:[%s6315_s2 + $0x244] sm:$0xf] }
 0x1d3   : > { %1908 = vmatpush.bf16.msra.mxu1 %v5001_v9  ;;  %v4949_v18 = vor.u32 %v5433_v16, %v4948_v15  ;;  %v4950_v19 = vld [vmem:[%s6315_s2 + $0x270] sm:$0xf0]  ;;  %v4956_v20 = vld [vmem:[%s6315_s2 + $0x248] sm:$0xf]  ;;  %v5434_v21 = vld [vmem:[%s6315_s2 + $0x274] sm:$0xf0] }
 0x1d4   : > { %1937 = vmatpush.bf16.msra.mxu2 %v5005_v10  ;;  %1966 = vmatpush.bf16.msra.mxu3 %v5009_v14  ;;  %v4953_v22 = vor.u32 %v5427_v17, %v4950_v19  ;;  %v4957_v24 = vor.u32 %v5434_v21, %v4956_v20  ;;  %v5428_v27 = vld [vmem:[%s6315_s2 + $0x24c] sm:$0xf]  ;;  %v4958_v28 = vld [vmem:[%s6315_s2 + $0x278] sm:$0xf0]  ;;  %v4900_v52 = vld [vmem:[%s6315_s2 + $0x1e0] sm:$0xf] }
 0x1d5   : > { %v6549_v61 = vld [vmem:[%s8350_s20] sm:$0xff]  ;;  %v6554_v50 = vld [vmem:[%s8350_s20 + $0x10] sm:$0xff]  ;;  %v6563_v31 = vld [vmem:[%s8350_s20 + $0x8] sm:$0xff]  ;;  %v4961_v30 = vor.u32 %v5428_v27, %v4958_v28 }
 0x1d6   : > { %1095 = vadd.xlane.f32.xlu0 %v6549_v61  ;;  %1099 = vadd.xlane.f32.xlu2 %v6554_v50  ;;  %v1111_v23 = vmul.f32 %v6549_v61, %v6549_v61  ;;  %v6568_v42 = vld [vmem:[%s8350_s20 + $0x18] sm:$0xff]  ;;  %v1112_v54 = vmul.f32 %v6563_v31, %v6563_v31  ;;  %v1113_v55 = vmul.f32 %v6554_v50, %v6554_v50  ;;  %v6579_v56 = vld [vmem:[%s8350_s20 + $0x20] sm:$0xff]  ;;  %v6587_v58 = vld [vmem:[%s8350_s20 + $0x28] sm:$0xff] }
 0x1d7   : > { %v1114_v57 = vmul.f32 %v6568_v42, %v6568_v42  ;;  %v1116_v60 = vmul.f32 %v6587_v58, %v6587_v58  ;;  %v1115_v37 = vmul.f32 %v6579_v56, %v6579_v56  ;;  %v6597_v59 = vld [vmem:[%s8350_s20 + $0x30] sm:$0xff]  ;;  %v6604_v0 = vld [vmem:[%s8350_s20 + $0x38] sm:$0xff]  ;;  %1880 = vmatpush.bf16.msra.mxu0 %v4949_v18  ;;  %1909 = vmatpush.bf16.msra.mxu1 %v4953_v22  ;;  %v5415_v5 = vld [vmem:[%s6315_s2 + $0x1e4] sm:$0xf] }
 0x1d8   : > { %1119 = vadd.xlane.f32.xlu1 %v1111_v23  ;;  %v1117_v63 = vmul.f32 %v6597_v59, %v6597_v59  ;;  %v1118_v33 = vmul.f32 %v6604_v0, %v6604_v0  ;;  %1938 = vmatpush.bf16.msra.mxu2 %v4957_v24  ;;  %v5421_v3 = vld [vmem:[%s6315_s2 + $0x20c] sm:$0xf0]  ;;  %v4902_v25 = vld [vmem:[%s6315_s2 + $0x210] sm:$0xf0]  ;;  %v4908_v32 = vld [vmem:[%s6315_s2 + $0x1e8] sm:$0xf] }
 0x1d9   : > { %1967 = vmatpush.bf16.msra.mxu3 %v4961_v30  ;;  %v4901_v26 = vor.u32 %v5421_v3, %v4900_v52  ;;  %v5422_v29 = vld [vmem:[%s6315_s2 + $0x214] sm:$0xf0]  ;;  %v4905_v34 = vor.u32 %v5415_v5, %v4902_v25  ;;  %v5416_v8 = vld [vmem:[%s6315_s2 + $0x1ec] sm:$0xf]  ;;  %v4910_v45 = vld [vmem:[%s6315_s2 + $0x218] sm:$0xf0] }
 0x1da   : > { %v4909_v38 = vor.u32 %v5422_v29, %v4908_v32  ;;  %v4913_v53 = vor.u32 %v5416_v8, %v4910_v45  ;;  %v4852_v6 = vld [vmem:[%s6315_s2 + $0x180] sm:$0xf]  ;;  %v5409_v39 = vld [vmem:[%s6315_s2 + $0x1ac] sm:$0xf0]  ;;  %v5403_v40 = vld [vmem:[%s6315_s2 + $0x184] sm:$0xf] }
 0x1db   : > { %1881 = vmatpush.bf16.msra.mxu0 %v4901_v26  ;;  %1910 = vmatpush.bf16.msra.mxu1 %v4905_v34  ;;  %v4853_v41 = vor.u32 %v5409_v39, %v4852_v6  ;;  %v4854_v43 = vld [vmem:[%s6315_s2 + $0x1b0] sm:$0xf0]  ;;  %v4860_v44 = vld [vmem:[%s6315_s2 + $0x188] sm:$0xf]  ;;  %v5410_v46 = vld [vmem:[%s6315_s2 + $0x1b4] sm:$0xf0] }
 0x1dc   : > { %1939 = vmatpush.bf16.msra.mxu2 %v4909_v38  ;;  %v4857_v47 = vor.u32 %v5403_v40, %v4854_v43  ;;  %v4861_v13 = vor.u32 %v5410_v46, %v4860_v44  ;;  %v5404_v35 = vld [vmem:[%s6315_s2 + $0x18c] sm:$0xf]  ;;  %v4862_v48 = vld [vmem:[%s6315_s2 + $0x1b8] sm:$0xf0]  ;;  %v4804_v23 = vld [vmem:[%s6315_s2 + $0x120] sm:$0xf] }
 0x1dd   : > { %1968 = vmatpush.bf16.msra.mxu3 %v4913_v53  ;;  %v4865_v49 = vor.u32 %v5404_v35, %v4862_v48  ;;  %v5392_v62 = vld [vmem:[%s6315_s2 + $0x12c] sm:$0xf]  ;;  %v4814_v2 = vld [vmem:[%s6315_s2 + $0x158] sm:$0xf0]  ;;  %v4756_v51 = vld [vmem:[%s6315_s2 + $0xc0] sm:$0xf] }
 0x1de   : > { %1097 = vadd.xlane.f32.xlu0 %v6563_v31  ;;  %1101 = vadd.xlane.f32.xlu2 %v6568_v42  ;;  %v4817_v4 = vor.u32 %v5392_v62, %v4814_v2  ;;  %v5385_v36 = vld [vmem:[%s6315_s2 + $0xec] sm:$0xf0]  ;;  %v5379_v7 = vld [vmem:[%s6315_s2 + $0xc4] sm:$0xf]  ;;  %v4758_v10 = vld [vmem:[%s6315_s2 + $0xf0] sm:$0xf0] }
 0x1df   : > { %1882 = vmatpush.bf16.msra.mxu0 %v4853_v41  ;;  %1911 = vmatpush.bf16.msra.mxu1 %v4857_v47  ;;  %v4757_v9 = vor.u32 %v5385_v36, %v4756_v51  ;;  %v4764_v11 = vld [vmem:[%s6315_s2 + $0xc8] sm:$0xf]  ;;  %v5386_v12 = vld [vmem:[%s6315_s2 + $0xf4] sm:$0xf0]  ;;  %v4761_v14 = vor.u32 %v5379_v7, %v4758_v10  ;;  %v5380_v16 = vld [vmem:[%s6315_s2 + $0xcc] sm:$0xf] }
 0x1e0   : > { %1121 = vadd.xlane.f32.xlu1 %v1112_v54  ;;  %1940 = vmatpush.bf16.msra.mxu2 %v4861_v13  ;;  %v5397_v54 = vld [vmem:[%s6315_s2 + $0x14c] sm:$0xf0]  ;;  %v4765_v15 = vor.u32 %v5386_v12, %v4764_v11  ;;  %v4766_v17 = vld [vmem:[%s6315_s2 + $0xf8] sm:$0xf0]  ;;  %v4708_v19 = vld [vmem:[%s6315_s2 + $0x60] sm:$0xf] }
 0x1e1   : > { %1969 = vmatpush.bf16.msra.mxu3 %v4865_v49  ;;  %v4769_v18 = vor.u32 %v5380_v16, %v4766_v17  ;;  %v5373_v20 = vld [vmem:[%s6315_s2 + $0x8c] sm:$0xf0]  ;;  %v5367_v21 = vld [vmem:[%s6315_s2 + $0x64] sm:$0xf]  ;;  %v4710_v24 = vld [vmem:[%s6315_s2 + $0x90] sm:$0xf0] }
 0x1e2   : > { %v4709_v22 = vor.u32 %v5373_v20, %v4708_v19  ;;  %v4716_v27 = vld [vmem:[%s6315_s2 + $0x68] sm:$0xf]  ;;  %v5374_v28 = vld [vmem:[%s6315_s2 + $0x94] sm:$0xf0]  ;;  %v4713_v3 = vor.u32 %v5367_v21, %v4710_v24  ;;  %v5368_v26 = vld [vmem:[%s6315_s2 + $0x6c] sm:$0xf] }
 0x1e3   : > { %v4717_v5 = vor.u32 %v5374_v28, %v4716_v27  ;;  %v4718_v25 = vld [vmem:[%s6315_s2 + $0x98] sm:$0xf0]  ;;  %v4660_v45 = vld [vmem:[%s6315_s2] sm:$0xf]  ;;  %v5361_v53 = vld [vmem:[%s6315_s2 + $0x2c] sm:$0xf0] }
 0x1e4   : > { %v4721_v29 = vor.u32 %v5368_v26, %v4718_v25  ;;  %v4661_v6 = vor.u32 %v5361_v53, %v4660_v45  ;;  %v5355_v39 = vld [vmem:[%s6315_s2 + $0x4] sm:$0xf]  ;;  %v4662_v40 = vld [vmem:[%s6315_s2 + $0x30] sm:$0xf0]  ;;  %v4668_v41 = vld [vmem:[%s6315_s2 + $0x8] sm:$0xf] }
 0x1e5   : > { %1970 = vmatpush.bf16.msra.mxu3 %v4817_v4  ;;  %v4665_v44 = vor.u32 %v5355_v39, %v4662_v40  ;;  %v5362_v46 = vld [vmem:[%s6315_s2 + $0x34] sm:$0xf0]  ;;  %v5356_v47 = vld [vmem:[%s6315_s2 + $0xc] sm:$0xf]  ;;  %v4670_v13 = vld [vmem:[%s6315_s2 + $0x38] sm:$0xf0] }
 0x1e6   : > { %1123 = vadd.xlane.f32.xlu0 %v1113_v55  ;;  %1103 = vadd.xlane.f32.xlu2 %v6579_v56  ;;  %v5391_v55 = vld [vmem:[%s6315_s2 + $0x124] sm:$0xf]  ;;  %v4669_v35 = vor.u32 %v5362_v46, %v4668_v41  ;;  %v4673_v48 = vor.u32 %v5356_v47, %v4670_v13 }
 0x1e8   : > { %1125 = vadd.xlane.f32.xlu1 %v1114_v57  ;;  %v4805_v57 = vor.u32 %v5397_v54, %v4804_v23 }
 0x1e9   : > { %1971 = vmatpush.bf16.msra.mxu3 %v4769_v18 }
 0x1ea   : > { %1883 = vmatpush.bf16.msra.mxu0 %v4805_v57 }
 0x1ed   : > { %1972 = vmatpush.bf16.msra.mxu3 %v4721_v29 }
 0x1ee   : > { %1105 = vadd.xlane.f32.xlu0 %v6587_v58  ;;  %1129 = vadd.xlane.f32.xlu2 %v1116_v60  ;;  %v4806_v60 = vld [vmem:[%s6315_s2 + $0x150] sm:$0xf0] }
 0x1ef   : > { %1884 = vmatpush.bf16.msra.mxu0 %v4757_v9 }
 0x1f0   : > { %1127 = vadd.xlane.f32.xlu1 %v1115_v37  ;;  %v4812_v37 = vld [vmem:[%s6315_s2 + $0x128] sm:$0xf] }
 0x1f1   : > { %1973 = vmatpush.bf16.msra.mxu3 %v4673_v48 }
 0x1f3   : > { %1885 = vmatpush.bf16.msra.mxu0 %v4709_v22 }
 0x1f6   : > { %1107 = vadd.xlane.f32.xlu0 %v6597_v59  ;;  %1131 = vadd.xlane.f32.xlu2 %v1117_v63  ;;  %v5398_v63 = vld [vmem:[%s6315_s2 + $0x154] sm:$0xf0] }
 0x1f7   : > { %v4813_v1 = vor.u32 %v5398_v63, %v4812_v37  ;;  %1886 = vmatpush.bf16.msra.mxu0 %v4661_v6 }
 0x1f8   : > { %1109 = vadd.xlane.f32.xlu1 %v6604_v0 }
 0x1f9   : > { %1941 = vmatpush.bf16.msra.mxu2 %v4813_v1 }
 0x1fd   : > { %1942 = vmatpush.bf16.msra.mxu2 %v4765_v15 }
 0x1fe   : > { %1133 = vadd.xlane.f32.xlu0 %v1118_v33  ;;  %v4809_v33 = vor.u32 %v5391_v55, %v4806_v60 }
 0x200   : > { %1912 = vmatpush.bf16.msra.mxu1 %v4809_v33 }
 0x201   : > { %1943 = vmatpush.bf16.msra.mxu2 %v4717_v5 }
 0x204   : > { %1913 = vmatpush.bf16.msra.mxu1 %v4761_v14 }
 0x205   : > { %1944 = vmatpush.bf16.msra.mxu2 %v4669_v35 }
 0x208   : > { %1914 = vmatpush.bf16.msra.mxu1 %v4713_v3 }
 0x20c   : > { %1915 = vmatpush.bf16.msra.mxu1 %v4665_v44 }
 0x249   : > { %v1096_v30 = vpop.xlane.xlu0 %1095  ;;  %v1100_v52 = vpop.xlane.xlu2 %1099 }
 0x24a   : > { %v6666_v32 = vmul.f32 0.0078125, %v1096_v30  ;;  %v6680_v60 = vmul.f32 0.0078125, %v1100_v52 }
 0x24b   : > { %v1120_v34 = vpop.xlane.xlu1 %1119 }
 0x24c   : > { %v1151_v38 = vmul.f32 %v6666_v32, %v6666_v32  ;;  %v1143_v8 = vmul.f32 0.0078125, %v1120_v34  ;;  %v1153_v62 = vmul.f32 %v6680_v60, %v6680_v60 }
 0x24e   : > { %v1159_v43 = vsub.f32 %v1143_v8, %v1151_v38 }
 0x250   : > { %v1175_v49 = vadd.f32 1e-05, %v1159_v43  ;;  %v5429_v43 = vld [vmem:[%s6315_s2 + $0x254] sm:$0xf] }
 0x251   : > { %v1098_v23 = vpop.xlane.xlu0 %1097  ;;  %v1102_v54 = vpop.xlane.xlu2 %1101 }
 0x252   : > { %v6678_v55 = vmul.f32 0.0078125, %v1098_v23  ;;  %5628 = vrsqrt.f32 %v1175_v49  ;;  %v6684_v33 = vmul.f32 0.0078125, %v1102_v54  ;;  %vm1189_vm10 = vweird.f32 %v1175_v49 }
 0x253   : > { %v1122_v57 = vpop.xlane.xlu1 %1121 }
 0x254   : > { %v1152_v37 = vmul.f32 %v6678_v55, %v6678_v55  ;;  %v1144_v63 = vmul.f32 0.0078125, %v1122_v57  ;;  %v1154_v10 = vmul.f32 %v6684_v33, %v6684_v33  ;;  %v1168_v23 = vsub.f32 %v6563_v31, %v6678_v55 }
 0x256   : > { %v1160_v1 = vsub.f32 %v1144_v63, %v1152_v37 }
 0x258   : > { %v6688_v2 = vpop.eup %5628  ;;  %v1176_v4 = vadd.f32 1e-05, %v1160_v1 }
 0x259   : > { %v1124_v51 = vpop.xlane.xlu0 %1123  ;;  %v1104_v36 = vpop.xlane.xlu2 %1103  ;;  %v1184_v7 = vmul.f32 %v6688_v2, %v1175_v49  ;;  %vm1190_vm9 = vweird.f32 %v6688_v2  ;;  %v1167_v49 = vsub.f32 %v6549_v61, %v6666_v32 }
 0x25a   : > { %v1145_v9 = vmul.f32 0.0078125, %v1124_v51  ;;  %5630 = vrsqrt.f32 %v1176_v4  ;;  %v6696_v18 = vmul.f32 0.0078125, %v1104_v36  ;;  %vm6718_vm12 = vmor %vm1189_vm10, %vm1190_vm9  ;;  %vm1199_vm13 = vweird.f32 %v1176_v4 }
 0x25b   : > { %v1126_v11 = vpop.xlane.xlu1 %1125  ;;  %v1185_v12 = vmul.f32 %v6688_v2, %v1184_v7 }
 0x25c   : > { %v1161_v14 = vsub.f32 %v1145_v9, %v1153_v62  ;;  %v1146_v15 = vmul.f32 0.0078125, %v1126_v11  ;;  %v1155_v52 = vmul.f32 %v6696_v18, %v6696_v18 }
 0x25d   : > { %v1186_v16 = vmul.f32 0.5, %v1185_v12 }
 0x25e   : > { %v6694_v17 = vadd.f32 1e-05, %v1161_v14  ;;  %v1162_v19 = vsub.f32 %v1146_v15, %v1154_v10  ;;  %v5012_v14 = vld [vmem:[%s6315_s2 + $0x2b0] sm:$0xf]  ;;  %v5447_v15 = vld [vmem:[%s6315_s2 + $0x2dc] sm:$0xf0] }
 0x25f   : > { %v1187_v27 = vsub.f32 1.5, %v1186_v16  ;;  %v5441_v16 = vld [vmem:[%s6315_s2 + $0x2b4] sm:$0xf] }
 0x260   : > { %5632 = vrsqrt.f32 %v6694_v17  ;;  %v5631_v20 = vpop.eup %5630  ;;  %v6699_v21 = vadd.f32 1e-05, %v1162_v19  ;;  %vm1209_vm3 = vweird.f32 %v6694_v17 }
 0x261   : > { %v1106_v22 = vpop.xlane.xlu0 %1105  ;;  %v1130_v24 = vpop.xlane.xlu2 %1129  ;;  %v1194_v28 = vmul.f32 %v5631_v20, %v1176_v4  ;;  %v1188_v38 = vmul.f32 %v6688_v2, %v1187_v27  ;;  %vm1200_vm11 = vweird.f32 %v5631_v20 }
 0x262   : > { %v6701_v30 = vmul.f32 0.0078125, %v1106_v22  ;;  %5634 = vrsqrt.f32 %v6699_v21  ;;  %v1148_v3 = vmul.f32 0.0078125, %v1130_v24  ;;  %vm1201_vm14 = vmor %vm1199_vm13, %vm1200_vm11  ;;  %vm1219_vm15 = vweird.f32 %v6699_v21  ;;  %v5014_v22 = vld [vmem:[%s6315_s2 + $0x2e0] sm:$0xf0]  ;;  %v5020_v24 = vld [vmem:[%s6315_s2 + $0x2b8] sm:$0xf] }
 0x263   : > { %v1128_v5 = vpop.xlane.xlu1 %1127  ;;  %v1195_v26 = vmul.f32 %v5631_v20, %v1194_v28  ;;  %v1192_v13 = vsel %vm6718_vm12, %v6688_v2, %v1188_v38 }
 0x264   : > { %v1156_v25 = vmul.f32 %v6701_v30, %v6701_v30  ;;  %v1147_v29 = vmul.f32 0.0078125, %v1128_v5  ;;  %v1263_v2 = vmul.f32 %v1192_v13, %v1167_v49  ;;  %v5448_v5 = vld [vmem:[%s6315_s2 + $0x2e4] sm:$0xf0]  ;;  %v4972_v49 = vld [vmem:[%s6315_s2 + $0x258] sm:$0xf] }
 0x265   : > { %v1196_v8 = vmul.f32 0.5, %v1195_v26  ;;  %v5021_v38 = vor.u32 %v5448_v5, %v5020_v24  ;;  %v4868_v24 = vld [vmem:[%s6315_s2 + $0x190] sm:$0xf] }
 0x266   : > { %v6708_v34 = vpop.eup %5632  ;;  %v1164_v45 = vsub.f32 %v1148_v3, %v1156_v25  ;;  %v1163_v6 = vsub.f32 %v1147_v29, %v1155_v52  ;;  %v5013_v3 = vor.u32 %v5447_v15, %v5012_v14  ;;  %v5017_v29 = vor.u32 %v5441_v16, %v5014_v22  ;;  %v5424_v14 = vld [vmem:[%s6315_s2 + $0x224] sm:$0xf0]  ;;  %v4926_v22 = vld [vmem:[%s6315_s2 + $0x228] sm:$0xf0] }
 0x267   : > { %v1204_v53 = vmul.f32 %v6708_v34, %v6694_v17  ;;  %v1197_v39 = vsub.f32 1.5, %v1196_v8  ;;  %v5442_v8 = vld [vmem:[%s6315_s2 + $0x2bc] sm:$0xf]  ;;  %vm1210_vm1 = vweird.f32 %v6708_v34  ;;  %2053 = vmatpush.bf16.msrb.mxu2 %v5021_v38  ;;  %v1169_v15 = vsub.f32 %v6554_v50, %v6680_v60  ;;  %v5412_v50 = vld [vmem:[%s6315_s2 + $0x1c4] sm:$0xf0] }
 0x268   : > { %v6714_v40 = vadd.f32 1e-05, %v1164_v45  ;;  %v6716_v41 = vpop.eup %5634  ;;  %v6723_v46 = vadd.f32 1e-05, %v1163_v6  ;;  %v5022_v45 = vld [vmem:[%s6315_s2 + $0x2e8] sm:$0xf0]  ;;  %1995 = vmatpush.bf16.msrb.mxu0 %v5013_v3  ;;  %2024 = vmatpush.bf16.msrb.mxu1 %v5017_v29  ;;  %vm6797_vm4 = vmor %vm1209_vm3, %vm1210_vm1 }
 0x269   : > { %v1205_v44 = vmul.f32 %v6708_v34, %v1204_v53  ;;  %v1108_v47 = vpop.xlane.xlu0 %1107  ;;  %v1198_v35 = vmul.f32 %v5631_v20, %v1197_v39  ;;  %v1214_v48 = vmul.f32 %v6716_v41, %v6699_v21  ;;  %v1132_v62 = vpop.xlane.xlu2 %1131  ;;  %vm1220_vm0 = vweird.f32 %v6716_v41  ;;  %v4964_v53 = vld [vmem:[%s6315_s2 + $0x250] sm:$0xf]  ;;  %v5435_v39 = vld [vmem:[%s6315_s2 + $0x27c] sm:$0xf0]  ;;  %v4878_v29 = vld [vmem:[%s6315_s2 + $0x1c8] sm:$0xf0] }
 0x26a   : > { %5636 = vrsqrt.f32 %v6714_v40  ;;  %v6737_v1 = vmul.f32 0.0078125, %v1108_v47  ;;  %v1149_v51 = vmul.f32 0.0078125, %v1132_v62  ;;  %vm6781_vm2 = vmor %vm1219_vm15, %vm1220_vm0  ;;  %v5025_v13 = vor.u32 %v5442_v8, %v5022_v45 }
 0x26b   : > { %5638 = vrsqrt.f32 %v6723_v46  ;;  %v1110_v54 = vpop.xlane.xlu1 %1109  ;;  %v1202_v57 = vsel %vm1201_vm14, %v5631_v20, %v1198_v35  ;;  %v1206_v37 = vmul.f32 0.5, %v1205_v44  ;;  %v1215_v63 = vmul.f32 %v6716_v41, %v1214_v48  ;;  %v4966_v48 = vld [vmem:[%s6315_s2 + $0x280] sm:$0xf0]  ;;  %v4820_v44 = vld [vmem:[%s6315_s2 + $0x130] sm:$0xf] }
 0x26c   : > { %v1264_v4 = vmul.f32 %v1202_v57, %v1168_v23  ;;  %v6739_v32 = vmul.f32 0.0078125, %v1110_v54  ;;  %v1157_v55 = vmul.f32 %v6737_v1, %v6737_v1  ;;  %v4965_v35 = vor.u32 %v5435_v39, %v4964_v53  ;;  %v5436_v57 = vld [vmem:[%s6315_s2 + $0x284] sm:$0xf0]  ;;  %2082 = vmatpush.bf16.msrb.mxu3 %v5025_v13  ;;  %v5393_v13 = vld [vmem:[%s6315_s2 + $0x134] sm:$0xf] }
 0x26d   : > { %v1216_v61 = vmul.f32 0.5, %v1215_v63  ;;  %v1207_v7 = vsub.f32 1.5, %v1206_v37  ;;  %v4969_v54 = vor.u32 %v5429_v43, %v4966_v48  ;;  %v5430_v37 = vld [vmem:[%s6315_s2 + $0x25c] sm:$0xf]  ;;  %vm1239_vm5 = vweird.f32 %v6714_v40  ;;  %v5400_v63 = vld [vmem:[%s6315_s2 + $0x164] sm:$0xf0] }
 0x26e   : > { %v6741_v31 = vpack.c.bf16 %v1264_v4, %v1263_v2  ;;  %v1158_v20 = vmul.f32 %v6739_v32, %v6739_v32  ;;  %v1165_v28 = vsub.f32 %v1149_v51, %v1157_v55  ;;  %v4974_v4 = vld [vmem:[%s6315_s2 + $0x288] sm:$0xf0]  ;;  %1996 = vmatpush.bf16.msrb.mxu0 %v4965_v35  ;;  %v4916_v51 = vld [vmem:[%s6315_s2 + $0x1f0] sm:$0xf]  ;;  %vm1229_vm8 = vweird.f32 %v6723_v46 }
 0x26f   : > { %v1217_v9 = vsub.f32 1.5, %v1216_v61  ;;  %v1208_v6 = vmul.f32 %v6708_v34, %v1207_v7  ;;  %v1170_v61 = vsub.f32 %v6568_v42, %v6684_v33  ;;  %v4977_v55 = vor.u32 %v5430_v37, %v4974_v4  ;;  %v5423_v7 = vld [vmem:[%s6315_s2 + $0x21c] sm:$0xf0]  ;;  %2025 = vmatpush.bf16.msrb.mxu1 %v4969_v54  ;;  %v4918_v33 = vld [vmem:[%s6315_s2 + $0x220] sm:$0xf0] }
 0x270   : > { %v6745_v36 = vpop.eup %5636  ;;  %1887 = vmatmul.bf16.vlgmr.msra.gmra.mxu0 %v6741_v31  ;;  %1916 = vmatmul.bf16.vlgmr.msra.gmra.mxu1 %v6741_v31  ;;  %v6791_v21 = vadd.f32 1e-05, %v1165_v28  ;;  %v4917_v42 = vor.u32 %v5423_v7, %v4916_v51  ;;  %v5405_v28 = vld [vmem:[%s6315_s2 + $0x194] sm:$0xf]  ;;  %v5387_v51 = vld [vmem:[%s6315_s2 + $0xfc] sm:$0xf0] }
 0x271   : > { %v6747_v10 = vpop.eup %5638  ;;  %v1234_v11 = vmul.f32 %v6745_v36, %v6714_v40  ;;  %v1134_v12 = vpop.xlane.xlu0 %1133  ;;  %1945 = vmatmul.bf16.vlgmr.msra.gmra.mxu2 %v6741_v31  ;;  %1974 = vmatmul.bf16.vlgmr.msra.gmra.mxu3 %v6741_v31  ;;  %v1218_v27 = vmul.f32 %v6716_v41, %v1217_v9  ;;  %v5417_v9 = vld [vmem:[%s6315_s2 + $0x1f4] sm:$0xf]  ;;  %vm1240_vm6 = vweird.f32 %v6745_v36  ;;  %v4686_v48 = vld [vmem:[%s6315_s2 + $0x48] sm:$0xf0] }
 0x272   : > { %v1224_v19 = vmul.f32 %v6747_v10, %v6723_v46  ;;  %v1150_v52 = vmul.f32 0.0078125, %v1134_v12  ;;  %v4924_v12 = vld [vmem:[%s6315_s2 + $0x1f8] sm:$0xf]  ;;  %2083 = vmatpush.bf16.msrb.mxu3 %v4977_v55  ;;  %1997 = vmatpush.bf16.msrb.mxu0 %v4917_v42  ;;  %vm6846_vm7 = vmor %vm1239_vm5, %vm1240_vm6  ;;  %vm1230_vm9 = vweird.f32 %v6747_v10  ;;  %v4772_v55 = vld [vmem:[%s6315_s2 + $0xd0] sm:$0xf]  ;;  %v1172_v42 = vsub.f32 %v6587_v58, %v6701_v30 }
 0x273   : > { %v1235_v26 = vmul.f32 %v6745_v36, %v1234_v11  ;;  %v1222_v23 = vsel %vm6781_vm2, %v6716_v41, %v1218_v27  ;;  %v4973_v41 = vor.u32 %v5436_v57, %v4972_v49  ;;  %v1212_v11 = vsel %vm6797_vm4, %v6708_v34, %v1208_v6  ;;  %v5418_v34 = vld [vmem:[%s6315_s2 + $0x1fc] sm:$0xf]  ;;  %v5411_v27 = vld [vmem:[%s6315_s2 + $0x1bc] sm:$0xf0]  ;;  %v4822_v49 = vld [vmem:[%s6315_s2 + $0x160] sm:$0xf0] }
 0x274   : > { %v1225_v25 = vmul.f32 %v6747_v10, %v1224_v19  ;;  %v1166_v47 = vsub.f32 %v1150_v52, %v1158_v20  ;;  %v1266_v16 = vmul.f32 %v1222_v23, %v1170_v61  ;;  %v4921_v19 = vor.u32 %v5417_v9, %v4918_v33  ;;  %v4870_v52 = vld [vmem:[%s6315_s2 + $0x1c0] sm:$0xf0]  ;;  %v4828_v23 = vld [vmem:[%s6315_s2 + $0x138] sm:$0xf]  ;;  %v5381_v7 = vld [vmem:[%s6315_s2 + $0xd4] sm:$0xf] }
 0x275   : > { %v1236_v62 = vmul.f32 0.5, %v1235_v26  ;;  %2054 = vmatpush.bf16.msrb.mxu2 %v4973_v41  ;;  %v4925_v20 = vor.u32 %v5424_v14, %v4924_v12  ;;  %v1265_v3 = vmul.f32 %v1212_v11, %v1169_v15  ;;  %v4929_v5 = vor.u32 %v5418_v34, %v4926_v22  ;;  %v4876_v26 = vld [vmem:[%s6315_s2 + $0x198] sm:$0xf]  ;;  %v4774_v9 = vld [vmem:[%s6315_s2 + $0x100] sm:$0xf0]  ;;  %vm6883_vm10 = vmor %vm1229_vm8, %vm1230_vm9 }
 0x276   : > { %v6801_v17 = vmul.f32 0.5, %v1225_v25  ;;  %v6803_v2 = vadd.f32 1e-05, %v1166_v47  ;;  %2026 = vmatpush.bf16.msrb.mxu1 %v4921_v19  ;;  %v5406_v25 = vld [vmem:[%s6315_s2 + $0x19c] sm:$0xf]  ;;  %v4869_v8 = vor.u32 %v5411_v27, %v4868_v24  ;;  %v4873_v45 = vor.u32 %v5405_v28, %v4870_v52 }
 0x277   : > { %v1237_v60 = vsub.f32 1.5, %v1236_v62  ;;  %v6832_v38 = vpack.c.bf16 %v1266_v16, %v1265_v3  ;;  %2084 = vmatpush.bf16.msrb.mxu3 %v4929_v5  ;;  %v4877_v39 = vor.u32 %v5412_v50, %v4876_v26  ;;  %v4881_v43 = vor.u32 %v5406_v25, %v4878_v29  ;;  %v5399_v47 = vld [vmem:[%s6315_s2 + $0x15c] sm:$0xf0]  ;;  %v5394_v62 = vld [vmem:[%s6315_s2 + $0x13c] sm:$0xf] }
 0x278   : > { %5640 = vrsqrt.f32 %v6803_v2  ;;  %v1227_v6 = vsub.f32 1.5, %v6801_v17  ;;  %1998 = vmatpush.bf16.msrb.mxu0 %v4869_v8  ;;  %v4821_v40 = vor.u32 %v5399_v47, %v4820_v44  ;;  %v4825_v37 = vor.u32 %v5393_v13, %v4822_v49  ;;  %v4830_v17 = vld [vmem:[%s6315_s2 + $0x168] sm:$0xf0]  ;;  %v4780_v11 = vld [vmem:[%s6315_s2 + $0xd8] sm:$0xf] }
 0x279   : > { %5642 = vrsqrt.f32 %v6791_v21  ;;  %2055 = vmatpush.bf16.msrb.mxu2 %v4925_v20  ;;  %v1238_v35 = vmul.f32 %v6745_v36, %v1237_v60  ;;  %v4829_v4 = vor.u32 %v5400_v63, %v4828_v23  ;;  %v4833_v61 = vor.u32 %v5394_v62, %v4830_v17  ;;  %v5388_v14 = vld [vmem:[%s6315_s2 + $0x104] sm:$0xf0]  ;;  %v5382_v15 = vld [vmem:[%s6315_s2 + $0xdc] sm:$0xf]  ;;  %v4782_v16 = vld [vmem:[%s6315_s2 + $0x108] sm:$0xf0] }
 0x27a   : > { %2027 = vmatpush.bf16.msrb.mxu1 %v4873_v45  ;;  %v1228_v41 = vmul.f32 %v6747_v10, %v1227_v6  ;;  %v4773_v30 = vor.u32 %v5387_v51, %v4772_v55  ;;  %v4724_v20 = vld [vmem:[%s6315_s2 + $0x70] sm:$0xf]  ;;  %v5375_v34 = vld [vmem:[%s6315_s2 + $0x9c] sm:$0xf0]  ;;  %v4781_v22 = vor.u32 %v5388_v14, %v4780_v11  ;;  %v4785_v24 = vor.u32 %v5382_v15, %v4782_v16  ;;  %v5369_v27 = vld [vmem:[%s6315_s2 + $0x74] sm:$0xf] }
 0x27b   : > { %2085 = vmatpush.bf16.msrb.mxu3 %v4881_v43  ;;  %v1242_v33 = vsel %vm6846_vm7, %v6745_v36, %v1238_v35  ;;  %v4777_v36 = vor.u32 %v5381_v7, %v4774_v9  ;;  %v4726_v28 = vld [vmem:[%s6315_s2 + $0xa0] sm:$0xf0]  ;;  %v4732_v52 = vld [vmem:[%s6315_s2 + $0x78] sm:$0xf]  ;;  %v1171_v3 = vsub.f32 %v6579_v56, %v6696_v18  ;;  %v5376_v5 = vld [vmem:[%s6315_s2 + $0xa4] sm:$0xf0]  ;;  %v4725_v8 = vor.u32 %v5375_v34, %v4724_v20 }
 0x27c   : > { %1999 = vmatpush.bf16.msrb.mxu0 %v4821_v40  ;;  %v1232_v46 = vsel %vm6883_vm10, %v6747_v10, %v1228_v41  ;;  %v5370_v26 = vld [vmem:[%s6315_s2 + $0x7c] sm:$0xf]  ;;  %v4734_v50 = vld [vmem:[%s6315_s2 + $0xa8] sm:$0xf0]  ;;  %v1268_v60 = vmul.f32 %v1242_v33, %v1172_v42  ;;  %v4729_v45 = vor.u32 %v5369_v27, %v4726_v28  ;;  %v4676_v6 = vld [vmem:[%s6315_s2 + $0x10] sm:$0xf]  ;;  %v4733_v18 = vor.u32 %v5376_v5, %v4732_v52 }
 0x27d   : > { %2056 = vmatpush.bf16.msrb.mxu2 %v4877_v39  ;;  %v1267_v25 = vmul.f32 %v1232_v46, %v1171_v3  ;;  %v5363_v56 = vld [vmem:[%s6315_s2 + $0x3c] sm:$0xf0]  ;;  %v4737_v39 = vor.u32 %v5370_v26, %v4734_v50  ;;  %v5357_v43 = vld [vmem:[%s6315_s2 + $0x14] sm:$0xf]  ;;  %v4678_v44 = vld [vmem:[%s6315_s2 + $0x40] sm:$0xf0]  ;;  %vm1259_vm11 = vweird.f32 %v6803_v2  ;;  %vm1249_vm13 = vweird.f32 %v6791_v21 }
 0x27e   : > { %v6835_v53 = vpop.eup %5640  ;;  %2028 = vmatpush.bf16.msrb.mxu1 %v4825_v37  ;;  %v4684_v47 = vld [vmem:[%s6315_s2 + $0x18] sm:$0xf]  ;;  %v5364_v13 = vld [vmem:[%s6315_s2 + $0x44] sm:$0xf0]  ;;  %v5358_v35 = vld [vmem:[%s6315_s2 + $0x1c] sm:$0xf]  ;;  %v4681_v40 = vor.u32 %v5357_v43, %v4678_v44  ;;  %v1173_v55 = vsub.f32 %v6597_v59, %v6737_v1 }
 0x27f   : > { %v6854_v54 = vpop.eup %5642  ;;  %v1254_v57 = vmul.f32 %v6835_v53, %v6803_v2  ;;  %2086 = vmatpush.bf16.msrb.mxu3 %v4833_v61  ;;  %v6910_v23 = vpack.c.bf16 %v1268_v60, %v1267_v25  ;;  %v4685_v63 = vor.u32 %v5364_v13, %v4684_v47  ;;  %v4689_v62 = vor.u32 %v5358_v35, %v4686_v48  ;;  %v5028_v59 = vld [vmem:[%s6315_s2 + $0x2c0] sm:$0xf]  ;;  %v5443_v1 = vld [vmem:[%s6315_s2 + $0x2c4] sm:$0xf]  ;;  %v5450_v11 = vld [vmem:[%s6315_s2 + $0x2f4] sm:$0xf0] }
 0x280   : > { %1892 = vmatmul.bf16.gmra.mxu0 %v6832_v38  ;;  %1921 = vmatmul.bf16.gmra.mxu1 %v6832_v38  ;;  %v1244_v12 = vmul.f32 %v6854_v54, %v6791_v21  ;;  %vm1260_vm12 = vweird.f32 %v6835_v53  ;;  %vm1250_vm14 = vweird.f32 %v6854_v54  ;;  %v1174_v61 = vsub.f32 %v6604_v0, %v6739_v32  ;;  %v5449_v0 = vld [vmem:[%s6315_s2 + $0x2ec] sm:$0xf0]  ;;  %v5038_v14 = vld [vmem:[%s6315_s2 + $0x2f8] sm:$0xf0]  ;;  %v4980_v15 = vld [vmem:[%s6315_s2 + $0x260] sm:$0xf] }
 0x281   : > { %1950 = vmatmul.bf16.gmra.mxu2 %v6832_v38  ;;  %1979 = vmatmul.bf16.gmra.mxu3 %v6832_v38  ;;  %v1255_v58 = vmul.f32 %v6835_v53, %v1254_v57  ;;  %v4677_v57 = vor.u32 %v5363_v56, %v4676_v6  ;;  %vm1261_vm15 = vmor %vm1259_vm11, %vm1260_vm12  ;;  %v5029_v32 = vor.u32 %v5449_v0, %v5028_v59  ;;  %v5437_v19 = vld [vmem:[%s6315_s2 + $0x28c] sm:$0xf0]  ;;  %v4988_v34 = vld [vmem:[%s6315_s2 + $0x268] sm:$0xf]  ;;  %vm2323_vm2 = vcmask 261120  }
 0x282   : > { %2057 = vmatpush.bf16.msrb.mxu2 %v4829_v4  ;;  %v1245_v10 = vmul.f32 %v6854_v54, %v1244_v12  ;;  %2000 = vmatpush.bf16.msrb.mxu0 %v4773_v30  ;;  %vm1251_vm0 = vmor %vm1249_vm13, %vm1250_vm14  ;;  %v5444_v12 = vld [vmem:[%s6315_s2 + $0x2cc] sm:$0xf]  ;;  %v4982_v30 = vld [vmem:[%s6315_s2 + $0x290] sm:$0xf0] }
 0x283   : > { %v1256_v29 = vmul.f32 0.5, %v1255_v58  ;;  %2029 = vmatpush.bf16.msrb.mxu1 %v4777_v36  ;;  %2087 = vmatpush.bf16.msrb.mxu3 %v4785_v24  ;;  %v5041_v16 = vor.u32 %v5444_v12, %v5038_v14  ;;  %v5431_v58 = vld [vmem:[%s6315_s2 + $0x264] sm:$0xf]  ;;  %v4981_v36 = vor.u32 %v5437_v19, %v4980_v15  ;;  %v5438_v46 = vld [vmem:[%s6315_s2 + $0x294] sm:$0xf0] }
 0x284   : > { %v1246_v49 = vmul.f32 0.5, %v1245_v10  ;;  %v4985_v20 = vor.u32 %v5431_v58, %v4982_v30  ;;  %v4989_v24 = vor.u32 %v5438_v46, %v4988_v34  ;;  %v4990_v27 = vld [vmem:[%s6315_s2 + $0x298] sm:$0xf0]  ;;  %v4932_v28 = vld [vmem:[%s6315_s2 + $0x200] sm:$0xf] }
 0x285   : > { %v1257_v37 = vsub.f32 1.5, %v1256_v29  ;;  %v5425_v52 = vld [vmem:[%s6315_s2 + $0x22c] sm:$0xf0]  ;;  %v5419_v5 = vld [vmem:[%s6315_s2 + $0x204] sm:$0xf] }
 0x286   : > { %2058 = vmatpush.bf16.msrb.mxu2 %v4781_v22  ;;  %2001 = vmatpush.bf16.msrb.mxu0 %v4725_v8  ;;  %v1247_v17 = vsub.f32 1.5, %v1246_v49  ;;  %v5432_v22 = vld [vmem:[%s6315_s2 + $0x26c] sm:$0xf]  ;;  %v4934_v26 = vld [vmem:[%s6315_s2 + $0x230] sm:$0xf0]  ;;  %v4933_v60 = vor.u32 %v5425_v52, %v4932_v28 }
 0x287   : > { %2030 = vmatpush.bf16.msrb.mxu1 %v4729_v45  ;;  %2088 = vmatpush.bf16.msrb.mxu3 %v4737_v39  ;;  %v1258_v41 = vmul.f32 %v6835_v53, %v1257_v37  ;;  %v4993_v3 = vor.u32 %v5432_v22, %v4990_v27  ;;  %v4940_v50 = vld [vmem:[%s6315_s2 + $0x208] sm:$0xf]  ;;  %v5426_v10 = vld [vmem:[%s6315_s2 + $0x234] sm:$0xf0]  ;;  %v5420_v25 = vld [vmem:[%s6315_s2 + $0x20c] sm:$0xf]  ;;  %v4937_v8 = vor.u32 %v5419_v5, %v4934_v26 }
 0x288   : > { %v1248_v2 = vmul.f32 %v6854_v54, %v1247_v17  ;;  %v4942_v29 = vld [vmem:[%s6315_s2 + $0x238] sm:$0xf0]  ;;  %v4941_v45 = vor.u32 %v5426_v10, %v4940_v50  ;;  %v4884_v6 = vld [vmem:[%s6315_s2 + $0x1a0] sm:$0xf]  ;;  %v5413_v56 = vld [vmem:[%s6315_s2 + $0x1cc] sm:$0xf0] }
 0x289   : > { %v1262_v4 = vsel %vm1261_vm15, %v6835_v53, %v1258_v41  ;;  %v5030_v53 = vld [vmem:[%s6315_s2 + $0x2f0] sm:$0xf0]  ;;  %v5407_v39 = vld [vmem:[%s6315_s2 + $0x1a4] sm:$0xf]  ;;  %v4885_v43 = vor.u32 %v5413_v56, %v4884_v6  ;;  %v4892_v47 = vld [vmem:[%s6315_s2 + $0x1a8] sm:$0xf] }
 0x28a   : > { %2059 = vmatpush.bf16.msrb.mxu2 %v4733_v18  ;;  %2002 = vmatpush.bf16.msrb.mxu0 %v4677_v57  ;;  %v1252_v21 = vsel %vm1251_vm0, %v6854_v54, %v1248_v2  ;;  %v1270_v51 = vmul.f32 %v1262_v4, %v1174_v61  ;;  %v5036_v54 = vld [vmem:[%s6315_s2 + $0x2c8] sm:$0xf]  ;;  %v5033_v42 = vor.u32 %v5443_v1, %v5030_v53  ;;  %v4886_v44 = vld [vmem:[%s6315_s2 + $0x1d0] sm:$0xf0]  ;;  %v5414_v13 = vld [vmem:[%s6315_s2 + $0x1d4] sm:$0xf0] }
 0x28b   : > { %2031 = vmatpush.bf16.msrb.mxu1 %v4681_v40  ;;  %2089 = vmatpush.bf16.msrb.mxu3 %v4689_v62  ;;  %v1269_v7 = vmul.f32 %v1252_v21, %v1173_v55  ;;  %v5037_v33 = vor.u32 %v5450_v11, %v5036_v54  ;;  %v4945_v18 = vor.u32 %v5420_v25, %v4942_v29  ;;  %v5408_v35 = vld [vmem:[%s6315_s2 + $0x1ac] sm:$0xf]  ;;  %v4894_v48 = vld [vmem:[%s6315_s2 + $0x1d8] sm:$0xf0]  ;;  %v4836_v37 = vld [vmem:[%s6315_s2 + $0x140] sm:$0xf] }
 0x28c   : > { %v4889_v49 = vor.u32 %v5407_v39, %v4886_v44  ;;  %v4893_v57 = vor.u32 %v5414_v13, %v4892_v47  ;;  %v4897_v40 = vor.u32 %v5408_v35, %v4894_v48  ;;  %v5395_v62 = vld [vmem:[%s6315_s2 + $0x144] sm:$0xf]  ;;  %v4838_v41 = vld [vmem:[%s6315_s2 + $0x170] sm:$0xf0]  ;;  %v4844_v2 = vld [vmem:[%s6315_s2 + $0x148] sm:$0xf] }
 0x28d   : > { %v6928_v9 = vpack.c.bf16 %v1270_v51, %v1269_v7  ;;  %v5402_v4 = vld [vmem:[%s6315_s2 + $0x174] sm:$0xf0]  ;;  %v4841_v61 = vor.u32 %v5395_v62, %v4838_v41  ;;  %v5396_v55 = vld [vmem:[%s6315_s2 + $0x14c] sm:$0xf]  ;;  %v4846_v51 = vld [vmem:[%s6315_s2 + $0x178] sm:$0xf0] }
 0x28e   : > { %2060 = vmatpush.bf16.msrb.mxu2 %v4685_v63  ;;  %2111 = vmatpush.bf16.msra.mxu0 %v5029_v32  ;;  %v5401_v63 = vld [vmem:[%s6315_s2 + $0x16c] sm:$0xf0]  ;;  %v4845_v21 = vor.u32 %v5402_v4, %v4844_v2  ;;  %v4788_v7 = vld [vmem:[%s6315_s2 + $0xe0] sm:$0xf]  ;;  %v4849_v59 = vor.u32 %v5396_v55, %v4846_v51  ;;  %v5383_v1 = vld [vmem:[%s6315_s2 + $0xe4] sm:$0xf] }
 0x28f   : > { %2140 = vmatpush.bf16.msra.mxu1 %v5033_v42  ;;  %2198 = vmatpush.bf16.msra.mxu3 %v5041_v16  ;;  %v4837_v17 = vor.u32 %v5401_v63, %v4836_v37  ;;  %v5389_v0 = vld [vmem:[%s6315_s2 + $0x10c] sm:$0xf0]  ;;  %v4790_v32 = vld [vmem:[%s6315_s2 + $0x110] sm:$0xf0]  ;;  %v4796_v54 = vld [vmem:[%s6315_s2 + $0xe8] sm:$0xf] }
 0x290   : > { %1897 = vmatmul.bf16.gmra.mxu0 %v6910_v23  ;;  %1926 = vmatmul.bf16.gmra.mxu1 %v6910_v23  ;;  %v4789_v53 = vor.u32 %v5389_v0, %v4788_v7  ;;  %v5390_v11 = vld [vmem:[%s6315_s2 + $0x114] sm:$0xf0]  ;;  %v5384_v42 = vld [vmem:[%s6315_s2 + $0xec] sm:$0xf]  ;;  %v4740_v12 = vld [vmem:[%s6315_s2 + $0x80] sm:$0xf]  ;;  %v4793_v15 = vor.u32 %v5383_v1, %v4790_v32 }
 0x291   : > { %1955 = vmatmul.bf16.gmra.mxu2 %v6910_v23  ;;  %1984 = vmatmul.bf16.gmra.mxu3 %v6910_v23  ;;  %v5377_v14 = vld [vmem:[%s6315_s2 + $0xac] sm:$0xf0]  ;;  %v4797_v16 = vor.u32 %v5390_v11, %v4796_v54  ;;  %v5371_v19 = vld [vmem:[%s6315_s2 + $0x84] sm:$0xf]  ;;  %v5378_v34 = vld [vmem:[%s6315_s2 + $0xb4] sm:$0xf0] }
 0x292   : > { %2169 = vmatpush.bf16.msra.mxu2 %v5037_v33  ;;  %2112 = vmatpush.bf16.msra.mxu0 %v4981_v36  ;;  %v4798_v33 = vld [vmem:[%s6315_s2 + $0x118] sm:$0xf0]  ;;  %v4741_v30 = vor.u32 %v5377_v14, %v4740_v12  ;;  %v4742_v36 = vld [vmem:[%s6315_s2 + $0xb0] sm:$0xf0]  ;;  %v5372_v46 = vld [vmem:[%s6315_s2 + $0x8c] sm:$0xf] }
 0x293   : > { %2141 = vmatpush.bf16.msra.mxu1 %v4985_v20  ;;  %2199 = vmatpush.bf16.msra.mxu3 %v4993_v3  ;;  %v4801_v58 = vor.u32 %v5384_v42, %v4798_v33  ;;  %v4748_v20 = vld [vmem:[%s6315_s2 + $0x88] sm:$0xf]  ;;  %v4750_v22 = vld [vmem:[%s6315_s2 + $0xb8] sm:$0xf0]  ;;  %v4692_v52 = vld [vmem:[%s6315_s2 + $0x20] sm:$0xf] }
 0x294   : > { %v4749_v27 = vor.u32 %v5378_v34, %v4748_v20  ;;  %v4753_v28 = vor.u32 %v5372_v46, %v4750_v22  ;;  %v5365_v3 = vld [vmem:[%s6315_s2 + $0x4c] sm:$0xf0]  ;;  %v5359_v5 = vld [vmem:[%s6315_s2 + $0x24] sm:$0xf]  ;;  %v4694_v50 = vld [vmem:[%s6315_s2 + $0x50] sm:$0xf0] }
 0x295   : > { %v4693_v26 = vor.u32 %v5365_v3, %v4692_v52  ;;  %v5366_v10 = vld [vmem:[%s6315_s2 + $0x54] sm:$0xf0]  ;;  %v4697_v25 = vor.u32 %v5359_v5, %v4694_v50 }
 0x296   : > { %2170 = vmatpush.bf16.msra.mxu2 %v4989_v24  ;;  %2113 = vmatpush.bf16.msra.mxu0 %v4933_v60  ;;  %v4745_v24 = vor.u32 %v5371_v19, %v4742_v36  ;;  %v4700_v60 = vld [vmem:[%s6315_s2 + $0x28] sm:$0xf] }
 0x297   : > { %2142 = vmatpush.bf16.msra.mxu1 %v4937_v8  ;;  %2200 = vmatpush.bf16.msra.mxu3 %v4945_v18  ;;  %v4701_v29 = vor.u32 %v5366_v10, %v4700_v60  ;;  %v5360_v8 = vld [vmem:[%s6315_s2 + $0x2c] sm:$0xf] }
 0x29a   : > { %2171 = vmatpush.bf16.msra.mxu2 %v4941_v45  ;;  %2114 = vmatpush.bf16.msra.mxu0 %v4885_v43  ;;  %v4702_v45 = vld [vmem:[%s6315_s2 + $0x58] sm:$0xf0] }
 0x29b   : > { %2143 = vmatpush.bf16.msra.mxu1 %v4889_v49  ;;  %2201 = vmatpush.bf16.msra.mxu3 %v4897_v40  ;;  %v4705_v6 = vor.u32 %v5360_v8, %v4702_v45 }
 0x29e   : > { %2172 = vmatpush.bf16.msra.mxu2 %v4893_v57  ;;  %2115 = vmatpush.bf16.msra.mxu0 %v4837_v17  ;;  %v7032_v57 = vld [vmem:[%s530_s1] sm:$0xff] }
 0x29f   : > { %2144 = vmatpush.bf16.msra.mxu1 %v4841_v61  ;;  %2202 = vmatpush.bf16.msra.mxu3 %v4849_v59  ;;  %v7046_v4 = vperm.slane %v7032_v57, 2  ;;  %v7070_v12 = vperm.slane %v7032_v57, 3 }
 0x2a0   : > { %1902 = vmatmul.bf16.gmra.mxu0 %v6928_v9  ;;  %1931 = vmatmul.bf16.gmra.mxu1 %v6928_v9 }
 0x2a1   : > { %1960 = vmatmul.bf16.gmra.mxu2 %v6928_v9  ;;  %1989 = vmatmul.bf16.gmra.mxu3 %v6928_v9 }
 0x2a2   : > { %2173 = vmatpush.bf16.msra.mxu2 %v4845_v21  ;;  %2116 = vmatpush.bf16.msra.mxu0 %v4789_v53 }
 0x2a3   : > { %2145 = vmatpush.bf16.msra.mxu1 %v4793_v15  ;;  %2203 = vmatpush.bf16.msra.mxu3 %v4801_v58 }
 0x2a6   : > { %2174 = vmatpush.bf16.msra.mxu2 %v4797_v16  ;;  %2117 = vmatpush.bf16.msra.mxu0 %v4741_v30 }
 0x2a7   : > { %2146 = vmatpush.bf16.msra.mxu1 %v4745_v24  ;;  %2204 = vmatpush.bf16.msra.mxu3 %v4753_v28 }
 0x2aa   : > { %2175 = vmatpush.bf16.msra.mxu2 %v4749_v27  ;;  %2118 = vmatpush.bf16.msra.mxu0 %v4693_v26 }
 0x2ab   : > { %2147 = vmatpush.bf16.msra.mxu1 %v4697_v25  ;;  %2205 = vmatpush.bf16.msra.mxu3 %v4705_v6 }
 0x2ae   : > { %2176 = vmatpush.bf16.msra.mxu2 %v4701_v29 }
 0x2b0   : > { %2003 = vmatmul.bf16.vlgmr.msrb.gmra.mxu0 %v6741_v31  ;;  %2032 = vmatmul.bf16.vlgmr.msrb.gmra.mxu1 %v6741_v31 }
 0x2b1   : > { %2061 = vmatmul.bf16.vlgmr.msrb.gmra.mxu2 %v6741_v31  ;;  %2090 = vmatmul.bf16.vlgmr.msrb.gmra.mxu3 %v6741_v31 }
 0x2c0   : > { %2008 = vmatmul.bf16.gmra.mxu0 %v6832_v38  ;;  %2037 = vmatmul.bf16.gmra.mxu1 %v6832_v38 }
 0x2c1   : > { %2066 = vmatmul.bf16.gmra.mxu2 %v6832_v38  ;;  %2095 = vmatmul.bf16.gmra.mxu3 %v6832_v38 }
 0x2d0   : > { %2013 = vmatmul.bf16.gmra.mxu0 %v6910_v23  ;;  %2042 = vmatmul.bf16.gmra.mxu1 %v6910_v23 }
 0x2d1   : > { %2071 = vmatmul.bf16.gmra.mxu2 %v6910_v23  ;;  %2100 = vmatmul.bf16.gmra.mxu3 %v6910_v23 }
 0x2e0   : > { %2018 = vmatmul.bf16.gmra.mxu0 %v6928_v9  ;;  %2047 = vmatmul.bf16.gmra.mxu1 %v6928_v9 }
 0x2e1   : > { %2076 = vmatmul.bf16.gmra.mxu2 %v6928_v9  ;;  %2105 = vmatmul.bf16.gmra.mxu3 %v6928_v9 }
 0x2ed   : > { %v7014_v56 = vpop.f32.mrf.mxu0  ;;  %v1917_v18 = vpop.f32.mrf.mxu1 }
 0x2f0   : > { %2119 = vmatmul.bf16.vlgmr.msra.gmra.mxu0 %v6741_v31  ;;  %2148 = vmatmul.bf16.vlgmr.msra.gmra.mxu1 %v6741_v31 }
 0x2f1   : > { %2177 = vmatmul.bf16.vlgmr.msra.gmra.mxu2 %v6741_v31  ;;  %2206 = vmatmul.bf16.vlgmr.msra.gmra.mxu3 %v6741_v31  ;;  %v7037_v31 = vperm.slane %v7032_v57, 1 }
 0x2f3   : > { %v1918_v1 = vadd.f32 %v1917_v18, %v7037_v31 }
 0x2f4   : > { %v1946_v39 = vpop.f32.mrf.mxu2  ;;  %v7020_v43 = vpop.f32.mrf.mxu3 }
 0x2f5   : > { %v7022_v44 = vpop.f32.mrf.mxu0  ;;  %v1919_v47 = vpop.f32.mrf.mxu1  ;;  %v1947_v33 = vadd.f32 %v1946_v39, %v7046_v4 }
 0x2f6   : > { %v1920_v61 = vadd.f32 %v1919_v47, %v7037_v31 }
 0x2f8   : > { %v2296_v11 = vpack.c.bf16 %v1920_v61, %v1918_v1 }
 0x2fc   : > { %v1948_v13 = vpop.f32.mrf.mxu2  ;;  %v7024_v35 = vpop.f32.mrf.mxu3 }
 0x2fd   : > { %v7026_v48 = vpop.f32.mrf.mxu0  ;;  %v1922_v49 = vpop.f32.mrf.mxu1  ;;  %v1949_v42 = vadd.f32 %v1948_v13, %v7046_v4 }
 0x2fe   : > { %v1923_v17 = vadd.f32 %v1922_v49, %v7037_v31 }
 0x2ff   : > { %v2298_v14 = vpack.c.bf16 %v1949_v42, %v1947_v33 }
 0x300   : > { %2124 = vmatmul.bf16.gmra.mxu0 %v6832_v38  ;;  %2153 = vmatmul.bf16.gmra.mxu1 %v6832_v38 }
 0x301   : > { %2182 = vmatmul.bf16.gmra.mxu2 %v6832_v38  ;;  %2211 = vmatmul.bf16.gmra.mxu3 %v6832_v38  ;;  %v7049_v38 = vperm.slane %v7032_v57, 0 }
 0x303   : > { %v1891_v13 = vadd.f32 %v7022_v44, %v7049_v38  ;;  %v1889_v49 = vadd.f32 %v7014_v56, %v7049_v38 }
 0x304   : > { %v1951_v40 = vpop.f32.mrf.mxu2  ;;  %v7039_v37 = vpop.f32.mrf.mxu3 }
 0x305   : > { %v7041_v63 = vpop.f32.mrf.mxu0  ;;  %v1924_v62 = vpop.f32.mrf.mxu1  ;;  %v1952_v51 = vadd.f32 %v1951_v40, %v7046_v4  ;;  %v2294_v61 = vpack.c.bf16 %v1891_v13, %v1889_v49 }
 0x306   : > { %v1925_v41 = vadd.f32 %v1924_v62, %v7037_v31 }
 0x308   : > { %v2297_v2 = vpack.c.bf16 %v1925_v41, %v1923_v17 }
 0x30a   : > { %2306 = vmatpush.bf16.xpose.msrb.mxu0 %v2297_v2 }
 0x30c   : > { %v1953_v21 = vpop.f32.mrf.mxu2  ;;  %v7052_v55 = vpop.f32.mrf.mxu3 }
 0x30d   : > { %v1954_v7 = vadd.f32 %v1953_v21, %v7046_v4  ;;  %v1898_v59 = vpop.f32.mrf.mxu0  ;;  %v1927_v0 = vpop.f32.mrf.mxu1 }
 0x30e   : > { %v7058_v32 = vadd.f32 %v1898_v59, %v7049_v38  ;;  %v7061_v53 = vadd.f32 %v1927_v0, %v7037_v31  ;;  %v1894_v0 = vadd.f32 %v7026_v48, %v7049_v38 }
 0x30f   : > { %v2299_v54 = vpack.c.bf16 %v1954_v7, %v1952_v51 }
 0x310   : > { %2129 = vmatmul.bf16.gmra.mxu0 %v6910_v23  ;;  %2158 = vmatmul.bf16.gmra.mxu1 %v6910_v23 }
 0x311   : > { %2187 = vmatmul.bf16.gmra.mxu2 %v6910_v23  ;;  %2216 = vmatmul.bf16.gmra.mxu3 %v6910_v23 }
 0x312   : > { %2382 = vmatpush.bf16.msrb.mxu1 %v2299_v54  ;;  %2307 = vmatpush.bf16.xpose.msrb.mxu0 %v2296_v11 }
 0x314   : > { %v1956_v15 = vpop.f32.mrf.mxu2  ;;  %v1985_v16 = vpop.f32.mrf.mxu3 }
 0x315   : > { %v7073_v19 = vadd.f32 %v1956_v15, %v7046_v4  ;;  %v7076_v58 = vadd.f32 %v1985_v16, %v7070_v12  ;;  %v1900_v30 = vpop.f32.mrf.mxu0  ;;  %v1929_v36 = vpop.f32.mrf.mxu1  ;;  %v7150_v15 = vperm.slane %v7032_v57, 5 }
 0x316   : > { %2383 = vmatpush.bf16.msrb.mxu1 %v2298_v14  ;;  %v7079_v23 = vadd.f32 %v1900_v30, %v7049_v38  ;;  %v7082_v20 = vadd.f32 %v1929_v36, %v7037_v31  ;;  %v7147_v14 = vperm.slane %v7032_v57, 4 }
 0x317   : > { %8361 = vst [vmem:[#allocation16_spill] sm:$0xff] %v7076_v58  ;;  %v7570_v58 = vld [vmem:[%s6304_s19] sm:$0xff] }
 0x31c   : > { %v1958_v22 = vpop.f32.mrf.mxu2  ;;  %v1987_v24 = vpop.f32.mrf.mxu3 }
 0x31d   : > { %v7089_v27 = vadd.f32 %v1958_v22, %v7046_v4  ;;  %v7092_v28 = vadd.f32 %v1987_v24, %v7070_v12  ;;  %v1903_v52 = vpop.f32.mrf.mxu0  ;;  %v1932_v3 = vpop.f32.mrf.mxu1 }
 0x31e   : > { %v7095_v5 = vadd.f32 %v1903_v52, %v7049_v38  ;;  %v7098_v26 = vadd.f32 %v1932_v3, %v7037_v31 }
 0x31f   : > { %8362 = vst [vmem:[#allocation17_spill] sm:$0xff] %v7092_v28 }
 0x320   : > { %2134 = vmatmul.bf16.gmra.mxu0 %v6928_v9  ;;  %2163 = vmatmul.bf16.gmra.mxu1 %v6928_v9 }
 0x321   : > { %2192 = vmatmul.bf16.gmra.mxu2 %v6928_v9  ;;  %2221 = vmatmul.bf16.gmra.mxu3 %v6928_v9 }
 0x324   : > { %v1961_v10 = vpop.f32.mrf.mxu2  ;;  %v1990_v25 = vpop.f32.mrf.mxu3 }
 0x325   : > { %v7109_v29 = vadd.f32 %v1961_v10, %v7046_v4  ;;  %v7112_v8 = vadd.f32 %v1990_v25, %v7070_v12  ;;  %v1905_v45 = vpop.f32.mrf.mxu0  ;;  %v1934_v6 = vpop.f32.mrf.mxu1 }
 0x326   : > { %v7115_v18 = vadd.f32 %v1905_v45, %v7049_v38  ;;  %v7118_v39 = vadd.f32 %v1934_v6, %v7037_v31  ;;  %v1382_v45 = vperm.slane %v7032_v57, 7 }
 0x327   : > { %8363 = vst [vmem:[#allocation18_spill] sm:$0xff] %v7112_v8 }
 0x32c   : > { %v1963_v40 = vpop.f32.mrf.mxu2  ;;  %v1992_v62 = vpop.f32.mrf.mxu3 }
 0x32d   : > { %v7129_v17 = vadd.f32 %v1963_v40, %v7046_v4  ;;  %v7132_v31 = vadd.f32 %v1992_v62, %v7070_v12  ;;  %v2004_v41 = vpop.f32.mrf.mxu0  ;;  %v2033_v2 = vpop.f32.mrf.mxu1  ;;  %v1896_v4 = vadd.f32 %v7041_v63, %v7049_v38 }
 0x32e   : > { %v2034_v25 = vadd.f32 %v2033_v2, %v7150_v15 }
 0x32f   : > { %8364 = vst [vmem:[#allocation19_spill] sm:$0xff] %v7132_v31  ;;  %v2295_v33 = vpack.c.bf16 %v1896_v4, %v1894_v0 }
 0x330   : > { %2308 = vmatmul.bf16.vlgmr.msrb.gmra.mxu0 %v2294_v61 }
 0x334   : > { %v7138_v51 = vpop.f32.mrf.mxu2  ;;  %v2091_v56 = vpop.f32.mrf.mxu3 }
 0x335   : > { %v2006_v7 = vpop.f32.mrf.mxu0  ;;  %v2035_v59 = vpop.f32.mrf.mxu1 }
 0x336   : > { %v2036_v52 = vadd.f32 %v2035_v59, %v7150_v15  ;;  %v2007_v6 = vadd.f32 %v2006_v7, %v7147_v14  ;;  %v2005_v59 = vadd.f32 %v2004_v41, %v7147_v14  ;;  %v1978_v7 = vadd.f32 %v7024_v35, %v7070_v12 }
 0x337   : > { %v1976_v41 = vadd.f32 %v7020_v43, %v7070_v12 }
 0x338   : > { %v2401_v13 = vpack.c.bf16 %v2036_v52, %v2034_v25  ;;  %v2092_v52 = vadd.f32 %v2091_v56, %v1382_v45 }
 0x33c   : > { %v7144_v1 = vpop.f32.mrf.mxu2  ;;  %v2093_v54 = vpop.f32.mrf.mxu3 }
 0x33d   : > { %v2009_v11 = vpop.f32.mrf.mxu0  ;;  %v2038_v42 = vpop.f32.mrf.mxu1 }
 0x33e   : > { %v2010_v48 = vadd.f32 %v2009_v11, %v7147_v14  ;;  %v2039_v38 = vadd.f32 %v2038_v42, %v7150_v15  ;;  %v2399_v11 = vpack.c.bf16 %v2007_v6, %v2005_v59 }
 0x340   : > { %2313 = vmatmul.bf16.gmra.mxu0 %v2295_v33  ;;  %v7173_v33 = vperm.slane %v7032_v57, 6  ;;  %v2397_v57 = vpack.c.bf16 %v1978_v7, %v1976_v41 }
 0x344   : > { %v7152_v16 = vpop.f32.mrf.mxu2  ;;  %v2096_v30 = vpop.f32.mrf.mxu3 }
 0x345   : > { %v2011_v63 = vpop.f32.mrf.mxu0  ;;  %v2040_v36 = vpop.f32.mrf.mxu1  ;;  %v2097_v2 = vadd.f32 %v2096_v30, %v1382_v45  ;;  %v2068_v44 = vadd.f32 %v7152_v16, %v7173_v33 }
 0x346   : > { %v2012_v22 = vadd.f32 %v2011_v63, %v7147_v14  ;;  %v2041_v24 = vadd.f32 %v2040_v36, %v7150_v15 }
 0x348   : > { %v2400_v3 = vpack.c.bf16 %v2012_v22, %v2010_v48  ;;  %v2402_v10 = vpack.c.bf16 %v2041_v24, %v2039_v38  ;;  %v2094_v48 = vadd.f32 %v2093_v54, %v1382_v45 }
 0x34a   : > { %2409 = vmatpush.bf16.xpose.msrb.mxu2 %v2400_v3  ;;  %2484 = vmatpush.bf16.msrb.mxu3 %v2402_v10  ;;  %v2635_v10 = vpack.c.bf16 %v2094_v48, %v2092_v52  ;;  %v1372_v48 = vld [vmem:[%s530_s1 + $0x8] sm:$0xf] }
 0x34c   : > { %v7162_v49 = vpop.f32.mrf.mxu2  ;;  %v2098_v40 = vpop.f32.mrf.mxu3 }
 0x34d   : > { %v2099_v62 = vadd.f32 %v2098_v40, %v1382_v45  ;;  %v2014_v61 = vpop.f32.mrf.mxu0  ;;  %v7164_v4 = vpop.f32.mrf.mxu1 }
 0x34e   : > { %v7168_v0 = vadd.f32 %v2014_v61, %v7147_v14  ;;  %2485 = vmatpush.bf16.msrb.mxu3 %v2401_v13  ;;  %v1983_v61 = vadd.f32 %v7052_v55, %v7070_v12 }
 0x34f   : > { %v2636_v42 = vpack.c.bf16 %v2099_v62, %v2097_v2 }
 0x352   : > { %2410 = vmatpush.bf16.xpose.msrb.mxu2 %v2399_v11  ;;  %v1981_v11 = vadd.f32 %v7039_v37, %v7070_v12 }
 0x354   : > { %v2072_v63 = vpop.f32.mrf.mxu2  ;;  %v2101_v36 = vpop.f32.mrf.mxu3  ;;  %v2398_v41 = vpack.c.bf16 %v1983_v61, %v1981_v11 }
 0x355   : > { %v7178_v38 = vadd.f32 %v2072_v63, %v7173_v33  ;;  %v7180_v30 = vadd.f32 %v2101_v36, %v1382_v45  ;;  %v2016_v22 = vpop.f32.mrf.mxu0  ;;  %v7182_v24 = vpop.f32.mrf.mxu1 }
 0x356   : > { %v7185_v35 = vadd.f32 %v2016_v22, %v7147_v14  ;;  %v7217_v22 = vperm.slane %v1372_v48, 1 }
 0x357   : > { %8365 = vst [vmem:[#allocation20_spill] sm:$0xff] %v7178_v38 }
 0x358   : > { %8366 = vst [vmem:[#allocation21_spill] sm:$0xff] %v7180_v30 }
 0x359   : > { %2411 = vmatmul.bf16.vlgmr.msrb.gmra.mxu2 %v2397_v57 }
 0x35a   : > { %2645 = vmatpush.bf16.xpose.msra.mxu2 %v2636_v42 }
 0x35c   : > { %v2074_v43 = vpop.f32.mrf.mxu2  ;;  %v2103_v54 = vpop.f32.mrf.mxu3 }
 0x35d   : > { %v7190_v25 = vadd.f32 %v2074_v43, %v7173_v33  ;;  %v7192_v6 = vadd.f32 %v2103_v54, %v1382_v45  ;;  %v7194_v13 = vpop.f32.mrf.mxu0  ;;  %v7196_v40 = vpop.f32.mrf.mxu1 }
 0x35f   : > { %8367 = vst [vmem:[#allocation22_spill] sm:$0xff] %v7190_v25 }
 0x360   : > { %8368 = vst [vmem:[#allocation23_spill] sm:$0xff] %v7192_v6 }
 0x362   : > { %2646 = vmatpush.bf16.xpose.msra.mxu2 %v2635_v10 }
 0x364   : > { %v2077_v59 = vpop.f32.mrf.mxu2  ;;  %v2106_v2 = vpop.f32.mrf.mxu3 }
 0x365   : > { %v7207_v42 = vadd.f32 %v2077_v59, %v7173_v33  ;;  %v7209_v7 = vadd.f32 %v2106_v2, %v1382_v45  ;;  %v7211_v63 = vpop.f32.mrf.mxu0  ;;  %v7213_v36 = vpop.f32.mrf.mxu1  ;;  %v7231_v59 = vperm.slane %v1372_v48, 2  ;;  %v2065_v2 = vadd.f32 %v7144_v1, %v7173_v33 }
 0x367   : > { %8369 = vst [vmem:[#allocation24_spill] sm:$0xff] %v7207_v42 }
 0x368   : > { %8370 = vst [vmem:[#allocation25_spill] sm:$0xff] %v7209_v7 }
 0x369   : > { %2416 = vmatmul.bf16.gmra.mxu2 %v2398_v41 }
 0x36c   : > { %v2079_v55 = vpop.f32.mrf.mxu2  ;;  %v2108_v57 = vpop.f32.mrf.mxu3 }
 0x36d   : > { %v7220_v52 = vadd.f32 %v2079_v55, %v7173_v33  ;;  %v7222_v37 = vadd.f32 %v2108_v57, %v1382_v45  ;;  %v2120_v12 = vpop.f32.mrf.mxu0  ;;  %v2149_v10 = vpop.f32.mrf.mxu1  ;;  %v2063_v45 = vadd.f32 %v7138_v51, %v7173_v33 }
 0x36e   : > { %v7225_v43 = vadd.f32 %v2149_v10, %v7217_v22 }
 0x36f   : > { %8371 = vst [vmem:[#allocation26_spill] sm:$0xff] %v7220_v52  ;;  %v2633_v56 = vpack.c.bf16 %v2065_v2, %v2063_v45  ;;  %v2070_v2 = vadd.f32 %v7162_v49, %v7173_v33  ;;  %v7255_v45 = vperm.slane %v1372_v48, 0  ;;  %v1386_v33 = vperm.slane %v1372_v48, 3 }
 0x370   : > { %8372 = vst [vmem:[#allocation27_spill] sm:$0xff] %v7222_v37  ;;  %v2022_v48 = vadd.f32 %v7211_v63, %v7147_v14 }
 0x371   : > { %v2634_v49 = vpack.c.bf16 %v2070_v2, %v2068_v44  ;;  %v2121_v16 = vadd.f32 %v2120_v12, %v7255_v45 }
 0x374   : > { %v2178_v11 = vpop.f32.mrf.mxu2  ;;  %v2207_v41 = vpop.f32.mrf.mxu3 }
 0x375   : > { %v7238_v55 = vadd.f32 %v2178_v11, %v7231_v59  ;;  %v2122_v57 = vpop.f32.mrf.mxu0  ;;  %v2151_v10 = vpop.f32.mrf.mxu1 }
 0x376   : > { %v7241_v54 = vadd.f32 %v2151_v10, %v7217_v22  ;;  %v2123_v46 = vadd.f32 %v2122_v57, %v7255_v45 }
 0x379   : > { %2647 = vmatmul.bf16.vlgmr.msra.gmra.mxu2 %v2633_v56 }
 0x37c   : > { %v2180_v60 = vpop.f32.mrf.mxu2  ;;  %v2209_v1 = vpop.f32.mrf.mxu3 }
 0x37d   : > { %v7246_v62 = vadd.f32 %v2180_v60, %v7231_v59  ;;  %v2125_v61 = vpop.f32.mrf.mxu0  ;;  %v2154_v51 = vpop.f32.mrf.mxu1  ;;  %v2210_v12 = vadd.f32 %v2209_v1, %v1386_v33 }
 0x37e   : > { %v7249_v11 = vadd.f32 %v2154_v51, %v7217_v22  ;;  %v2126_v51 = vadd.f32 %v2125_v61, %v7255_v45 }
 0x384   : > { %v2183_v10 = vpop.f32.mrf.mxu2  ;;  %v2212_v56 = vpop.f32.mrf.mxu3 }
 0x385   : > { %v7260_v60 = vadd.f32 %v2183_v10, %v7231_v59  ;;  %v2127_v21 = vpop.f32.mrf.mxu0  ;;  %v2156_v47 = vpop.f32.mrf.mxu1  ;;  %v2637_v10 = vpack.c.bf16 %v2123_v46, %v2121_v16  ;;  %v2213_v52 = vadd.f32 %v2212_v56, %v1386_v33  ;;  %v2020_v56 = vadd.f32 %v7194_v13, %v7147_v14 }
 0x386   : > { %v2128_v34 = vadd.f32 %v2127_v21, %v7255_v45  ;;  %v7265_v50 = vadd.f32 %v2156_v47, %v7217_v22 }
 0x388   : > { %v2638_v9 = vpack.c.bf16 %v2128_v34, %v2126_v51 }
 0x389   : > { %2652 = vmatmul.bf16.gmra.mxu2 %v2634_v49  ;;  %v3100_v49 = vpack.c.bf16 %v2022_v48, %v2020_v56 }
 0x38a   : > { %2720 = vmatpush.bf16.msra.mxu3 %v2638_v9 }
 0x38c   : > { %v2185_v42 = vpop.f32.mrf.mxu2  ;;  %v2214_v61 = vpop.f32.mrf.mxu3 }
 0x38d   : > { %v7272_v21 = vadd.f32 %v2185_v42, %v7231_v59  ;;  %v2215_v47 = vadd.f32 %v2214_v61, %v1386_v33  ;;  %v2130_v44 = vpop.f32.mrf.mxu0  ;;  %v2159_v2 = vpop.f32.mrf.mxu1  ;;  %v2208_v42 = vadd.f32 %v2207_v41, %v1386_v33 }
 0x38e   : > { %v7275_v34 = vadd.f32 %v2130_v44, %v7255_v45  ;;  %v7278_v57 = vadd.f32 %v2159_v2, %v7217_v22  ;;  %2721 = vmatpush.bf16.msra.mxu3 %v2637_v10 }
 0x38f   : > { %v2811_v9 = vpack.c.bf16 %v2215_v47, %v2213_v52  ;;  %v2810_v51 = vpack.c.bf16 %v2210_v12, %v2208_v42 }
 0x390   : > { %8373 = vst [vmem:[#allocation28_spill] sm:$0xff] %v7275_v34 }
 0x391   : > { %8374 = vst [vmem:[#allocation29_spill] sm:$0xff] %v7278_v57  ;;  %2893 = vmatpush.bf16.msrb.mxu2 %v2811_v9  ;;  %v8388_v57 = vpack.c.bf16 %v7082_v20, %v7061_v53 }
 0x394   : > { %v2188_v16 = vpop.f32.mrf.mxu2  ;;  %v2217_v61 = vpop.f32.mrf.mxu3 }
 0x395   : > { %v7287_v44 = vadd.f32 %v2188_v16, %v7231_v59  ;;  %v7289_v1 = vadd.f32 %v2217_v61, %v1386_v33  ;;  %2894 = vmatpush.bf16.msrb.mxu2 %v2810_v51  ;;  %v2132_v10 = vpop.f32.mrf.mxu0  ;;  %v2161_v52 = vpop.f32.mrf.mxu1 }
 0x396   : > { %v7292_v47 = vadd.f32 %v2132_v10, %v7255_v45  ;;  %v7295_v63 = vadd.f32 %v2161_v52, %v7217_v22 }
 0x397   : > { %8375 = vst [vmem:[#allocation30_spill] sm:$0xff] %v7287_v44 }
 0x398   : > { %8376 = vst [vmem:[#allocation31_spill] sm:$0xff] %v7289_v1 }
 0x399   : > { %8377 = vst [vmem:[#allocation32_spill] sm:$0xff] %v7292_v47  ;;  %3109 = vmatpush.bf16.xpose.msra.mxu2 %v3100_v49  ;;  %v8382_v49 = vpack.c.bf16 %v7185_v35, %v7168_v0 }
 0x39a   : > { %8378 = vst [vmem:[#allocation33_spill] sm:$0xff] %v7295_v63 }
 0x39c   : > { %v2190_v41 = vpop.f32.mrf.mxu2  ;;  %v2219_v2 = vpop.f32.mrf.mxu3 }
 0x39d   : > { %v7302_v12 = vadd.f32 %v2190_v41, %v7231_v59  ;;  %v7304_v9 = vadd.f32 %v2219_v2, %v1386_v33  ;;  %v2135_v48 = vpop.f32.mrf.mxu0  ;;  %v2164_v42 = vpop.f32.mrf.mxu1 }
 0x39e   : > { %v7307_v56 = vadd.f32 %v2135_v48, %v7255_v45  ;;  %v7310_v51 = vadd.f32 %v2164_v42, %v7217_v22 }
 0x39f   : > { %8379 = vst [vmem:[#allocation34_spill] sm:$0xff] %v7304_v9  ;;  %v7563_v9 = vld [vmem:[%s6304_s19 + $0x8] sm:$0xff] }
 0x3a0   : > { %8380 = vst [vmem:[#allocation35_spill] sm:$0xff] %v7307_v56 }
 0x3a1   : > { %8381 = vst [vmem:[#allocation36_spill] sm:$0xff] %v7310_v51  ;;  %3110 = vmatpush.bf16.xpose.msra.mxu2 %v8382_v49 }
 0x3a4   : > { %v2193_v10 = vpop.f32.mrf.mxu2  ;;  %v2222_v52 = vpop.f32.mrf.mxu3 }
 0x3a5   : > { %v7320_v41 = vadd.f32 %v2193_v10, %v7231_v59  ;;  %v7322_v2 = vadd.f32 %v2222_v52, %v1386_v33  ;;  %v2137_v48 = vpop.f32.mrf.mxu0  ;;  %v2166_v42 = vpop.f32.mrf.mxu1 }
 0x3a6   : > { %v7325_v14 = vadd.f32 %v2137_v48, %v7255_v45  ;;  %v7328_v0 = vadd.f32 %v2166_v42, %v7217_v22  ;;  %v2227_v48 = vlaneseq }
 0x3a7   : > { %8383 = vst [vmem:[#allocation37_spill] sm:$0xff] %v7322_v2 }
 0x3a8   : > { %8384 = vst [vmem:[#allocation38_spill] sm:$0xff] %v7325_v14  ;;  %v7343_v42 = vand.u32 127, %v2227_v48 }
 0x3a9   : > { %8385 = vst [vmem:[#allocation39_spill] sm:$0xff] %v7328_v0 }
 0x3aa   : > { %vm2229_vm1 = vcmp.lt.s32.totalorder %v7343_v42, 17 }
 0x3ac   : > { %v2195_v61 = vpop.f32.mrf.mxu2  ;;  %v2224_v13 = vpop.f32.mrf.mxu3 }
 0x3ad   : > { %v7335_v10 = vadd.f32 %v2195_v61, %v7231_v59  ;;  %v7337_v52 = vadd.f32 %v2224_v13, %v1386_v33 }
 0x3af   : > { %8386 = vst [vmem:[#allocation40_spill] sm:$0xff] %v7337_v52  ;;  %v8387_v52 = vpack.c.bf16 %v7118_v39, %v7098_v26 }
 0x3dc   : > { %v2412_v35 = vpop.f32.mrf.mxu2 }
 0x3dd   : > { %v2422_v49 = vsel %vm2229_vm1, %v2412_v35, -1e+30 }
 0x3de   : > { %v2426_v59 = vsel %vm2323_vm2, %v2422_v49, -inf }
 0x3df   : > { %2427 = vmax.xlane.f32.xlu1 %v2426_v59 }
 0x3e4   : > { %v2414_v33 = vpop.f32.mrf.mxu2 }
 0x3e5   : > { %v2423_v13 = vsel %vm2229_vm1, %v2414_v33, -1e+30 }
 0x3e6   : > { %v2429_v61 = vsel %vm2323_vm2, %v2423_v13, -inf }
 0x3e7   : > { %2430 = vmax.xlane.f32.xlu2 %v2429_v61 }
 0x3ec   : > { %v2417_v22 = vpop.f32.mrf.mxu2 }
 0x3ed   : > { %v2424_v48 = vsel %vm2229_vm1, %v2417_v22, -1e+30 }
 0x3ee   : > { %v2432_v16 = vsel %vm2323_vm2, %v2424_v48, -inf }
 0x3ef   : > { %2433 = vmax.xlane.f32.xlu0 %v2432_v16 }
 0x3f4   : > { %v2419_v45 = vpop.f32.mrf.mxu2 }
 0x3f5   : > { %v2425_v35 = vsel %vm2229_vm1, %v2419_v45, -1e+30 }
 0x3f6   : > { %v2435_v59 = vsel %vm2323_vm2, %v2425_v35, -inf }
 0x3f7   : > { %2436 = vmax.xlane.f32.xlu1 %v2435_v59 }
 0x3fc   : > { %v2648_v3 = vpop.f32.mrf.mxu2 }
 0x3fd   : > { %v2658_v33 = vsel %vm2229_vm1, %v2648_v3, -1e+30 }
 0x3fe   : > { %v2662_v61 = vsel %vm2323_vm2, %v2658_v33, -inf }
 0x3ff   : > { %2663 = vmax.xlane.f32.xlu2 %v2662_v61 }
 0x404   : > { %v2650_v46 = vpop.f32.mrf.mxu2 }
 0x405   : > { %v2659_v22 = vsel %vm2229_vm1, %v2650_v46, -1e+30 }
 0x406   : > { %v2665_v16 = vsel %vm2323_vm2, %v2659_v22, -inf }
 0x407   : > { %2666 = vmax.xlane.f32.xlu0 %v2665_v16 }
 0x40c   : > { %v2653_v34 = vpop.f32.mrf.mxu2 }
 0x40d   : > { %v2660_v45 = vsel %vm2229_vm1, %v2653_v34, -1e+30 }
 0x40e   : > { %v2668_v59 = vsel %vm2323_vm2, %v2660_v45, -inf }
 0x40f   : > { %2669 = vmax.xlane.f32.xlu1 %v2668_v59 }
 0x414   : > { %v2655_v47 = vpop.f32.mrf.mxu2 }
 0x415   : > { %v2661_v3 = vsel %vm2229_vm1, %v2655_v47, -1e+30 }
 0x416   : > { %v2671_v61 = vsel %vm2323_vm2, %v2661_v3, -inf }
 0x417   : > { %2672 = vmax.xlane.f32.xlu2 %v2671_v61 }
 0x452   : > { %v2428_v56 = vpop.xlane.xlu1 %2427 }
 0x453   : > { %v2438_v14 = vsub.f32 %v2422_v49, %v2428_v56 }
 0x455   : > { %v2442_v46 = vmul.f32 1.442695, %v2438_v14 }
 0x457   : > { %5644 = vpow2.f32 %v2442_v46 }
 0x45a   : > { %v2431_v38 = vpop.xlane.xlu2 %2430 }
 0x45b   : > { %v2439_v16 = vsub.f32 %v2423_v13, %v2431_v38 }
 0x45d   : > { %v7370_v25 = vpop.eup %5644  ;;  %v2444_v8 = vmul.f32 1.442695, %v2439_v16 }
 0x45e   : > { %v2450_v34 = vsel %vm2323_vm2, %v7370_v25, 0.0 }
 0x45f   : > { %5646 = vpow2.f32 %v2444_v8  ;;  %2451 = vadd.xlane.f32.xlu0 %v2450_v34  ;;  %v2309_v8 = vpop.f32.mrf.mxu0 }
 0x462   : > { %v2434_v59 = vpop.xlane.xlu0 %2433 }
 0x463   : > { %v2440_v31 = vsub.f32 %v2424_v48, %v2434_v59 }
 0x465   : > { %v7374_v47 = vpop.eup %5646  ;;  %v2446_v51 = vmul.f32 1.442695, %v2440_v31 }
 0x466   : > { %v2453_v56 = vsel %vm2323_vm2, %v7374_v47, 0.0 }
 0x467   : > { %5648 = vpow2.f32 %v2446_v51  ;;  %2454 = vadd.xlane.f32.xlu1 %v2453_v56  ;;  %v2311_v59 = vpop.f32.mrf.mxu0 }
 0x46a   : > { %v2437_v14 = vpop.xlane.xlu1 %2436 }
 0x46b   : > { %v2441_v38 = vsub.f32 %v2425_v35, %v2437_v14 }
 0x46d   : > { %v7378_v49 = vpop.eup %5648  ;;  %v2448_v13 = vmul.f32 1.442695, %v2441_v38 }
 0x46e   : > { %v2456_v61 = vsel %vm2323_vm2, %v7378_v49, 0.0 }
 0x46f   : > { %5650 = vpow2.f32 %v2448_v13  ;;  %2457 = vadd.xlane.f32.xlu2 %v2456_v61 }
 0x472   : > { %v2664_v48 = vpop.xlane.xlu2 %2663 }
 0x473   : > { %v2674_v46 = vsub.f32 %v2658_v33, %v2664_v48 }
 0x475   : > { %v7382_v16 = vpop.eup %5650  ;;  %v2678_v31 = vmul.f32 1.442695, %v2674_v46  ;;  %v2314_v46 = vpop.f32.mrf.mxu0 }
 0x476   : > { %v2459_v51 = vsel %vm2323_vm2, %v7382_v16, 0.0 }
 0x477   : > { %5652 = vpow2.f32 %v2678_v31  ;;  %2460 = vadd.xlane.f32.xlu0 %v2459_v51  ;;  %v7396_v51 = vsel %vm2229_vm1, %v2309_v8, -1e+30 }
 0x47a   : > { %v2667_v35 = vpop.xlane.xlu0 %2666 }
 0x47b   : > { %v2675_v34 = vsub.f32 %v2659_v22, %v2667_v35 }
 0x47d   : > { %v7386_v56 = vpop.eup %5652  ;;  %v2680_v14 = vmul.f32 1.442695, %v2675_v34 }
 0x47e   : > { %v2686_v38 = vsel %vm2323_vm2, %v7386_v56, 0.0 }
 0x47f   : > { %5654 = vpow2.f32 %v2680_v14  ;;  %2687 = vadd.xlane.f32.xlu1 %v2686_v38 }
 0x482   : > { %v2670_v33 = vpop.xlane.xlu1 %2669 }
 0x483   : > { %v2676_v13 = vsub.f32 %v2660_v45, %v2670_v33  ;;  %v2324_v45 = vsel %vm2323_vm2, %v7396_v51, -inf  ;;  %v2316_v33 = vpop.f32.mrf.mxu0 }
 0x485   : > { %v7390_v61 = vpop.eup %5654  ;;  %v2682_v48 = vmul.f32 1.442695, %v2676_v13  ;;  %v7406_v13 = vsel %vm2229_vm1, %v2316_v33, -1e+30 }
 0x486   : > { %v2689_v31 = vsel %vm2323_vm2, %v7390_v61, 0.0 }
 0x487   : > { %5656 = vpow2.f32 %v2682_v48  ;;  %2690 = vadd.xlane.f32.xlu2 %v2689_v31  ;;  %v2333_v48 = vsel %vm2323_vm2, %v7406_v13, -inf }
 0x48a   : > { %v2673_v22 = vpop.xlane.xlu2 %2672 }
 0x48b   : > { %v2677_v35 = vsub.f32 %v2661_v3, %v2673_v22  ;;  %v7410_v3 = vsel %vm2229_vm1, %v2311_v59, -1e+30 }
 0x48c   : > { %v2327_v22 = vsel %vm2323_vm2, %v7410_v3, -inf }
 0x48d   : > { %v7398_v34 = vpop.eup %5656  ;;  %v2684_v14 = vmul.f32 1.442695, %v2677_v35  ;;  %v7422_v35 = vsel %vm2229_vm1, %v2314_v46, -1e+30 }
 0x48e   : > { %v2692_v38 = vsel %vm2323_vm2, %v7398_v34, 0.0  ;;  %v2330_v59 = vsel %vm2323_vm2, %v7422_v35, -inf }
 0x48f   : > { %5658 = vpow2.f32 %v2684_v14  ;;  %2325 = vmax.xlane.f32.xlu2 %v2324_v45  ;;  %2693 = vadd.xlane.f32.xlu0 %v2692_v38 }
 0x495   : > { %v7412_v8 = vpop.eup %5658 }
 0x496   : > { %v2695_v31 = vsel %vm2323_vm2, %v7412_v8, 0.0 }
 0x497   : > { %2334 = vmax.xlane.f32.xlu2 %v2333_v48  ;;  %2696 = vadd.xlane.f32.xlu1 %v2695_v31 }
 0x498   : > { %2328 = vmax.xlane.f32.xlu0 %v2327_v22  ;;  %v5482_v22 = vld [vmem:[%s6304_s19 + $0xf8] sm:$0xff] }
 0x49f   : > { %2331 = vmax.xlane.f32.xlu1 %v2330_v59  ;;  %v5481_v59 = vld [vmem:[%s6304_s19 + $0xf0] sm:$0xff] }
 0x4d2   : > { %v2452_v14 = vpop.xlane.xlu0 %2451 }
 0x4d3   : > { %5660 = vrcp.f32 %v2452_v14 }
 0x4d9   : > { %v5661_v38 = vpop.eup %5660 }
 0x4da   : > { %v2455_v45 = vpop.xlane.xlu1 %2454  ;;  %v2466_v48 = vmul.f32 %v5661_v38, %v7370_v25  ;;  %v5479_v25 = vld [vmem:[%s6304_s19 + $0xe0] sm:$0xff] }
 0x4db   : > { %5662 = vrcp.f32 %v2455_v45  ;;  %v5480_v45 = vld [vmem:[%s6304_s19 + $0xe8] sm:$0xff] }
 0x4e1   : > { %v5663_v33 = vpop.eup %5662 }
 0x4e2   : > { %v2467_v31 = vmul.f32 %v5663_v33, %v7374_v47  ;;  %v2458_v0 = vpop.xlane.xlu2 %2457 }
 0x4e3   : > { %5664 = vrcp.f32 %v2458_v0 }
 0x4e4   : > { %v2470_v46 = vpack.c.bf16 %v2467_v31, %v2466_v48  ;;  %v5478_v48 = vld [vmem:[%s6304_s19 + $0xd8] sm:$0xff] }
 0x4e6   : > { %5044 = vmatmul.msk.bf16.vlgmr.msrb.gmra.mxu3 %vm2323_vm2, %v2470_v46 }
 0x4e7   : > { %2956 = vmatpush.bf16.msrb.mxu3 %v5482_v22  ;;  %v5477_v22 = vld [vmem:[%s6304_s19 + $0xd0] sm:$0xff] }
 0x4e9   : > { %v5665_v1 = vpop.eup %5664 }
 0x4ea   : > { %v2461_v14 = vpop.xlane.xlu0 %2460  ;;  %v2468_v47 = vmul.f32 %v5665_v1, %v7378_v49  ;;  %v5475_v1 = vld [vmem:[%s6304_s19 + $0xc0] sm:$0xff]  ;;  %v7441_v49 = vld [vmem:[%s6304_s19 + $0x78] sm:$0xff] }
 0x4eb   : > { %5666 = vrcp.f32 %v2461_v14  ;;  %2957 = vmatpush.bf16.msrb.mxu3 %v5481_v59  ;;  %v5476_v59 = vld [vmem:[%s6304_s19 + $0xc8] sm:$0xff]  ;;  %2547 = vmatpush.bf16.msra.mxu0 %v7441_v49 }
 0x4ef   : > { %2958 = vmatpush.bf16.msrb.mxu3 %v5480_v45  ;;  %v2051_v45 = vadd.f32 %v7213_v36, %v7150_v15  ;;  %v2046_v36 = vadd.f32 %v7182_v24, %v7150_v15 }
 0x4f1   : > { %v5667_v38 = vpop.eup %5666 }
 0x4f2   : > { %v2469_v33 = vmul.f32 %v5667_v38, %v7382_v16  ;;  %v2688_v0 = vpop.xlane.xlu1 %2687 }
 0x4f3   : > { %2959 = vmatpush.bf16.msrb.mxu3 %v5479_v25  ;;  %5668 = vrcp.f32 %v2688_v0  ;;  %v7447_v25 = vld [vmem:[%s6304_s19 + $0x70] sm:$0xff] }
 0x4f4   : > { %v2471_v31 = vpack.c.bf16 %v2469_v33, %v2468_v47  ;;  %2548 = vmatpush.bf16.msra.mxu0 %v7447_v25 }
 0x4f6   : > { %5045 = vmatmul.msk.bf16.gmra.mxu3 %vm2323_vm2, %v2471_v31  ;;  %v2049_v31 = vadd.f32 %v7196_v40, %v7150_v15 }
 0x4f7   : > { %2960 = vmatpush.bf16.msrb.mxu3 %v5478_v48 }
 0x4f9   : > { %v5669_v14 = vpop.eup %5668 }
 0x4fa   : > { %v2691_v46 = vpop.xlane.xlu2 %2690  ;;  %v2702_v38 = vmul.f32 %v5669_v14, %v7386_v56  ;;  %v7458_v56 = vld [vmem:[%s6304_s19 + $0x68] sm:$0xff] }
 0x4fb   : > { %5670 = vrcp.f32 %v2691_v46  ;;  %2961 = vmatpush.bf16.msrb.mxu3 %v5477_v22  ;;  %v3102_v46 = vpack.c.bf16 %v2051_v45, %v2049_v31  ;;  %2549 = vmatpush.bf16.msra.mxu0 %v7458_v56 }
 0x4ff   : > { %2962 = vmatpush.bf16.msrb.mxu3 %v5476_v59 }
 0x501   : > { %v5671_v16 = vpop.eup %5670 }
 0x502   : > { %v2703_v47 = vmul.f32 %v5671_v16, %v7390_v61  ;;  %v2326_v33 = vpop.xlane.xlu2 %2325  ;;  %v2694_v48 = vpop.xlane.xlu0 %2693  ;;  %v2044_v61 = vadd.f32 %v7164_v4, %v7150_v15 }
 0x503   : > { %v2336_v0 = vsub.f32 %v7396_v51, %v2326_v33  ;;  %2963 = vmatpush.bf16.msrb.mxu3 %v5475_v1  ;;  %v7465_v51 = vld [vmem:[%s6304_s19 + $0x60] sm:$0xff] }
 0x504   : > { %v2706_v22 = vpack.c.bf16 %v2703_v47, %v2702_v38  ;;  %v3101_v40 = vpack.c.bf16 %v2046_v36, %v2044_v61  ;;  %2550 = vmatpush.bf16.msra.mxu0 %v7465_v51  ;;  %v7473_v38 = vld [vmem:[%s6304_s19 + $0x58] sm:$0xff] }
 0x505   : > { %v2340_v59 = vmul.f32 1.442695, %v2336_v0 }
 0x506   : > { %5110 = vmatmul.msk.bf16.vlgmr.msra.gmra.mxu3 %vm2323_vm2, %v2706_v22 }
 0x507   : > { %5672 = vpow2.f32 %v2340_v59  ;;  %3184 = vmatpush.bf16.msra.mxu3 %v3102_v46 }
 0x508   : > { %5674 = vrcp.f32 %v2694_v48  ;;  %2551 = vmatpush.bf16.msra.mxu0 %v7473_v38 }
 0x50a   : > { %v2335_v24 = vpop.xlane.xlu2 %2334  ;;  %v2697_v14 = vpop.xlane.xlu1 %2696 }
 0x50b   : > { %v2339_v1 = vsub.f32 %v7406_v13, %v2335_v24  ;;  %v2329_v16 = vpop.xlane.xlu0 %2328  ;;  %3185 = vmatpush.bf16.msra.mxu3 %v3101_v40  ;;  %5676 = vrcp.f32 %v2697_v14  ;;  %v7488_v40 = vld [vmem:[%s6304_s19 + $0x48] sm:$0xff]  ;;  %v7502_v14 = vld [vmem:[%s6304_s19 + $0xb8] sm:$0xff] }
 0x50c   : > { %v2337_v45 = vsub.f32 %v7410_v3, %v2329_v16  ;;  %v7479_v3 = vld [vmem:[%s6304_s19 + $0x50] sm:$0xff] }
 0x50d   : > { %v7469_v15 = vpop.eup %5672  ;;  %v2346_v4 = vmul.f32 1.442695, %v2339_v1  ;;  %2552 = vmatpush.bf16.msra.mxu0 %v7479_v3 }
 0x50e   : > { %v2342_v47 = vmul.f32 1.442695, %v2337_v45  ;;  %v2348_v33 = vsel %vm2323_vm2, %v7469_v15, 0.0  ;;  %v5675_v48 = vpop.eup %5674  ;;  %v7511_v45 = vld [vmem:[%s6304_s19 + $0xb0] sm:$0xff] }
 0x50f   : > { %5678 = vpow2.f32 %v2346_v4  ;;  %2349 = vadd.xlane.f32.xlu0 %v2348_v33  ;;  %v2704_v31 = vmul.f32 %v5675_v48, %v7398_v34  ;;  %v7515_v4 = vld [vmem:[%s6304_s19 + $0xa8] sm:$0xff]  ;;  %v7523_v33 = vld [vmem:[%s6304_s19 + $0x98] sm:$0xff]  ;;  %v7527_v48 = vld [vmem:[%s6304_s19 + $0x90] sm:$0xff] }
 0x510   : > { %5680 = vpow2.f32 %v2342_v47  ;;  %v7519_v47 = vld [vmem:[%s6304_s19 + $0xa0] sm:$0xff] }
 0x511   : > { %v5677_v13 = vpop.eup %5676  ;;  %2553 = vmatpush.bf16.msra.mxu0 %v7488_v40 }
 0x512   : > { %v2705_v0 = vmul.f32 %v5677_v13, %v7412_v8  ;;  %v2332_v22 = vpop.xlane.xlu1 %2331  ;;  %v7531_v13 = vld [vmem:[%s6304_s19 + $0x88] sm:$0xff] }
 0x513   : > { %v2338_v36 = vsub.f32 %v7422_v35, %v2332_v22  ;;  %v7499_v35 = vld [vmem:[%s6304_s19 + $0x40] sm:$0xff]  ;;  %v7543_v22 = vld [vmem:[%s6304_s19 + $0x30] sm:$0xff] }
 0x514   : > { %v2707_v46 = vpack.c.bf16 %v2705_v0, %v2704_v31  ;;  %v7535_v31 = vld [vmem:[%s6304_s19 + $0x80] sm:$0xff]  ;;  %v7539_v0 = vld [vmem:[%s6304_s19 + $0x38] sm:$0xff] }
 0x515   : > { %v7484_v59 = vpop.eup %5678  ;;  %v2344_v61 = vmul.f32 1.442695, %v2338_v36  ;;  %2554 = vmatpush.bf16.msra.mxu0 %v7499_v35  ;;  %2614 = vmatpush.bf16.msra.mxu1 %v7539_v0  ;;  %v7547_v36 = vld [vmem:[%s6304_s19 + $0x28] sm:$0xff] }
 0x516   : > { %v7490_v24 = vpop.eup %5680  ;;  %5111 = vmatmul.msk.bf16.gmra.mxu3 %vm2323_vm2, %v2707_v46  ;;  %v2357_v34 = vsel %vm2323_vm2, %v7484_v59, 0.0  ;;  %v7551_v46 = vld [vmem:[%s6304_s19 + $0x20] sm:$0xff] }
 0x517   : > { %5682 = vpow2.f32 %v2344_v61  ;;  %2358 = vadd.xlane.f32.xlu0 %v2357_v34  ;;  %v2351_v8 = vsel %vm2323_vm2, %v7490_v24, 0.0  ;;  %v7555_v34 = vld [vmem:[%s6304_s19 + $0x18] sm:$0xff] }
 0x518   : > { %2352 = vadd.xlane.f32.xlu1 %v2351_v8  ;;  %v7559_v8 = vld [vmem:[%s6304_s19 + $0x10] sm:$0xff] }
 0x519   : > { %2783 = vmatpush.bf16.msrb.mxu0 %v7502_v14  ;;  %2615 = vmatpush.bf16.msra.mxu1 %v7543_v22 }
 0x51d   : > { %v7504_v1 = vpop.eup %5682  ;;  %2784 = vmatpush.bf16.msrb.mxu0 %v7511_v45  ;;  %2616 = vmatpush.bf16.msra.mxu1 %v7547_v36 }
 0x51e   : > { %v2354_v16 = vsel %vm2323_vm2, %v7504_v1, 0.0 }
 0x51f   : > { %2355 = vadd.xlane.f32.xlu2 %v2354_v16 }
 0x521   : > { %2785 = vmatpush.bf16.msrb.mxu0 %v7515_v4  ;;  %2617 = vmatpush.bf16.msra.mxu1 %v7551_v46 }
 0x525   : > { %2786 = vmatpush.bf16.msrb.mxu0 %v7519_v47  ;;  %2618 = vmatpush.bf16.msra.mxu1 %v7555_v34 }
 0x529   : > { %2787 = vmatpush.bf16.msrb.mxu0 %v7523_v33  ;;  %2619 = vmatpush.bf16.msra.mxu1 %v7559_v8 }
 0x52d   : > { %2788 = vmatpush.bf16.msrb.mxu0 %v7527_v48  ;;  %2620 = vmatpush.bf16.msra.mxu1 %v7563_v9 }
 0x531   : > { %2789 = vmatpush.bf16.msrb.mxu0 %v7531_v13  ;;  %2621 = vmatpush.bf16.msra.mxu1 %v7570_v58 }
 0x535   : > { %2790 = vmatpush.bf16.msrb.mxu0 %v7535_v31 }
 0x569   : > { %v2487_v61 = vpop.f32.mrf.mxu3 }
 0x571   : > { %v2489_v16 = vpop.f32.mrf.mxu3 }
 0x572   : > { %v2497_v2 = vpack.c.bf16 %v2489_v16, %v2487_v61 }
 0x574   : > { %2555 = vmatmul.bf16.vlgmr.msra.gmra.mxu0 %v2497_v2 }
 0x575   : > { %3007 = vmatpush.bf16.xpose.msra.mxu0 %v8387_v52 }
 0x579   : > { %v2492_v28 = vpop.f32.mrf.mxu3 }
 0x57d   : > { %3008 = vmatpush.bf16.xpose.msra.mxu0 %v8388_v57 }
 0x581   : > { %v2494_v63 = vpop.f32.mrf.mxu3 }
 0x582   : > { %v2498_v30 = vpack.c.bf16 %v2494_v63, %v2492_v28  ;;  %v2350_v61 = vpop.xlane.xlu0 %2349  ;;  %v8389_v28 = vpack.c.bf16 %v7272_v21, %v7260_v60 }
 0x583   : > { %5684 = vrcp.f32 %v2350_v61 }
 0x584   : > { %2560 = vmatmul.bf16.gmra.mxu0 %v2498_v30 }
 0x589   : > { %v2723_v16 = vpop.f32.mrf.mxu3  ;;  %v5685_v6 = vpop.eup %5684 }
 0x58a   : > { %v2364_v7 = vmul.f32 %v5685_v6, %v7469_v15  ;;  %v2359_v20 = vpop.xlane.xlu0 %2358 }
 0x58b   : > { %v2353_v2 = vpop.xlane.xlu1 %2352 }
 0x58c   : > { %5686 = vrcp.f32 %v2353_v2 }
 0x591   : > { %v2725_v26 = vpop.f32.mrf.mxu3 }
 0x592   : > { %v5687_v39 = vpop.eup %5686  ;;  %v2733_v52 = vpack.c.bf16 %v2725_v26, %v2723_v16  ;;  %v2356_v53 = vpop.xlane.xlu2 %2355 }
 0x593   : > { %v2365_v37 = vmul.f32 %v5687_v39, %v7490_v24  ;;  %5688 = vrcp.f32 %v2356_v53 }
 0x594   : > { %2791 = vmatmul.bf16.vlgmr.msrb.gmra.mxu0 %v2733_v52  ;;  %5690 = vrcp.f32 %v2359_v20 }
 0x595   : > { %v2368_v44 = vpack.c.bf16 %v2365_v37, %v2364_v7  ;;  %3199 = vmatpush.bf16.msrb.mxu0 %v7441_v49  ;;  %v8390_v7 = vpack.c.bf16 %v7246_v62, %v7238_v55  ;;  %v8391_v62 = vpack.c.bf16 %v7079_v23, %v7058_v32  ;;  %v8392_v55 = vpack.c.bf16 %v7115_v18, %v7095_v5 }
 0x597   : > { %5042 = vmatmul.msk.bf16.vlgmr.msrb.gmra.mxu1 %vm2323_vm2, %v2368_v44 }
 0x598   : > { %2818 = vmatpush.bf16.xpose.msrb.mxu1 %v8389_v28 }
 0x599   : > { %v2728_v30 = vpop.f32.mrf.mxu3  ;;  %3200 = vmatpush.bf16.msrb.mxu0 %v7447_v25  ;;  %v5689_v6 = vpop.eup %5688 }
 0x59a   : > { %v5691_v57 = vpop.eup %5690  ;;  %v2366_v37 = vmul.f32 %v5689_v6, %v7504_v1 }
 0x59b   : > { %v2367_v60 = vmul.f32 %v5691_v57, %v7484_v59  ;;  %v8394_v59 = vpack.c.bf16 %v7089_v27, %v7073_v19  ;;  %v8395_v27 = vpack.c.bf16 %v7241_v54, %v7225_v43  ;;  %v8396_v54 = vpack.c.bf16 %v7265_v50, %v7249_v11 }
 0x59d   : > { %3201 = vmatpush.bf16.msrb.mxu0 %v7458_v56  ;;  %v2369_v21 = vpack.c.bf16 %v2367_v60, %v2366_v37 }
 0x5a0   : > { %2819 = vmatpush.bf16.xpose.msrb.mxu1 %v8390_v7 }
 0x5a1   : > { %v2730_v44 = vpop.f32.mrf.mxu3  ;;  %3202 = vmatpush.bf16.msrb.mxu0 %v7465_v51 }
 0x5a2   : > { %v2734_v63 = vpack.c.bf16 %v2730_v44, %v2728_v30 }
 0x5a4   : > { %2796 = vmatmul.bf16.gmra.mxu0 %v2734_v63 }
 0x5a5   : > { %3203 = vmatpush.bf16.msrb.mxu0 %v7473_v38  ;;  %v8393_v38 = vpack.c.bf16 %v7129_v17, %v7109_v29 }
 0x5a7   : > { %5043 = vmatmul.msk.bf16.gmra.mxu1 %vm2323_vm2, %v2369_v21 }
 0x5a9   : > { %3204 = vmatpush.bf16.msrb.mxu0 %v7479_v3 }
 0x5ad   : > { %3205 = vmatpush.bf16.msrb.mxu0 %v7488_v40 }
 0x5b1   : > { %3206 = vmatpush.bf16.msrb.mxu0 %v7499_v35 }
 0x5b4   : > { %3009 = vmatmul.bf16.vlgmr.msra.gmra.mxu0 %v8391_v62 }
 0x5b5   : > { %3339 = vmatpush.bf16.msra.mxu0 %v7502_v14 }
 0x5b9   : > { %3340 = vmatpush.bf16.msra.mxu0 %v7511_v45 }
 0x5bd   : > { %3341 = vmatpush.bf16.msra.mxu0 %v7515_v4 }
 0x5c1   : > { %3342 = vmatpush.bf16.msra.mxu0 %v7519_v47 }
 0x5c4   : > { %3014 = vmatmul.bf16.gmra.mxu0 %v8392_v55 }
 0x5c5   : > { %3343 = vmatpush.bf16.msra.mxu0 %v7523_v33 }
 0x5c9   : > { %3344 = vmatpush.bf16.msra.mxu0 %v7527_v48 }
 0x5cd   : > { %3345 = vmatpush.bf16.msra.mxu0 %v7531_v13 }
 0x5d1   : > { %3346 = vmatpush.bf16.msra.mxu0 %v7535_v31 }
 0x5f1   : > { %v7610_v32 = vpop.f32.mrf.mxu0 }
 0x5f9   : > { %v7612_v23 = vpop.f32.mrf.mxu0 }
 0x601   : > { %v7614_v49 = vpop.f32.mrf.mxu0 }
 0x609   : > { %v7616_v25 = vpop.f32.mrf.mxu0 }
 0x611   : > { %v7618_v56 = vpop.f32.mrf.mxu0 }
 0x614   : > { %v2385_v5 = vpop.f32.mrf.mxu1 }
 0x619   : > { %v7620_v18 = vpop.f32.mrf.mxu0 }
 0x61c   : > { %v2387_v51 = vpop.f32.mrf.mxu1 }
 0x61d   : > { %v2395_v15 = vpack.c.bf16 %v2387_v51, %v2385_v5 }
 0x61f   : > { %2622 = vmatmul.bf16.vlgmr.msra.gmra.mxu1 %v2395_v15 }
 0x620   : > { %3082 = vmatpush.bf16.msra.mxu1 %v8393_v38 }
 0x621   : > { %v7625_v3 = vpop.f32.mrf.mxu0 }
 0x624   : > { %3083 = vmatpush.bf16.msra.mxu1 %v8394_v59  ;;  %v2390_v40 = vpop.f32.mrf.mxu1 }
 0x629   : > { %v7630_v24 = vpop.f32.mrf.mxu0 }
 0x62c   : > { %v2392_v35 = vpop.f32.mrf.mxu1 }
 0x62d   : > { %v2396_v14 = vpack.c.bf16 %v2392_v35, %v2390_v40 }
 0x62f   : > { %2627 = vmatmul.bf16.gmra.mxu1 %v2396_v14 }
 0x631   : > { %v3010_v1 = vpop.f32.mrf.mxu0 }
 0x632   : > { %v3020_v45 = vsel %vm2229_vm1, %v3010_v1, -1e+30 }
 0x633   : > { %v3024_v4 = vsel %vm2323_vm2, %v3020_v45, -inf }
 0x634   : > { %3025 = vmax.xlane.f32.xlu1 %v3024_v4 }
 0x639   : > { %v3012_v29 = vpop.f32.mrf.mxu0 }
 0x63a   : > { %v3021_v17 = vsel %vm2229_vm1, %v3012_v29, -1e+30 }
 0x63b   : > { %v3027_v19 = vsel %vm2323_vm2, %v3021_v17, -inf }
 0x63c   : > { %3028 = vmax.xlane.f32.xlu2 %v3027_v19 }
 0x63f   : > { %2820 = vmatmul.bf16.vlgmr.msrb.gmra.mxu1 %v8395_v27 }
 0x640   : > { %3218 = vmatpush.bf16.msrb.mxu1 %v7539_v0 }
 0x641   : > { %v3015_v47 = vpop.f32.mrf.mxu0 }
 0x642   : > { %v3022_v33 = vsel %vm2229_vm1, %v3015_v47, -1e+30 }
 0x643   : > { %v3030_v48 = vsel %vm2323_vm2, %v3022_v33, -inf }
 0x644   : > { %3031 = vmax.xlane.f32.xlu0 %v3030_v48  ;;  %3219 = vmatpush.bf16.msrb.mxu1 %v7543_v22  ;;  %v8397_v48 = vpack.c.bf16 %v7335_v10, %v7320_v41 }
 0x648   : > { %3220 = vmatpush.bf16.msrb.mxu1 %v7547_v36 }
 0x649   : > { %v3017_v13 = vpop.f32.mrf.mxu0 }
 0x64a   : > { %v3023_v31 = vsel %vm2229_vm1, %v3017_v13, -1e+30 }
 0x64b   : > { %v3033_v43 = vsel %vm2323_vm2, %v3023_v31, -inf }
 0x64c   : > { %3034 = vmax.xlane.f32.xlu1 %v3033_v43  ;;  %3221 = vmatpush.bf16.msrb.mxu1 %v7551_v46 }
 0x64f   : > { %2825 = vmatmul.bf16.gmra.mxu1 %v8396_v54 }
 0x650   : > { %3222 = vmatpush.bf16.msrb.mxu1 %v7555_v34 }
 0x654   : > { %3223 = vmatpush.bf16.msrb.mxu1 %v7559_v8 }
 0x658   : > { %3224 = vmatpush.bf16.msrb.mxu1 %v7563_v9 }
 0x65c   : > { %3225 = vmatpush.bf16.msrb.mxu1 %v7570_v58 }
 0x69c   : > { %v7658_v0 = vpop.f32.mrf.mxu1 }
 0x6a4   : > { %v7660_v22 = vpop.f32.mrf.mxu1 }
 0x6a7   : > { %v3026_v36 = vpop.xlane.xlu1 %3025 }
 0x6a8   : > { %v3036_v61 = vsub.f32 %v3020_v45, %v3026_v36 }
 0x6aa   : > { %v3040_v16 = vmul.f32 1.442695, %v3036_v61 }
 0x6ac   : > { %5692 = vpow2.f32 %v3040_v16  ;;  %v7662_v46 = vpop.f32.mrf.mxu1 }
 0x6af   : > { %v3029_v50 = vpop.xlane.xlu2 %3028 }
 0x6b0   : > { %v3037_v11 = vsub.f32 %v3021_v17, %v3029_v50  ;;  %v8398_v50 = vld [vmem:[#allocation30_spill] sm:$0xff] }
 0x6b2   : > { %v5693_v2 = vpop.eup %5692  ;;  %v3042_v34 = vmul.f32 1.442695, %v3037_v11  ;;  %v8399_v11 = vpack.c.bf16 %v7302_v12, %v8398_v50  ;;  %v8413_v50 = vld [vmem:[#allocation37_spill] sm:$0xff] }
 0x6b3   : > { %v3048_v8 = vsel %vm2323_vm2, %v5693_v2, 0.0 }
 0x6b4   : > { %5694 = vpow2.f32 %v3042_v34  ;;  %v7665_v9 = vpop.f32.mrf.mxu1  ;;  %3049 = vadd.xlane.f32.xlu2 %v3048_v8 }
 0x6b7   : > { %v3032_v58 = vpop.xlane.xlu0 %3031 }
 0x6b8   : > { %v3038_v26 = vsub.f32 %v3022_v33, %v3032_v58 }
 0x6ba   : > { %v5695_v39 = vpop.eup %5694  ;;  %v3044_v52 = vmul.f32 1.442695, %v3038_v26 }
 0x6bb   : > { %v3051_v53 = vsel %vm2323_vm2, %v5695_v39, 0.0 }
 0x6bc   : > { %5696 = vpow2.f32 %v3044_v52  ;;  %v2821_v20 = vpop.f32.mrf.mxu1  ;;  %3052 = vadd.xlane.f32.xlu0 %v3051_v53 }
 0x6bd   : > { %v2831_v30 = vsel %vm2229_vm1, %v2821_v20, -1e+30 }
 0x6be   : > { %v2835_v37 = vsel %vm2323_vm2, %v2831_v30, -inf }
 0x6bf   : > { %v3035_v28 = vpop.xlane.xlu1 %3034 }
 0x6c0   : > { %v3039_v6 = vsub.f32 %v3023_v31, %v3035_v28 }
 0x6c2   : > { %v5697_v57 = vpop.eup %5696  ;;  %v3046_v7 = vmul.f32 1.442695, %v3039_v6 }
 0x6c3   : > { %v3054_v44 = vsel %vm2323_vm2, %v5697_v57, 0.0 }
 0x6c4   : > { %5698 = vpow2.f32 %v3046_v7  ;;  %v2823_v63 = vpop.f32.mrf.mxu1  ;;  %2836 = vmax.xlane.f32.xlu0 %v2835_v37  ;;  %3055 = vadd.xlane.f32.xlu1 %v3054_v44 }
 0x6c5   : > { %v2832_v60 = vsel %vm2229_vm1, %v2823_v63, -1e+30 }
 0x6c6   : > { %v2838_v62 = vsel %vm2323_vm2, %v2832_v60, -inf }
 0x6ca   : > { %v5699_v21 = vpop.eup %5698 }
 0x6cb   : > { %v3057_v55 = vsel %vm2323_vm2, %v5699_v21, 0.0 }
 0x6cc   : > { %v2826_v5 = vpop.f32.mrf.mxu1  ;;  %2839 = vmax.xlane.f32.xlu1 %v2838_v62  ;;  %3058 = vadd.xlane.f32.xlu2 %v3057_v55 }
 0x6cd   : > { %v2833_v51 = vsel %vm2229_vm1, %v2826_v5, -1e+30 }
 0x6ce   : > { %v2841_v15 = vsel %vm2323_vm2, %v2833_v51, -inf }
 0x6d4   : > { %v2828_v38 = vpop.f32.mrf.mxu1  ;;  %2842 = vmax.xlane.f32.xlu2 %v2841_v15 }
 0x6d5   : > { %v2834_v59 = vsel %vm2229_vm1, %v2828_v38, -1e+30 }
 0x6d6   : > { %v2844_v40 = vsel %vm2323_vm2, %v2834_v59, -inf }
 0x6d7   : > { %2845 = vmax.xlane.f32.xlu0 %v2844_v40  ;;  %v8400_v40 = vld [vmem:[#allocation27_spill] sm:$0xff] }
 0x727   : > { %v3050_v35 = vpop.xlane.xlu2 %3049 }
 0x728   : > { %5700 = vrcp.f32 %v3050_v35  ;;  %v8401_v35 = vld [vmem:[#allocation25_spill] sm:$0xff] }
 0x72e   : > { %v5701_v1 = vpop.eup %5700 }
 0x72f   : > { %v3053_v14 = vpop.xlane.xlu0 %3052  ;;  %v3064_v4 = vmul.f32 %v5701_v1, %v5693_v2 }
 0x730   : > { %5702 = vrcp.f32 %v3053_v14  ;;  %v8402_v14 = vpack.c.bf16 %v8400_v40, %v8401_v35 }
 0x736   : > { %v5703_v45 = vpop.eup %5702 }
 0x737   : > { %v3065_v29 = vmul.f32 %v5703_v45, %v5695_v39  ;;  %v2837_v17 = vpop.xlane.xlu0 %2836  ;;  %v3056_v19 = vpop.xlane.xlu1 %3055 }
 0x738   : > { %v2847_v27 = vsub.f32 %v2831_v30, %v2837_v17  ;;  %v8403_v17 = vld [vmem:[#allocation23_spill] sm:$0xff] }
 0x739   : > { %v3068_v47 = vpack.c.bf16 %v3065_v29, %v3064_v4 }
 0x73a   : > { %v2851_v33 = vmul.f32 1.442695, %v2847_v27 }
 0x73b   : > { %5178 = vmatmul.msk.bf16.vlgmr.msra.gmra.mxu1 %vm2323_vm2, %v3068_v47 }
 0x73c   : > { %5704 = vpow2.f32 %v2851_v33  ;;  %3374 = vmatpush.bf16.xpose.msra.mxu1 %v8397_v48 }
 0x73d   : > { %5706 = vrcp.f32 %v3056_v19  ;;  %v8404_v19 = vld [vmem:[#allocation21_spill] sm:$0xff] }
 0x73e   : > { %v8405_v27 = vpack.c.bf16 %v8403_v17, %v8404_v19 }
 0x73f   : > { %v3059_v13 = vpop.xlane.xlu2 %3058  ;;  %v2840_v31 = vpop.xlane.xlu1 %2839 }
 0x740   : > { %5708 = vrcp.f32 %v3059_v13  ;;  %v2848_v43 = vsub.f32 %v2832_v60, %v2840_v31  ;;  %v8406_v13 = vld [vmem:[#allocation33_spill] sm:$0xff] }
 0x741   : > { %v8407_v31 = vld [vmem:[#allocation29_spill] sm:$0xff] }
 0x742   : > { %v5705_v54 = vpop.eup %5704  ;;  %v2853_v36 = vmul.f32 1.442695, %v2848_v43  ;;  %v8408_v43 = vpack.c.bf16 %v8406_v13, %v8407_v31 }
 0x743   : > { %v2859_v61 = vsel %vm2323_vm2, %v5705_v54, 0.0  ;;  %v5707_v16 = vpop.eup %5706 }
 0x744   : > { %5710 = vpow2.f32 %v2853_v36  ;;  %3375 = vmatpush.bf16.xpose.msra.mxu1 %v8399_v11  ;;  %2860 = vadd.xlane.f32.xlu1 %v2859_v61  ;;  %v3066_v34 = vmul.f32 %v5707_v16, %v5697_v57  ;;  %v8410_v36 = vld [vmem:[#allocation16_spill] sm:$0xff] }
 0x745   : > { %v8412_v16 = vld [vmem:[#allocation40_spill] sm:$0xff] }
 0x746   : > { %v5709_v2 = vpop.eup %5708  ;;  %v8414_v11 = vpack.c.bf16 %v8412_v16, %v8413_v50 }
 0x747   : > { %v3067_v41 = vmul.f32 %v5709_v2, %v5699_v21  ;;  %v2843_v10 = vpop.xlane.xlu2 %2842  ;;  %v8415_v2 = vld [vmem:[#allocation34_spill] sm:$0xff] }
 0x748   : > { %v2849_v8 = vsub.f32 %v2833_v51, %v2843_v10  ;;  %v8418_v10 = vld [vmem:[#allocation39_spill] sm:$0xff] }
 0x749   : > { %v3069_v58 = vpack.c.bf16 %v3067_v41, %v3066_v34  ;;  %v8416_v34 = vld [vmem:[#allocation31_spill] sm:$0xff] }
 0x74a   : > { %v5711_v26 = vpop.eup %5710  ;;  %v2855_v39 = vmul.f32 1.442695, %v2849_v8  ;;  %v2846_v52 = vpop.xlane.xlu0 %2845  ;;  %v8417_v41 = vpack.c.bf16 %v8415_v2, %v8416_v34  ;;  %v8419_v8 = vld [vmem:[#allocation36_spill] sm:$0xff] }
 0x74b   : > { %v2850_v53 = vsub.f32 %v2834_v59, %v2846_v52  ;;  %5179 = vmatmul.msk.bf16.gmra.mxu1 %vm2323_vm2, %v3069_v58  ;;  %v2862_v20 = vsel %vm2323_vm2, %v5711_v26, 0.0  ;;  %v8420_v58 = vpack.c.bf16 %v8418_v10, %v8419_v8 }
 0x74c   : > { %5712 = vpow2.f32 %v2855_v39  ;;  %2863 = vadd.xlane.f32.xlu2 %v2862_v20  ;;  %v8422_v39 = vld [vmem:[#allocation18_spill] sm:$0xff]  ;;  %v8425_v20 = vld [vmem:[#allocation20_spill] sm:$0xff] }
 0x74d   : > { %v2857_v28 = vmul.f32 1.442695, %v2850_v53  ;;  %v8424_v53 = vld [vmem:[#allocation22_spill] sm:$0xff] }
 0x74f   : > { %5714 = vpow2.f32 %v2857_v28  ;;  %v8426_v28 = vpack.c.bf16 %v8424_v53, %v8425_v20 }
 0x752   : > { %v5713_v12 = vpop.eup %5712 }
 0x753   : > { %v2865_v30 = vsel %vm2323_vm2, %v5713_v12, 0.0 }
 0x754   : > { %2866 = vadd.xlane.f32.xlu0 %v2865_v30  ;;  %v8428_v30 = vld [vmem:[#allocation24_spill] sm:$0xff] }
 0x755   : > { %v5715_v6 = vpop.eup %5714 }
 0x756   : > { %v2868_v57 = vsel %vm2323_vm2, %v5715_v6, 0.0 }
 0x757   : > { %2869 = vadd.xlane.f32.xlu1 %v2868_v57 }
 0x7b7   : > { %v2861_v37 = vpop.xlane.xlu1 %2860 }
 0x7b8   : > { %v3085_v7 = vpop.f32.mrf.mxu1  ;;  %5716 = vrcp.f32 %v2861_v37 }
 0x7be   : > { %v5717_v21 = vpop.eup %5716 }
 0x7bf   : > { %v2864_v44 = vpop.xlane.xlu2 %2863  ;;  %v2875_v55 = vmul.f32 %v5717_v21, %v5705_v54  ;;  %v8409_v54 = vld [vmem:[#allocation17_spill] sm:$0xff]  ;;  %v8431_v21 = vld [vmem:[#allocation35_spill] sm:$0xff] }
 0x7c0   : > { %5718 = vrcp.f32 %v2864_v44  ;;  %v3087_v63 = vpop.f32.mrf.mxu1  ;;  %v8411_v61 = vpack.c.bf16 %v8409_v54, %v8410_v36 }
 0x7c1   : > { %v3095_v60 = vpack.c.bf16 %v3087_v63, %v3085_v7 }
 0x7c3   : > { %3226 = vmatmul.bf16.vlgmr.msrb.gmra.mxu1 %v3095_v60  ;;  %v8430_v60 = vld [vmem:[#allocation38_spill] sm:$0xff] }
 0x7c6   : > { %v5719_v62 = vpop.eup %5718 }
 0x7c7   : > { %v2876_v5 = vmul.f32 %v5719_v62, %v5711_v26  ;;  %v2867_v59 = vpop.xlane.xlu0 %2866  ;;  %v8421_v26 = vld [vmem:[#allocation19_spill] sm:$0xff]  ;;  %v8432_v62 = vpack.c.bf16 %v8430_v60, %v8431_v21 }
 0x7c8   : > { %v3090_v51 = vpop.f32.mrf.mxu1  ;;  %v8423_v52 = vpack.c.bf16 %v8421_v26, %v8422_v39 }
 0x7c9   : > { %v2879_v15 = vpack.c.bf16 %v2876_v5, %v2875_v55  ;;  %v8433_v55 = vld [vmem:[#allocation32_spill] sm:$0xff] }
 0x7ca   : > { %v2870_v38 = vpop.xlane.xlu1 %2869  ;;  %v8434_v5 = vld [vmem:[#allocation28_spill] sm:$0xff] }
 0x7cb   : > { %5144 = vmatmul.msk.bf16.vlgmr.msrb.gmra.mxu2 %vm2323_vm2, %v2879_v15  ;;  %5720 = vrcp.f32 %v2870_v38 }
 0x7cc   : > { %3249 = vmatpush.bf16.xpose.msrb.mxu2 %v8402_v14  ;;  %5722 = vrcp.f32 %v2867_v59 }
 0x7d0   : > { %v3092_v1 = vpop.f32.mrf.mxu1 }
 0x7d1   : > { %v3096_v45 = vpack.c.bf16 %v3092_v1, %v3090_v51  ;;  %v5721_v4 = vpop.eup %5720  ;;  %v8435_v51 = vpack.c.bf16 %v8433_v55, %v8434_v5 }
 0x7d2   : > { %v5723_v29 = vpop.eup %5722  ;;  %v2878_v47 = vmul.f32 %v5721_v4, %v5715_v6 }
 0x7d3   : > { %3231 = vmatmul.bf16.gmra.mxu1 %v3096_v45  ;;  %v2877_v33 = vmul.f32 %v5723_v29, %v5713_v12  ;;  %v8427_v12 = vld [vmem:[#allocation26_spill] sm:$0xff] }
 0x7d4   : > { %3250 = vmatpush.bf16.xpose.msrb.mxu2 %v8405_v27  ;;  %v8429_v6 = vpack.c.bf16 %v8427_v12, %v8428_v30 }
 0x7d5   : > { %v2880_v48 = vpack.c.bf16 %v2878_v47, %v2877_v33 }
 0x7db   : > { %5145 = vmatmul.msk.bf16.gmra.mxu2 %vm2323_vm2, %v2880_v48 }
 0x7e3   : > { %3376 = vmatmul.bf16.vlgmr.msra.gmra.mxu1 %v8408_v43 }
 0x7eb   : > { %3111 = vmatmul.bf16.vlgmr.msra.gmra.mxu2 %v8411_v61 }
 0x7ec   : > { %3449 = vmatpush.bf16.msra.mxu2 %v8414_v11 }
 0x7f0   : > { %3450 = vmatpush.bf16.msra.mxu2 %v8417_v41 }
 0x7f3   : > { %3381 = vmatmul.bf16.gmra.mxu1 %v8420_v58 }
 0x7fb   : > { %3116 = vmatmul.bf16.gmra.mxu2 %v8423_v52 }
 0x80b   : > { %3251 = vmatmul.bf16.vlgmr.msrb.gmra.mxu2 %v8426_v28 }
 0x81b   : > { %3256 = vmatmul.bf16.gmra.mxu2 %v8429_v6 }
 0x840   : > { %v7726_v57 = vpop.f32.mrf.mxu1 }
 0x848   : > { %v7728_v37 = vpop.f32.mrf.mxu1 }
 0x84e   : > { %v2896_v7 = vpop.f32.mrf.mxu2 }
 0x850   : > { %v7736_v38 = vpop.f32.mrf.mxu1 }
 0x856   : > { %v2898_v44 = vpop.f32.mrf.mxu2 }
 0x857   : > { %v2906_v63 = vpack.c.bf16 %v2898_v44, %v2896_v7 }
 0x858   : > { %v7738_v35 = vpop.f32.mrf.mxu1 }
 0x859   : > { %2964 = vmatmul.bf16.vlgmr.msrb.gmra.mxu3 %v2906_v63 }
 0x85a   : > { %3324 = vmatpush.bf16.msrb.mxu3 %v8432_v62 }
 0x85e   : > { %3325 = vmatpush.bf16.msrb.mxu3 %v8435_v51  ;;  %v2901_v15 = vpop.f32.mrf.mxu2 }
 0x860   : > { %v3377_v4 = vpop.f32.mrf.mxu1 }
 0x861   : > { %v3387_v27 = vsel %vm2229_vm1, %v3377_v4, -1e+30 }
 0x862   : > { %v3391_v13 = vsel %vm2323_vm2, %v3387_v27, -inf }
 0x866   : > { %v2903_v59 = vpop.f32.mrf.mxu2 }
 0x867   : > { %v2907_v40 = vpack.c.bf16 %v2903_v59, %v2901_v15 }
 0x868   : > { %v3379_v47 = vpop.f32.mrf.mxu1 }
 0x869   : > { %2969 = vmatmul.bf16.gmra.mxu3 %v2907_v40  ;;  %v3388_v43 = vsel %vm2229_vm1, %v3379_v47, -1e+30 }
 0x86a   : > { %v3394_v16 = vsel %vm2323_vm2, %v3388_v43, -inf }
 0x86e   : > { %v3112_v14 = vpop.f32.mrf.mxu2 }
 0x86f   : > { %v3122_v1 = vsel %vm2229_vm1, %v3112_v14, -1e+30 }
 0x870   : > { %v3126_v45 = vsel %vm2323_vm2, %v3122_v1, -inf  ;;  %v3382_v61 = vpop.f32.mrf.mxu1 }
 0x871   : > { %3127 = vmax.xlane.f32.xlu2 %v3126_v45  ;;  %v7760_v11 = vsel %vm2229_vm1, %v3382_v61, -1e+30 }
 0x872   : > { %v3397_v41 = vsel %vm2323_vm2, %v7760_v11, -inf }
 0x876   : > { %v3114_v29 = vpop.f32.mrf.mxu2 }
 0x877   : > { %v3123_v17 = vsel %vm2229_vm1, %v3114_v29, -1e+30 }
 0x878   : > { %v3129_v19 = vsel %vm2323_vm2, %v3123_v17, -inf  ;;  %v3384_v8 = vpop.f32.mrf.mxu1 }
 0x879   : > { %3130 = vmax.xlane.f32.xlu0 %v3129_v19  ;;  %v7772_v58 = vsel %vm2229_vm1, %v3384_v8, -1e+30 }
 0x87a   : > { %v3400_v53 = vsel %vm2323_vm2, %v7772_v58, -inf }
 0x87e   : > { %v3117_v33 = vpop.f32.mrf.mxu2 }
 0x87f   : > { %v3124_v48 = vsel %vm2229_vm1, %v3117_v33, -1e+30 }
 0x880   : > { %v3132_v31 = vsel %vm2323_vm2, %v3124_v48, -inf }
 0x881   : > { %3392 = vmax.xlane.f32.xlu0 %v3391_v13  ;;  %3133 = vmax.xlane.f32.xlu1 %v3132_v31 }
 0x886   : > { %v3119_v54 = vpop.f32.mrf.mxu2 }
 0x887   : > { %v3125_v36 = vsel %vm2229_vm1, %v3119_v54, -1e+30 }
 0x888   : > { %v3135_v50 = vsel %vm2323_vm2, %v3125_v36, -inf }
 0x889   : > { %3395 = vmax.xlane.f32.xlu1 %v3394_v16  ;;  %3136 = vmax.xlane.f32.xlu2 %v3135_v50 }
 0x88e   : > { %v3252_v2 = vpop.f32.mrf.mxu2 }
 0x88f   : > { %v7764_v34 = vsel %vm2229_vm1, %v3252_v2, -1e+30 }
 0x890   : > { %v3266_v10 = vsel %vm2323_vm2, %v7764_v34, -inf }
 0x891   : > { %3398 = vmax.xlane.f32.xlu1 %v3397_v41  ;;  %3267 = vmax.xlane.f32.xlu2 %v3266_v10 }
 0x896   : > { %v3254_v26 = vpop.f32.mrf.mxu2 }
 0x897   : > { %v7776_v39 = vsel %vm2229_vm1, %v3254_v26, -1e+30 }
 0x898   : > { %v3269_v52 = vsel %vm2323_vm2, %v7776_v39, -inf }
 0x899   : > { %3270 = vmax.xlane.f32.xlu0 %v3269_v52  ;;  %3401 = vmax.xlane.f32.xlu2 %v3400_v53 }
 0x89e   : > { %v3257_v20 = vpop.f32.mrf.mxu2 }
 0x89f   : > { %v7784_v28 = vsel %vm2229_vm1, %v3257_v20, -1e+30 }
 0x8a0   : > { %v3272_v12 = vsel %vm2323_vm2, %v7784_v28, -inf }
 0x8a1   : > { %3273 = vmax.xlane.f32.xlu0 %v3272_v12 }
 0x8a6   : > { %v3259_v30 = vpop.f32.mrf.mxu2 }
 0x8a7   : > { %v7790_v6 = vsel %vm2229_vm1, %v3259_v30, -1e+30 }
 0x8a8   : > { %v3275_v7 = vsel %vm2323_vm2, %v7790_v6, -inf }
 0x8a9   : > { %3276 = vmax.xlane.f32.xlu1 %v3275_v7 }
 0x8dc   : > { %v2965_v52 = vpop.f32.mrf.mxu3 }
 0x8e4   : > { %v3128_v44 = vpop.xlane.xlu2 %3127 }
 0x8e5   : > { %v3138_v63 = vsub.f32 %v3122_v1, %v3128_v44 }
 0x8e7   : > { %v3142_v60 = vmul.f32 1.442695, %v3138_v63 }
 0x8e9   : > { %5724 = vpow2.f32 %v3142_v60 }
 0x8ec   : > { %v3131_v21 = vpop.xlane.xlu0 %3130 }
 0x8ed   : > { %v3139_v62 = vsub.f32 %v3123_v17, %v3131_v21  ;;  %v2624_v21 = vadd.f32 %v7658_v0, %v7610_v32 }
 0x8ef   : > { %v7794_v55 = vpop.eup %5724  ;;  %v3144_v5 = vmul.f32 1.442695, %v3139_v62 }
 0x8f0   : > { %v3150_v51 = vsel %vm2323_vm2, %v7794_v55, 0.0 }
 0x8f1   : > { %5726 = vpow2.f32 %v3144_v5  ;;  %3151 = vadd.xlane.f32.xlu2 %v3150_v51  ;;  %v2626_v5 = vadd.f32 %v7660_v22, %v7612_v23  ;;  %v2802_v51 = vadd.f32 %v7618_v56, %v2624_v21  ;;  %v5852_v23 = vld [vmem:[%s8350_s20] sm:$0xff] }
 0x8f2   : > { %v5625_v22 = vld [vmem:[%s6310_s27] ss:$0 sm:$0xff] }
 0x8f4   : > { %v3393_v42 = vpop.xlane.xlu0 %3392  ;;  %v3134_v15 = vpop.xlane.xlu1 %3133 }
 0x8f5   : > { %v3403_v59 = vsub.f32 %v3387_v27, %v3393_v42  ;;  %v3140_v40 = vsub.f32 %v3124_v48, %v3134_v15 }
 0x8f7   : > { %v7798_v14 = vpop.eup %5726  ;;  %v3407_v45 = vmul.f32 1.442695, %v3403_v59  ;;  %v3146_v1 = vmul.f32 1.442695, %v3140_v40  ;;  %v2975_v40 = vadd.f32 %v2965_v52, %v2802_v51 }
 0x8f8   : > { %v3153_v4 = vsel %vm2323_vm2, %v7798_v14, 0.0 }
 0x8f9   : > { %5728 = vpow2.f32 %v3407_v45  ;;  %3154 = vadd.xlane.f32.xlu0 %v3153_v4  ;;  %v2979_v56 = vadd.f32 %v5852_v23, %v2975_v40  ;;  %v5858_v40 = vld [vmem:[%s6304_s19 + $0xe8] sm:$0xff] }
 0x8fa   : > { %5730 = vpow2.f32 %v3146_v1 }
 0x8fc   : > { %v3396_v29 = vpop.xlane.xlu1 %3395  ;;  %v3137_v17 = vpop.xlane.xlu2 %3136 }
 0x8fd   : > { %v3404_v19 = vsub.f32 %v3388_v43, %v3396_v29  ;;  %v3141_v47 = vsub.f32 %v3125_v36, %v3137_v17  ;;  %v2629_v29 = vadd.f32 %v7662_v46, %v7614_v49 }
 0x8ff   : > { %v7802_v33 = vpop.eup %5728  ;;  %v3409_v13 = vmul.f32 1.442695, %v3404_v19  ;;  %v3148_v31 = vmul.f32 1.442695, %v3141_v47 }
 0x900   : > { %v7804_v27 = vpop.eup %5730  ;;  %v3415_v48 = vsel %vm2323_vm2, %v7802_v33, 0.0 }
 0x901   : > { %5732 = vpow2.f32 %v3409_v13  ;;  %3416 = vadd.xlane.f32.xlu0 %v3415_v48  ;;  %v3156_v54 = vsel %vm2323_vm2, %v7804_v27, 0.0  ;;  %v7854_v13 = vadd.f32 %v5625_v22, %v2979_v56 }
 0x902   : > { %5734 = vpow2.f32 %v3148_v31  ;;  %3157 = vadd.xlane.f32.xlu1 %v3156_v54  ;;  %v2631_v54 = vadd.f32 %v7665_v9, %v7616_v25 }
 0x903   : > { %v3527_v52 = vmul.f32 %v7854_v13, %v7854_v13 }
 0x904   : > { %v3399_v61 = vpop.xlane.xlu1 %3398  ;;  %v3268_v16 = vpop.xlane.xlu2 %3267 }
 0x905   : > { %v3405_v43 = vsub.f32 %v7760_v11, %v3399_v61  ;;  %v3278_v36 = vsub.f32 %v7764_v34, %v3268_v16  ;;  %v5854_v16 = vld [vmem:[%s8350_s20 + $0x10] sm:$0xff] }
 0x907   : > { %v7812_v50 = vpop.eup %5732  ;;  %v3411_v2 = vmul.f32 1.442695, %v3405_v43  ;;  %v3282_v41 = vmul.f32 1.442695, %v3278_v36 }
 0x908   : > { %v7814_v10 = vpop.eup %5734  ;;  %v3418_v8 = vsel %vm2323_vm2, %v7812_v50, 0.0 }
 0x909   : > { %5736 = vpow2.f32 %v3411_v2  ;;  %v3159_v26 = vsel %vm2323_vm2, %v7814_v10, 0.0 }
 0x90a   : > { %5738 = vpow2.f32 %v3282_v41  ;;  %3419 = vadd.xlane.f32.xlu1 %v3418_v8  ;;  %3160 = vadd.xlane.f32.xlu2 %v3159_v26  ;;  %v2805_v41 = vadd.f32 %v7630_v24, %v2631_v54  ;;  %v5855_v8 = vld [vmem:[%s8350_s20 + $0x18] sm:$0xff] }
 0x90b   : > { %v5860_v54 = vld [vmem:[%s6304_s19 + $0xd8] sm:$0xff] }
 0x90c   : > { %v3271_v11 = vpop.xlane.xlu0 %3270  ;;  %v3402_v53 = vpop.xlane.xlu2 %3401 }
 0x90d   : > { %v3279_v34 = vsub.f32 %v7776_v39, %v3271_v11  ;;  %v3406_v20 = vsub.f32 %v7772_v58, %v3402_v53  ;;  %v2967_v58 = vpop.f32.mrf.mxu3 }
 0x90f   : > { %v7822_v12 = vpop.eup %5736  ;;  %v3284_v30 = vmul.f32 1.442695, %v3279_v34  ;;  %v3413_v7 = vmul.f32 1.442695, %v3406_v20 }
 0x910   : > { %v7824_v44 = vpop.eup %5738  ;;  %v3421_v63 = vsel %vm2323_vm2, %v7822_v12, 0.0 }
 0x911   : > { %5740 = vpow2.f32 %v3284_v30  ;;  %v3290_v60 = vsel %vm2323_vm2, %v7824_v44, 0.0 }
 0x912   : > { %5742 = vpow2.f32 %v3413_v7  ;;  %3422 = vadd.xlane.f32.xlu1 %v3421_v63  ;;  %3291 = vadd.xlane.f32.xlu2 %v3290_v60 }
 0x914   : > { %v3274_v39 = vpop.xlane.xlu0 %3273 }
 0x915   : > { %v3280_v62 = vsub.f32 %v7784_v28, %v3274_v39  ;;  %v2803_v28 = vadd.f32 %v7620_v18, %v2626_v5  ;;  %v2970_v17 = vpop.f32.mrf.mxu3  ;;  %v5853_v18 = vld [vmem:[%s8350_s20 + $0x8] sm:$0xff] }
 0x917   : > { %v7836_v42 = vpop.eup %5740  ;;  %v3286_v15 = vmul.f32 1.442695, %v3280_v62  ;;  %v2976_v45 = vadd.f32 %v2967_v58, %v2803_v28  ;;  %v5856_v62 = vld [vmem:[%s6304_s19 + $0xf8] sm:$0xff] }
 0x918   : > { %v7838_v59 = vpop.eup %5742  ;;  %v3293_v32 = vsel %vm2323_vm2, %v7836_v42, 0.0 }
 0x919   : > { %5744 = vpow2.f32 %v3286_v15  ;;  %3294 = vadd.xlane.f32.xlu0 %v3293_v32  ;;  %v3424_v0 = vsel %vm2323_vm2, %v7838_v59, 0.0  ;;  %v2980_v31 = vadd.f32 %v5853_v18, %v2976_v45  ;;  %v5857_v15 = vld [vmem:[%s6304_s19 + $0xf0] sm:$0xff] }
 0x91a   : > { %3425 = vadd.xlane.f32.xlu2 %v3424_v0 }
 0x91b   : > { %v7863_v49 = vadd.f32 %v5625_v22, %v2980_v31 }
 0x91c   : > { %v3277_v1 = vpop.xlane.xlu1 %3276 }
 0x91d   : > { %v3281_v4 = vsub.f32 %v7790_v6, %v3277_v1  ;;  %v2804_v6 = vadd.f32 %v7625_v3, %v2629_v29  ;;  %v2972_v36 = vpop.f32.mrf.mxu3  ;;  %v3528_v3 = vmul.f32 %v7863_v49, %v7863_v49  ;;  %v5238_v29 = vld [vmem:[%s6327_s6 + $0x68] sm:$0xf0] }
 0x91e   : > { %v2978_v25 = vadd.f32 %v2972_v36, %v2805_v41  ;;  %v5222_v36 = vld [vmem:[%s6327_s6 + $0x48] sm:$0xf0] }
 0x91f   : > { %v7852_v19 = vpop.eup %5744  ;;  %v3288_v47 = vmul.f32 1.442695, %v3281_v4  ;;  %v2977_v46 = vadd.f32 %v2970_v17, %v2804_v6  ;;  %v5495_v4 = vld [vmem:[%s6327_s6 + $0x64] sm:$0xf]  ;;  %v5859_v17 = vld [vmem:[%s6304_s19 + $0xe0] sm:$0xff] }
 0x920   : > { %v3296_v48 = vsel %vm2323_vm2, %v7852_v19, 0.0  ;;  %v2982_v26 = vadd.f32 %v5855_v8, %v2978_v25  ;;  %v5241_v31 = vor.u32 %v5495_v4, %v5238_v29  ;;  %v5489_v25 = vld [vmem:[%s6327_s6 + $0x34] sm:$0xf]  ;;  %v5214_v8 = vld [vmem:[%s6327_s6 + $0x38] sm:$0xf0] }
 0x921   : > { %5746 = vpow2.f32 %v3288_v47  ;;  %3297 = vadd.xlane.f32.xlu0 %v3296_v48  ;;  %v2981_v43 = vadd.f32 %v5854_v16, %v2977_v46  ;;  %v5230_v46 = vld [vmem:[%s6327_s6 + $0x58] sm:$0xf0] }
 0x922   : > { %3511 = vadd.xlane.f32.xlu2 %v7854_v13  ;;  %v7888_v24 = vadd.f32 %v5625_v22, %v2982_v26  ;;  %v5862_v26 = vld [vmem:[%s6304_s19 + $0xc8] sm:$0xff] }
 0x923   : > { %v7878_v9 = vadd.f32 %v5625_v22, %v2981_v43  ;;  %v5491_v43 = vld [vmem:[%s6327_s6 + $0x44] sm:$0xf] }
 0x924   : > { %v3530_v53 = vmul.f32 %v7888_v24, %v7888_v24 }
 0x925   : > { %v3529_v11 = vmul.f32 %v7878_v9, %v7878_v9 }
 0x927   : > { %v7867_v61 = vpop.eup %5746 }
 0x928   : > { %v3299_v2 = vsel %vm2323_vm2, %v7867_v61, 0.0 }
 0x929   : > { %3513 = vadd.xlane.f32.xlu0 %v7863_v49  ;;  %3300 = vadd.xlane.f32.xlu1 %v3299_v2  ;;  %v5861_v2 = vld [vmem:[%s6304_s19 + $0xd0] sm:$0xff] }
 0x92a   : > { %3537 = vadd.xlane.f32.xlu2 %v3528_v3  ;;  %v5225_v3 = vor.u32 %v5491_v43, %v5222_v36 }
 0x931   : > { %3535 = vadd.xlane.f32.xlu1 %v3527_v52  ;;  %3515 = vadd.xlane.f32.xlu0 %v7878_v9 }
 0x932   : > { %3539 = vadd.xlane.f32.xlu2 %v3529_v11  ;;  %v5217_v11 = vor.u32 %v5489_v25, %v5214_v8 }
 0x939   : > { %3517 = vadd.xlane.f32.xlu1 %v7888_v24  ;;  %3541 = vadd.xlane.f32.xlu0 %v3530_v53 }
 0x964   : > { %v3152_v34 = vpop.xlane.xlu2 %3151 }
 0x965   : > { %5748 = vrcp.f32 %v3152_v34 }
 0x96b   : > { %v5749_v30 = vpop.eup %5748 }
 0x96c   : > { %v3155_v20 = vpop.xlane.xlu0 %3154  ;;  %v3166_v63 = vmul.f32 %v5749_v30, %v7794_v55  ;;  %v5497_v55 = vld [vmem:[%s6327_s6 + $0x74] sm:$0xf] }
 0x96d   : > { %5750 = vrcp.f32 %v3155_v20 }
 0x973   : > { %v5751_v7 = vpop.eup %5750 }
 0x974   : > { %v3167_v60 = vmul.f32 %v5751_v7, %v7798_v14  ;;  %v3417_v39 = vpop.xlane.xlu0 %3416  ;;  %v5246_v14 = vld [vmem:[%s6327_s6 + $0x78] sm:$0xf0] }
 0x975   : > { %v3158_v21 = vpop.xlane.xlu1 %3157  ;;  %5752 = vrcp.f32 %v3417_v39  ;;  %v5249_v0 = vor.u32 %v5497_v55, %v5246_v14  ;;  %v5206_v39 = vld [vmem:[%s6327_s6 + $0x28] sm:$0xf0] }
 0x976   : > { %v3170_v58 = vpack.c.bf16 %v3167_v60, %v3166_v63  ;;  %5754 = vrcp.f32 %v3158_v21 }
 0x977   : > { %3822 = vmatpush.bf16.msrb.mxu1 %v5249_v0  ;;  %v5190_v0 = vld [vmem:[%s6327_s6 + $0x8] sm:$0xf0] }
 0x978   : > { %5180 = vmatmul.msk.bf16.vlgmr.msra.gmra.mxu3 %vm2323_vm2, %v3170_v58  ;;  %v5487_v58 = vld [vmem:[%s6327_s6 + $0x24] sm:$0xf] }
 0x979   : > { %3464 = vmatpush.bf16.msra.mxu3 %v5856_v62  ;;  %v5863_v62 = vld [vmem:[%s6304_s19 + $0xc0] sm:$0xff] }
 0x97b   : > { %v5753_v32 = vpop.eup %5752  ;;  %3823 = vmatpush.bf16.msrb.mxu1 %v5241_v31 }
 0x97c   : > { %v5755_v28 = vpop.eup %5754  ;;  %v3431_v22 = vmul.f32 %v5753_v32, %v7802_v33  ;;  %v5483_v32 = vld [vmem:[%s6327_s6 + $0x4] sm:$0xf] }
 0x97d   : > { %v3420_v5 = vpop.xlane.xlu1 %3419  ;;  %v3161_v51 = vpop.xlane.xlu2 %3160  ;;  %3465 = vmatpush.bf16.msra.mxu3 %v5857_v15  ;;  %v3168_v47 = vmul.f32 %v5755_v28, %v7804_v27  ;;  %v5198_v15 = vld [vmem:[%s6327_s6 + $0x18] sm:$0xf0]  ;;  %v5193_v28 = vor.u32 %v5483_v32, %v5190_v0 }
 0x97e   : > { %5756 = vrcp.f32 %v3420_v5 }
 0x97f   : > { %5758 = vrcp.f32 %v3161_v51  ;;  %v5209_v51 = vor.u32 %v5487_v58, %v5206_v39 }
 0x981   : > { %3466 = vmatpush.bf16.msra.mxu3 %v5858_v40 }
 0x984   : > { %v5757_v23 = vpop.eup %5756 }
 0x985   : > { %v5759_v56 = vpop.eup %5758  ;;  %v3432_v45 = vmul.f32 %v5757_v23, %v7812_v50  ;;  %v3292_v1 = vpop.xlane.xlu2 %3291  ;;  %3467 = vmatpush.bf16.msra.mxu3 %v5859_v17  ;;  %v5493_v50 = vld [vmem:[%s6327_s6 + $0x54] sm:$0xf] }
 0x986   : > { %v3169_v18 = vmul.f32 %v5759_v56, %v7814_v10  ;;  %v3423_v33 = vpop.xlane.xlu1 %3422  ;;  %v5233_v27 = vor.u32 %v5493_v50, %v5230_v46  ;;  %5760 = vrcp.f32 %v3292_v1 }
 0x987   : > { %v3435_v48 = vpack.c.bf16 %v3432_v45, %v3431_v22  ;;  %5762 = vrcp.f32 %v3423_v33 }
 0x988   : > { %v3171_v6 = vpack.c.bf16 %v3169_v18, %v3168_v47  ;;  %3824 = vmatpush.bf16.msrb.mxu1 %v5233_v27 }
 0x989   : > { %5184 = vmatmul.msk.bf16.vlgmr.msra.gmra.mxu2 %vm2323_vm2, %v3435_v48  ;;  %3468 = vmatpush.bf16.msra.mxu3 %v5860_v54 }
 0x98a   : > { %5181 = vmatmul.msk.bf16.gmra.mxu3 %vm2323_vm2, %v3171_v6 }
 0x98c   : > { %v3295_v10 = vpop.xlane.xlu0 %3294  ;;  %3825 = vmatpush.bf16.msrb.mxu1 %v5225_v3  ;;  %v5761_v41 = vpop.eup %5760 }
 0x98d   : > { %5764 = vrcp.f32 %v3295_v10  ;;  %v3426_v16 = vpop.xlane.xlu2 %3425  ;;  %3469 = vmatpush.bf16.msra.mxu3 %v5861_v2  ;;  %v5763_v52 = vpop.eup %5762  ;;  %v3306_v20 = vmul.f32 %v5761_v41, %v7824_v44 }
 0x98e   : > { %5766 = vrcp.f32 %v3426_v16  ;;  %v3433_v63 = vmul.f32 %v5763_v52, %v7822_v12 }
 0x990   : > { %3826 = vmatpush.bf16.msrb.mxu1 %v5217_v11 }
 0x991   : > { %3470 = vmatpush.bf16.msra.mxu3 %v5862_v26 }
 0x993   : > { %v5765_v53 = vpop.eup %5764 }
 0x994   : > { %v5767_v34 = vpop.eup %5766  ;;  %v3307_v30 = vmul.f32 %v5765_v53, %v7836_v42  ;;  %v3298_v7 = vpop.xlane.xlu0 %3297  ;;  %3827 = vmatpush.bf16.msrb.mxu1 %v5209_v51  ;;  %v5485_v42 = vld [vmem:[%s6327_s6 + $0x14] sm:$0xf] }
 0x995   : > { %v3434_v60 = vmul.f32 %v5767_v34, %v7838_v59  ;;  %v3512_v21 = vpop.xlane.xlu2 %3511  ;;  %3471 = vmatpush.bf16.msra.mxu3 %v5863_v62  ;;  %v5201_v12 = vor.u32 %v5485_v42, %v5198_v15  ;;  %5768 = vrcp.f32 %v3298_v7 }
 0x996   : > { %v3310_v5 = vpack.c.bf16 %v3307_v30, %v3306_v20  ;;  %v3551_v45 = vmul.f32 0.0078125, %v3512_v21 }
 0x997   : > { %v3436_v44 = vpack.c.bf16 %v3434_v60, %v3433_v63 }
 0x998   : > { %3828 = vmatpush.bf16.msrb.mxu1 %v5201_v12  ;;  %v3567_v48 = vmul.f32 %v3551_v45, %v3551_v45  ;;  %v3583_v42 = vsub.f32 %v7854_v13, %v3551_v45 }
 0x999   : > { %5185 = vmatmul.msk.bf16.gmra.mxu2 %vm2323_vm2, %v3436_v44 }
 0x99a   : > { %5182 = vmatmul.msk.bf16.vlgmr.msrb.gmra.mxu3 %vm2323_vm2, %v3310_v5 }
 0x99b   : > { %v5769_v22 = vpop.eup %5768 }
 0x99c   : > { %v3514_v59 = vpop.xlane.xlu0 %3513  ;;  %v3301_v55 = vpop.xlane.xlu1 %3300  ;;  %3829 = vmatpush.bf16.msrb.mxu1 %v5193_v28  ;;  %v3308_v17 = vmul.f32 %v5769_v22, %v7852_v19 }
 0x99d   : > { %v7930_v14 = vmul.f32 0.0078125, %v3514_v59  ;;  %5770 = vrcp.f32 %v3301_v55  ;;  %v3538_v40 = vpop.xlane.xlu2 %3537 }
 0x99e   : > { %v3560_v56 = vmul.f32 0.0078125, %v3538_v40 }
 0x99f   : > { %v3568_v23 = vmul.f32 %v7930_v14, %v7930_v14  ;;  %v3584_v15 = vsub.f32 %v7863_v49, %v7930_v14 }
 0x9a1   : > { %v3576_v1 = vsub.f32 %v3560_v56, %v3568_v23 }
 0x9a3   : > { %v5771_v4 = vpop.eup %5770  ;;  %v3592_v29 = vadd.f32 1e-05, %v3576_v1 }
 0x9a4   : > { %v3309_v47 = vmul.f32 %v5771_v4, %v7867_v61  ;;  %v3536_v18 = vpop.xlane.xlu1 %3535  ;;  %v3516_v31 = vpop.xlane.xlu0 %3515 }
 0x9a5   : > { %5772 = vrsqrt.f32 %v3592_v29  ;;  %v3559_v6 = vmul.f32 0.0078125, %v3536_v18  ;;  %v7938_v33 = vmul.f32 0.0078125, %v3516_v31  ;;  %v3540_v50 = vpop.xlane.xlu2 %3539  ;;  %vm3615_vm4 = vweird.f32 %v3592_v29 }
 0x9a6   : > { %v3311_v46 = vpack.c.bf16 %v3309_v47, %v3308_v17  ;;  %v3561_v10 = vmul.f32 0.0078125, %v3540_v50 }
 0x9a7   : > { %v3575_v54 = vsub.f32 %v3559_v6, %v3567_v48  ;;  %v3569_v27 = vmul.f32 %v7938_v33, %v7938_v33  ;;  %v3585_v17 = vsub.f32 %v7878_v9, %v7938_v33  ;;  %v5496_v33 = vld [vmem:[%s6327_s6 + $0x64] sm:$0xf0] }
 0x9a9   : > { %v3591_v16 = vadd.f32 1e-05, %v3575_v54  ;;  %v3577_v43 = vsub.f32 %v3561_v10, %v3569_v27  ;;  %v5498_v54 = vld [vmem:[%s6327_s6 + $0x74] sm:$0xf0]  ;;  %v5236_v10 = vld [vmem:[%s6327_s6 + $0x60] sm:$0xf] }
 0x9aa   : > { %5183 = vmatmul.msk.bf16.gmra.mxu3 %vm2323_vm2, %v3311_v46  ;;  %v5244_v46 = vld [vmem:[%s6327_s6 + $0x70] sm:$0xf] }
 0x9ab   : > { %v5773_v19 = vpop.eup %5772  ;;  %5774 = vrsqrt.f32 %v3591_v16  ;;  %v3593_v61 = vadd.f32 1e-05, %v3577_v43  ;;  %vm3605_vm7 = vweird.f32 %v3591_v16  ;;  %v5245_v27 = vor.u32 %v5498_v54, %v5244_v46  ;;  %v5507_v46 = vld [vmem:[%s6329_s24 + $0x40] sm:$0xff] }
 0x9ac   : > { %v3610_v36 = vmul.f32 %v5773_v19, %v3592_v29  ;;  %v3518_v2 = vpop.xlane.xlu1 %3517  ;;  %v3542_v3 = vpop.xlane.xlu0 %3541  ;;  %vm3616_vm3 = vweird.f32 %v5773_v19 }
 0x9ad   : > { %5776 = vrsqrt.f32 %v3593_v61  ;;  %v3554_v41 = vmul.f32 0.0078125, %v3518_v2  ;;  %v3562_v26 = vmul.f32 0.0078125, %v3542_v3  ;;  %vm3617_vm6 = vmor %vm3615_vm4, %vm3616_vm3  ;;  %vm3625_vm13 = vweird.f32 %v3593_v61  ;;  %v5220_v3 = vld [vmem:[%s6327_s6 + $0x40] sm:$0xf] }
 0x9ae   : > { %v3611_v25 = vmul.f32 %v5773_v19, %v3610_v36  ;;  %v5494_v36 = vld [vmem:[%s6327_s6 + $0x54] sm:$0xf0] }
 0x9af   : > { %v3570_v8 = vmul.f32 %v3554_v41, %v3554_v41  ;;  %v3586_v4 = vsub.f32 %v7888_v24, %v3554_v41  ;;  %v5492_v41 = vld [vmem:[%s6327_s6 + $0x44] sm:$0xf0] }
 0x9b0   : > { %v3612_v52 = vmul.f32 0.5, %v3611_v25  ;;  %v5221_v25 = vor.u32 %v5492_v41, %v5220_v3 }
 0x9b1   : > { %v5775_v11 = vpop.eup %5774  ;;  %v3578_v53 = vsub.f32 %v3562_v26, %v3570_v8 }
 0x9b2   : > { %v3613_v34 = vsub.f32 1.5, %v3612_v52  ;;  %v3600_v20 = vmul.f32 %v5775_v11, %v3591_v16  ;;  %vm3606_vm5 = vweird.f32 %v5775_v11  ;;  %v5237_v16 = vor.u32 %v5496_v33, %v5236_v10 }
 0x9b3   : > { %v5777_v30 = vpop.eup %5776  ;;  %v3594_v7 = vadd.f32 1e-05, %v3578_v53  ;;  %vm3607_vm8 = vmor %vm3605_vm7, %vm3606_vm5  ;;  %v5212_v53 = vld [vmem:[%s6327_s6 + $0x30] sm:$0xf] }
 0x9b4   : > { %v3601_v63 = vmul.f32 %v5775_v11, %v3600_v20  ;;  %v3614_v60 = vmul.f32 %v5773_v19, %v3613_v34  ;;  %v3620_v58 = vmul.f32 %v5777_v30, %v3593_v61  ;;  %vm3626_vm10 = vweird.f32 %v5777_v30  ;;  %v5228_v61 = vld [vmem:[%s6327_s6 + $0x50] sm:$0xf]  ;;  %v5490_v34 = vld [vmem:[%s6327_s6 + $0x34] sm:$0xf0] }
 0x9b5   : > { %5778 = vrsqrt.f32 %v3594_v7  ;;  %vm3635_vm11 = vweird.f32 %v3594_v7  ;;  %vm3627_vm14 = vmor %vm3625_vm13, %vm3626_vm10  ;;  %v5229_v2 = vor.u32 %v5494_v36, %v5228_v61  ;;  %v5213_v20 = vor.u32 %v5490_v34, %v5212_v53 }
 0x9b6   : > { %v3602_v21 = vmul.f32 0.5, %v3601_v63  ;;  %v3618_v62 = vsel %vm3617_vm6, %v5773_v19, %v3614_v60  ;;  %v3621_v51 = vmul.f32 %v5777_v30, %v3620_v58  ;;  %v5196_v58 = vld [vmem:[%s6327_s6 + $0x10] sm:$0xf] }
 0x9b7   : > { %v3680_v55 = vmul.f32 %v3618_v62, %v3584_v15 }
 0x9b8   : > { %v3603_v39 = vsub.f32 1.5, %v3602_v21  ;;  %v3622_v32 = vmul.f32 0.5, %v3621_v51  ;;  %v5484_v51 = vld [vmem:[%s6327_s6 + $0x4] sm:$0xf0] }
 0x9ba   : > { %v3604_v5 = vmul.f32 %v5775_v11, %v3603_v39  ;;  %v3623_v56 = vsub.f32 1.5, %v3622_v32  ;;  %v5486_v39 = vld [vmem:[%s6327_s6 + $0x14] sm:$0xf0]  ;;  %v5513_v32 = vld [vmem:[%s6329_s24 + $0x70] sm:$0xff] }
 0x9bb   : > { %v5779_v44 = vpop.eup %5778  ;;  %v5197_v62 = vor.u32 %v5486_v39, %v5196_v58 }
 0x9bc   : > { %v3608_v12 = vsel %vm3607_vm8, %v5775_v11, %v3604_v5  ;;  %v3630_v59 = vmul.f32 %v5779_v44, %v3594_v7  ;;  %vm3636_vm9 = vweird.f32 %v5779_v44  ;;  %v3624_v45 = vmul.f32 %v5777_v30, %v3623_v56  ;;  %v5488_v7 = vld [vmem:[%s6327_s6 + $0x24] sm:$0xf0]  ;;  %v5188_v5 = vld [vmem:[%s6327_s6] sm:$0xf] }
 0x9bd   : > { %v3679_v40 = vmul.f32 %v3608_v12, %v3583_v42  ;;  %vm3637_vm12 = vmor %vm3635_vm11, %vm3636_vm9 }
 0x9be   : > { %v3631_v0 = vmul.f32 %v5779_v44, %v3630_v59  ;;  %v3628_v29 = vsel %vm3627_vm14, %v5777_v30, %v3624_v45  ;;  %v5204_v30 = vld [vmem:[%s6327_s6 + $0x20] sm:$0xf] }
 0x9bf   : > { %v7946_v28 = vpack.c.bf16 %v3680_v55, %v3679_v40  ;;  %v3681_v18 = vmul.f32 %v3628_v29, %v3585_v17  ;;  %v5205_v63 = vor.u32 %v5488_v7, %v5204_v30  ;;  %v5514_v55 = vld [vmem:[%s6329_s24 + $0x78] sm:$0xff]  ;;  %v5509_v17 = vld [vmem:[%s6329_s24 + $0x50] sm:$0xff] }
 0x9c0   : > { %v3632_v23 = vmul.f32 0.5, %v3631_v0  ;;  %4356 = vmatpush.bf16.msrb.mxu3 %v5514_v55  ;;  %v5512_v0 = vld [vmem:[%s6329_s24 + $0x68] sm:$0xff] }
 0x9c1   : > { %3830 = vmatmul.bf16.vlgmr.msrb.gmra.mxu1 %v7946_v28 }
 0x9c2   : > { %v3633_v22 = vsub.f32 1.5, %v3632_v23 }
 0x9c4   : > { %v3634_v1 = vmul.f32 %v5779_v44, %v3633_v22  ;;  %4357 = vmatpush.bf16.msrb.mxu3 %v5513_v32  ;;  %v7975_v22 = vld [vmem:[%s6321_s13] sm:$0x3] }
 0x9c5   : > { %v7979_v45 = vperm.slane %v7975_v22, 1 }
 0x9c6   : > { %v3638_v14 = vsel %vm3637_vm12, %v5779_v44, %v3634_v1  ;;  %v5189_v44 = vor.u32 %v5484_v51, %v5188_v5  ;;  %v5511_v1 = vld [vmem:[%s6329_s24 + $0x60] sm:$0xff] }
 0x9c7   : > { %v3682_v47 = vmul.f32 %v3638_v14, %v3586_v4  ;;  %v5510_v14 = vld [vmem:[%s6329_s24 + $0x58] sm:$0xff] }
 0x9c8   : > { %4358 = vmatpush.bf16.msrb.mxu3 %v5512_v0 }
 0x9c9   : > { %v7952_v31 = vpack.c.bf16 %v3682_v47, %v3681_v18 }
 0x9cc   : > { %4359 = vmatpush.bf16.msrb.mxu3 %v5511_v1 }
 0x9d0   : > { %4360 = vmatpush.bf16.msrb.mxu3 %v5510_v14 }
 0x9d1   : > { %3835 = vmatmul.bf16.gmra.mxu1 %v7952_v31 }
 0x9d4   : > { %4361 = vmatpush.bf16.msrb.mxu3 %v5509_v17 }
 0x9fb   : > { %v3187_v48 = vpop.f32.mrf.mxu3 }
 0xa03   : > { %v3189_v6 = vpop.f32.mrf.mxu3 }
 0xa04   : > { %v3197_v50 = vpack.c.bf16 %v3189_v6, %v3187_v48  ;;  %v5508_v48 = vld [vmem:[%s6329_s24 + $0x48] sm:$0xff] }
 0xa05   : > { %4362 = vmatpush.bf16.msrb.mxu3 %v5508_v48 }
 0xa06   : > { %3207 = vmatmul.bf16.vlgmr.msrb.gmra.mxu0 %v3197_v50 }
 0xa07   : > { %3793 = vmatpush.bf16.msrb.mxu0 %v5245_v27 }
 0xa09   : > { %4363 = vmatpush.bf16.msrb.mxu3 %v5507_v46 }
 0xa0b   : > { %3794 = vmatpush.bf16.msrb.mxu0 %v5237_v16 }
 0xa0c   : > { %v3452_v43 = vpop.f32.mrf.mxu2 }
 0xa0d   : > { %v3192_v19 = vpop.f32.mrf.mxu3 }
 0xa0f   : > { %3795 = vmatpush.bf16.msrb.mxu0 %v5229_v2 }
 0xa13   : > { %3796 = vmatpush.bf16.msrb.mxu0 %v5221_v25 }
 0xa14   : > { %v3454_v8 = vpop.f32.mrf.mxu2 }
 0xa15   : > { %v3194_v26 = vpop.f32.mrf.mxu3  ;;  %v3462_v52 = vpack.c.bf16 %v3454_v8, %v3452_v43 }
 0xa16   : > { %v3198_v11 = vpack.c.bf16 %v3194_v26, %v3192_v19 }
 0xa17   : > { %3472 = vmatmul.bf16.vlgmr.msra.gmra.mxu3 %v3462_v52  ;;  %3797 = vmatpush.bf16.msrb.mxu0 %v5213_v20 }
 0xa18   : > { %3212 = vmatmul.bf16.gmra.mxu0 %v3198_v11 }
 0xa1b   : > { %3798 = vmatpush.bf16.msrb.mxu0 %v5205_v63 }
 0xa1c   : > { %v3457_v60 = vpop.f32.mrf.mxu2 }
 0xa1d   : > { %v3327_v21 = vpop.f32.mrf.mxu3 }
 0xa1f   : > { %3799 = vmatpush.bf16.msrb.mxu0 %v5197_v62 }
 0xa23   : > { %3800 = vmatpush.bf16.msrb.mxu0 %v5189_v44 }
 0xa24   : > { %v3459_v42 = vpop.f32.mrf.mxu2 }
 0xa25   : > { %v3329_v15 = vpop.f32.mrf.mxu3  ;;  %v3463_v12 = vpack.c.bf16 %v3459_v42, %v3457_v60 }
 0xa26   : > { %v3337_v59 = vpack.c.bf16 %v3329_v15, %v3327_v21 }
 0xa27   : > { %3477 = vmatmul.bf16.gmra.mxu3 %v3463_v12 }
 0xa28   : > { %3347 = vmatmul.bf16.vlgmr.msra.gmra.mxu0 %v3337_v59 }
 0xa2d   : > { %v3332_v40 = vpop.f32.mrf.mxu3 }
 0xa35   : > { %v3334_v23 = vpop.f32.mrf.mxu3 }
 0xa36   : > { %v3338_v56 = vpack.c.bf16 %v3334_v23, %v3332_v40 }
 0xa38   : > { %3352 = vmatmul.bf16.gmra.mxu0 %v3338_v56 }
 0xa3e   : > { %v3831_v4 = vpop.f32.mrf.mxu1 }
 0xa3f   : > { %v7983_v29 = vadd.f32 %v3831_v4, %v7979_v45 }
 0xa41   : > { %v5251_v47 = vmul.f32 -1.702, %v7983_v29 }
 0xa43   : > { %v3885_v18 = vmul.f32 1.442695, %v5251_v47 }
 0xa45   : > { %5780 = vpow2.f32 %v3885_v18 }
 0xa46   : > { %v3833_v6 = vpop.f32.mrf.mxu1 }
 0xa47   : > { %v3834_v50 = vadd.f32 %v3833_v6, %v7979_v45 }
 0xa48   : > { %3801 = vmatmul.bf16.vlgmr.msrb.gmra.mxu0 %v7946_v28 }
 0xa49   : > { %v5253_v54 = vmul.f32 -1.702, %v3834_v50 }
 0xa4b   : > { %v5781_v27 = vpop.eup %5780  ;;  %v3889_v10 = vmul.f32 1.442695, %v5253_v54 }
 0xa4c   : > { %v3916_v33 = vadd.f32 1.0, %v5781_v27 }
 0xa4d   : > { %5782 = vpow2.f32 %v3889_v10 }
 0xa4e   : > { %5784 = vrcp.f32 %v3916_v33  ;;  %v3836_v16 = vpop.f32.mrf.mxu1  ;;  %v3957_v63 = vand.u32 2147483648, %v3916_v33  ;;  %vm3951_vm0 = vweird.f32 %v3916_v33  ;;  %v3955_v60 = vand.u32 2147483647, %v3916_v33 }
 0xa4f   : > { %v7992_v43 = vadd.f32 %v3836_v16, %v7979_v45 }
 0xa50   : > { %v3958_v5 = vor.u32 1.1754944e-38, %v3957_v63  ;;  %vm3956_vm3 = vcmp.eq.f32.partialorder %v3955_v60, 8.507059e+37 }
 0xa51   : > { %v5255_v19 = vmul.f32 -1.702, %v7992_v43 }
 0xa53   : > { %v5783_v61 = vpop.eup %5782  ;;  %v3893_v36 = vmul.f32 1.442695, %v5255_v19 }
 0xa54   : > { %v5785_v2 = vpop.eup %5784  ;;  %v3918_v3 = vadd.f32 1.0, %v5783_v61 }
 0xa55   : > { %v3947_v41 = vmul.f32 %v5785_v2, %v3916_v33  ;;  %5786 = vpow2.f32 %v3893_v36  ;;  %vm3952_vm15 = vweird.f32 %v5785_v2 }
 0xa56   : > { %5788 = vrcp.f32 %v3918_v3  ;;  %v3838_v28 = vpop.f32.mrf.mxu1  ;;  %vm3953_vm1 = vmor %vm3951_vm0, %vm3952_vm15  ;;  %v3987_v58 = vand.u32 2147483648, %v3918_v3  ;;  %v3985_v62 = vand.u32 2147483647, %v3918_v3  ;;  %vm3981_vm4 = vweird.f32 %v3918_v3 }
 0xa57   : > { %v3948_v25 = vsub.f32 1.0, %v3947_v41  ;;  %v7996_v8 = vadd.f32 %v3838_v28, %v7979_v45 }
 0xa58   : > { %3806 = vmatmul.bf16.gmra.mxu0 %v7952_v31  ;;  %v3988_v12 = vor.u32 1.1754944e-38, %v3987_v58  ;;  %vm3986_vm6 = vcmp.eq.f32.partialorder %v3985_v62, 8.507059e+37  ;;  %v5865_v62 = vld [vmem:[%s8350_s20 + $0x28] sm:$0xff] }
 0xa59   : > { %v3949_v26 = vmul.f32 %v5785_v2, %v3948_v25  ;;  %v5257_v52 = vmul.f32 -1.702, %v7996_v8 }
 0xa5b   : > { %v5787_v11 = vpop.eup %5786  ;;  %v3897_v53 = vmul.f32 1.442695, %v5257_v52  ;;  %v3950_v30 = vadd.f32 %v5785_v2, %v3949_v26 }
 0xa5c   : > { %v5789_v34 = vpop.eup %5788  ;;  %v3920_v20 = vadd.f32 1.0, %v5787_v11 }
 0xa5d   : > { %v3977_v7 = vmul.f32 %v5789_v34, %v3918_v3  ;;  %5790 = vpow2.f32 %v3897_v53  ;;  %v3954_v39 = vsel %vm3953_vm1, %v5785_v2, %v3950_v30  ;;  %vm3982_vm2 = vweird.f32 %v5789_v34  ;;  %v5626_v30 = vld [vmem:[%s6310_s27] ss:$0 sm:$0xff] }
 0xa5e   : > { %5792 = vrcp.f32 %v3920_v20  ;;  %v3959_v15 = vsel %vm3956_vm3, %v3958_v5, %v3954_v39  ;;  %vm3983_vm5 = vmor %vm3981_vm4, %vm3982_vm2  ;;  %v4017_v18 = vand.u32 2147483648, %v3920_v20  ;;  %vm4011_vm8 = vweird.f32 %v3920_v20 }
 0xa5f   : > { %v3978_v21 = vsub.f32 1.0, %v3977_v7  ;;  %v4172_v0 = vmul.f32 %v3959_v15, %v7983_v29  ;;  %v4015_v48 = vand.u32 2147483647, %v3920_v20 }
 0xa60   : > { %v4018_v29 = vor.u32 1.1754944e-38, %v4017_v18 }
 0xa61   : > { %v3979_v31 = vmul.f32 %v5789_v34, %v3978_v21  ;;  %vm4016_vm11 = vcmp.eq.f32.partialorder %v4015_v48, 8.507059e+37  ;;  %v8040_v48 = vperm.slane %v7975_v22, 0 }
 0xa63   : > { %v5791_v51 = vpop.eup %5790  ;;  %v3980_v44 = vadd.f32 %v5789_v34, %v3979_v31  ;;  %v5506_v31 = vld [vmem:[%s6329_s24 + $0x38] sm:$0xff] }
 0xa64   : > { %v5793_v42 = vpop.eup %5792  ;;  %v3922_v59 = vadd.f32 1.0, %v5791_v51  ;;  %4327 = vmatpush.bf16.msrb.mxu2 %v5506_v31 }
 0xa65   : > { %v3984_v55 = vsel %vm3983_vm5, %v5789_v34, %v3980_v44  ;;  %v4007_v40 = vmul.f32 %v5793_v42, %v3920_v20  ;;  %vm4012_vm7 = vweird.f32 %v5793_v42 }
 0xa66   : > { %v3989_v32 = vsel %vm3986_vm6, %v3988_v12, %v3984_v55  ;;  %5794 = vrcp.f32 %v3922_v59  ;;  %vm4013_vm9 = vmor %vm4011_vm8, %vm4012_vm7  ;;  %v4047_v46 = vand.u32 2147483648, %v3922_v59  ;;  %v4045_v10 = vand.u32 2147483647, %v3922_v59 }
 0xa67   : > { %v4174_v23 = vmul.f32 %v3989_v32, %v3834_v50  ;;  %v4008_v56 = vsub.f32 1.0, %v4007_v40  ;;  %vm4041_vm12 = vweird.f32 %v3922_v59  ;;  %v5866_v40 = vld [vmem:[%s8350_s20 + $0x30] sm:$0xff]  ;;  %v5504_v32 = vld [vmem:[%s6329_s24 + $0x28] sm:$0xff] }
 0xa68   : > { %v4048_v16 = vor.u32 1.1754944e-38, %v4047_v46  ;;  %vm4046_vm14 = vcmp.eq.f32.partialorder %v4045_v10, 8.507059e+37 }
 0xa69   : > { %v4188_v1 = vpack.c.bf16 %v4174_v23, %v4172_v0  ;;  %v4009_v14 = vmul.f32 %v5793_v42, %v4008_v56 }
 0xa6b   : > { %4364 = vmatmul.bf16.vlgmr.msrb.gmra.mxu3 %v4188_v1  ;;  %v4010_v17 = vadd.f32 %v5793_v42, %v4009_v14 }
 0xa6c   : > { %v5795_v4 = vpop.eup %5794 }
 0xa6d   : > { %v4037_v47 = vmul.f32 %v5795_v4, %v3922_v59  ;;  %v4014_v54 = vsel %vm4013_vm9, %v5793_v42, %v4010_v17  ;;  %vm4042_vm10 = vweird.f32 %v5795_v4  ;;  %v5505_v59 = vld [vmem:[%s6329_s24 + $0x30] sm:$0xff] }
 0xa6e   : > { %v4019_v33 = vsel %vm4016_vm11, %v4018_v29, %v4014_v54  ;;  %vm4043_vm13 = vmor %vm4041_vm12, %vm4042_vm10  ;;  %4328 = vmatpush.bf16.msrb.mxu2 %v5505_v59  ;;  %v5501_v29 = vld [vmem:[%s6329_s24 + $0x10] sm:$0xff] }
 0xa6f   : > { %v4038_v6 = vsub.f32 1.0, %v4037_v47  ;;  %v4176_v36 = vmul.f32 %v4019_v33, %v7992_v43  ;;  %v5864_v43 = vld [vmem:[%s8350_s20 + $0x20] sm:$0xff] }
 0xa70   : > { %v5500_v33 = vld [vmem:[%s6329_s24 + $0x8] sm:$0xff] }
 0xa71   : > { %v4039_v27 = vmul.f32 %v5795_v4, %v4038_v6  ;;  %v5502_v6 = vld [vmem:[%s6329_s24 + $0x18] sm:$0xff] }
 0xa72   : > { %4329 = vmatpush.bf16.msrb.mxu2 %v5504_v32 }
 0xa73   : > { %v4040_v50 = vadd.f32 %v5795_v4, %v4039_v27 }
 0xa75   : > { %v4044_v19 = vsel %vm4043_vm13, %v5795_v4, %v4040_v50  ;;  %v5503_v4 = vld [vmem:[%s6329_s24 + $0x20] sm:$0xff] }
 0xa76   : > { %v4049_v61 = vsel %vm4046_vm14, %v4048_v16, %v4044_v19  ;;  %4330 = vmatpush.bf16.msrb.mxu2 %v5503_v4 }
 0xa77   : > { %v4178_v2 = vmul.f32 %v4049_v61, %v7996_v8  ;;  %v5499_v61 = vld [vmem:[%s6329_s24] sm:$0xff] }
 0xa79   : > { %v4190_v3 = vpack.c.bf16 %v4178_v2, %v4176_v36 }
 0xa7a   : > { %4331 = vmatpush.bf16.msrb.mxu2 %v5502_v6 }
 0xa7b   : > { %4369 = vmatmul.bf16.gmra.mxu3 %v4190_v3 }
 0xa7e   : > { %4332 = vmatpush.bf16.msrb.mxu2 %v5501_v29 }
 0xa82   : > { %4333 = vmatpush.bf16.msrb.mxu2 %v5500_v33 }
 0xa83   : > { %v3208_v41 = vpop.f32.mrf.mxu0 }
 0xa84   : > { %v3228_v11 = vadd.f32 %v7726_v57, %v3208_v41 }
 0xa86   : > { %4334 = vmatpush.bf16.msrb.mxu2 %v5499_v61 }
 0xa8b   : > { %v3210_v28 = vpop.f32.mrf.mxu0 }
 0xa8c   : > { %v3230_v63 = vadd.f32 %v7728_v37, %v3210_v28 }
 0xa95   : > { %v3213_v25 = vpop.f32.mrf.mxu0 }
 0xa96   : > { %v3233_v37 = vadd.f32 %v7736_v38, %v3213_v25 }
 0xa9a   : > { %v3473_v52 = vpop.f32.mrf.mxu3 }
 0xa9d   : > { %v3215_v26 = vpop.f32.mrf.mxu0 }
 0xa9e   : > { %v3235_v0 = vadd.f32 %v7738_v35, %v3215_v26  ;;  %v5867_v35 = vld [vmem:[%s8350_s20 + $0x38] sm:$0xff] }
 0xaa2   : > { %v3475_v8 = vpop.f32.mrf.mxu3 }
 0xaa5   : > { %v3348_v53 = vpop.f32.mrf.mxu0 }
 0xaa6   : > { %v3358_v34 = vadd.f32 %v3348_v53, %v3228_v11 }
 0xaa8   : > { %v3483_v20 = vadd.f32 %v3473_v52, %v3358_v34 }
 0xaaa   : > { %v3487_v7 = vadd.f32 %v5864_v43, %v3483_v20  ;;  %v3478_v44 = vpop.f32.mrf.mxu3 }
 0xaac   : > { %v8009_v60 = vadd.f32 %v5626_v30, %v3487_v7 }
 0xaad   : > { %v3350_v21 = vpop.f32.mrf.mxu0 }
 0xaae   : > { %v3359_v58 = vadd.f32 %v3350_v21, %v3230_v63  ;;  %3519 = vadd.xlane.f32.xlu1 %v8009_v60  ;;  %v3531_v57 = vmul.f32 %v8009_v60, %v8009_v60 }
 0xab0   : > { %v3484_v39 = vadd.f32 %v3475_v8, %v3359_v58  ;;  %3543 = vadd.xlane.f32.xlu0 %v3531_v57 }
 0xab2   : > { %v3488_v5 = vadd.f32 %v5865_v62, %v3484_v39  ;;  %v3480_v17 = vpop.f32.mrf.mxu3 }
 0xab4   : > { %v8019_v51 = vadd.f32 %v5626_v30, %v3488_v5 }
 0xab5   : > { %v3353_v42 = vpop.f32.mrf.mxu0 }
 0xab6   : > { %v3360_v15 = vadd.f32 %v3353_v42, %v3233_v37  ;;  %3521 = vadd.xlane.f32.xlu2 %v8019_v51  ;;  %v3532_v12 = vmul.f32 %v8019_v51, %v8019_v51 }
 0xab8   : > { %v3485_v55 = vadd.f32 %v3478_v44, %v3360_v15  ;;  %3545 = vadd.xlane.f32.xlu1 %v3532_v12 }
 0xaba   : > { %v3489_v38 = vadd.f32 %v5866_v40, %v3485_v55 }
 0xabc   : > { %v8030_v23 = vadd.f32 %v5626_v30, %v3489_v38 }
 0xabd   : > { %v3355_v56 = vpop.f32.mrf.mxu0 }
 0xabe   : > { %v3361_v1 = vadd.f32 %v3355_v56, %v3235_v0  ;;  %3523 = vadd.xlane.f32.xlu2 %v8030_v23  ;;  %v3533_v14 = vmul.f32 %v8030_v23, %v8030_v23 }
 0xac0   : > { %v3486_v47 = vadd.f32 %v3480_v17, %v3361_v1  ;;  %3547 = vadd.xlane.f32.xlu1 %v3533_v14 }
 0xac2   : > { %v3490_v18 = vadd.f32 %v5867_v35, %v3486_v47 }
 0xac4   : > { %v8043_v46 = vadd.f32 %v5626_v30, %v3490_v18 }
 0xac5   : > { %v3802_v54 = vpop.f32.mrf.mxu0 }
 0xac6   : > { %v8046_v27 = vadd.f32 %v3802_v54, %v8040_v48  ;;  %3525 = vadd.xlane.f32.xlu0 %v8043_v46  ;;  %v3534_v10 = vmul.f32 %v8043_v46, %v8043_v46 }
 0xac8   : > { %v5250_v50 = vmul.f32 -1.702, %v8046_v27  ;;  %3549 = vadd.xlane.f32.xlu2 %v3534_v10 }
 0xaca   : > { %v3883_v22 = vmul.f32 1.442695, %v5250_v50 }
 0xacc   : > { %5796 = vpow2.f32 %v3883_v22 }
 0xacd   : > { %v3804_v16 = vpop.f32.mrf.mxu0 }
 0xace   : > { %v3805_v19 = vadd.f32 %v3804_v16, %v8040_v48 }
 0xad0   : > { %v5252_v36 = vmul.f32 -1.702, %v3805_v19 }
 0xad2   : > { %v5797_v2 = vpop.eup %5796  ;;  %v3887_v3 = vmul.f32 1.442695, %v5252_v36 }
 0xad3   : > { %v3915_v41 = vadd.f32 1.0, %v5797_v2 }
 0xad4   : > { %5798 = vpow2.f32 %v3887_v3 }
 0xad5   : > { %5800 = vrcp.f32 %v3915_v41  ;;  %v3807_v28 = vpop.f32.mrf.mxu0  ;;  %v3942_v5 = vand.u32 2147483648, %v3915_v41  ;;  %vm3936_vm0 = vweird.f32 %v3915_v41  ;;  %v3940_v37 = vand.u32 2147483647, %v3915_v41 }
 0xad6   : > { %v8057_v25 = vadd.f32 %v3807_v28, %v8040_v48 }
 0xad7   : > { %v3943_v55 = vor.u32 1.1754944e-38, %v3942_v5  ;;  %vm3941_vm3 = vcmp.eq.f32.partialorder %v3940_v37, 8.507059e+37 }
 0xad8   : > { %v5254_v26 = vmul.f32 -1.702, %v8057_v25 }
 0xada   : > { %v5799_v52 = vpop.eup %5798  ;;  %v3891_v11 = vmul.f32 1.442695, %v5254_v26 }
 0xadb   : > { %v5801_v53 = vpop.eup %5800  ;;  %v3917_v34 = vadd.f32 1.0, %v5799_v52 }
 0xadc   : > { %v3932_v20 = vmul.f32 %v5801_v53, %v3915_v41  ;;  %5802 = vpow2.f32 %v3891_v11  ;;  %vm3937_vm15 = vweird.f32 %v5801_v53 }
 0xadd   : > { %5804 = vrcp.f32 %v3917_v34  ;;  %v3809_v30 = vpop.f32.mrf.mxu0  ;;  %vm3938_vm1 = vmor %vm3936_vm0, %vm3937_vm15  ;;  %v3972_v42 = vand.u32 2147483648, %v3917_v34  ;;  %v3970_v59 = vand.u32 2147483647, %v3917_v34  ;;  %vm3966_vm4 = vweird.f32 %v3917_v34 }
 0xade   : > { %v3933_v43 = vsub.f32 1.0, %v3932_v20  ;;  %v8061_v7 = vadd.f32 %v3809_v30, %v8040_v48 }
 0xadf   : > { %v3973_v56 = vor.u32 1.1754944e-38, %v3972_v42  ;;  %vm3971_vm6 = vcmp.eq.f32.partialorder %v3970_v59, 8.507059e+37 }
 0xae0   : > { %v3934_v8 = vmul.f32 %v5801_v53, %v3933_v43  ;;  %v5256_v63 = vmul.f32 -1.702, %v8061_v7 }
 0xae2   : > { %v5803_v21 = vpop.eup %5802  ;;  %v3895_v58 = vmul.f32 1.442695, %v5256_v63  ;;  %v3935_v31 = vadd.f32 %v5801_v53, %v3934_v8 }
 0xae3   : > { %v5805_v57 = vpop.eup %5804  ;;  %v3919_v39 = vadd.f32 1.0, %v5803_v21 }
 0xae4   : > { %v3962_v62 = vmul.f32 %v5805_v57, %v3917_v34  ;;  %5806 = vpow2.f32 %v3895_v58  ;;  %v3939_v15 = vsel %vm3938_vm1, %v5801_v53, %v3935_v31  ;;  %vm3967_vm2 = vweird.f32 %v5805_v57 }
 0xae5   : > { %5808 = vrcp.f32 %v3919_v39  ;;  %v3944_v0 = vsel %vm3941_vm3, %v3943_v55, %v3939_v15  ;;  %vm3968_vm5 = vmor %vm3966_vm4, %vm3967_vm2  ;;  %v4002_v22 = vand.u32 2147483648, %v3919_v39  ;;  %vm3996_vm8 = vweird.f32 %v3919_v39 }
 0xae6   : > { %v3963_v44 = vsub.f32 1.0, %v3962_v62  ;;  %v4171_v47 = vmul.f32 %v3944_v0, %v8046_v27  ;;  %v4000_v33 = vand.u32 2147483647, %v3919_v39 }
 0xae7   : > { %v4003_v27 = vor.u32 1.1754944e-38, %v4002_v22 }
 0xae8   : > { %v3964_v12 = vmul.f32 %v5805_v57, %v3963_v44  ;;  %vm4001_vm11 = vcmp.eq.f32.partialorder %v4000_v33, 8.507059e+37 }
 0xaea   : > { %v5807_v40 = vpop.eup %5806  ;;  %v3965_v38 = vadd.f32 %v5805_v57, %v3964_v12 }
 0xaeb   : > { %v5809_v32 = vpop.eup %5808  ;;  %v3921_v1 = vadd.f32 1.0, %v5807_v40 }
 0xaec   : > { %v3969_v14 = vsel %vm3968_vm5, %v5805_v57, %v3965_v38  ;;  %v3992_v4 = vmul.f32 %v5809_v32, %v3919_v39  ;;  %vm3997_vm7 = vweird.f32 %v5809_v32 }
 0xaed   : > { %v3974_v17 = vsel %vm3971_vm6, %v3973_v56, %v3969_v14  ;;  %5810 = vrcp.f32 %v3921_v1  ;;  %vm3998_vm9 = vmor %vm3996_vm8, %vm3997_vm7  ;;  %v4032_v61 = vand.u32 2147483648, %v3921_v1  ;;  %v4030_v3 = vand.u32 2147483647, %v3921_v1 }
 0xaee   : > { %v4173_v35 = vmul.f32 %v3974_v17, %v3805_v19  ;;  %v3993_v18 = vsub.f32 1.0, %v3992_v4  ;;  %vm4026_vm12 = vweird.f32 %v3921_v1 }
 0xaef   : > { %v4033_v28 = vor.u32 1.1754944e-38, %v4032_v61  ;;  %vm4031_vm14 = vcmp.eq.f32.partialorder %v4030_v3, 8.507059e+37 }
 0xaf0   : > { %v4187_v6 = vpack.c.bf16 %v4173_v35, %v4171_v47  ;;  %v3994_v54 = vmul.f32 %v5809_v32, %v3993_v18 }
 0xaf2   : > { %4335 = vmatmul.bf16.vlgmr.msrb.gmra.mxu2 %v4187_v6  ;;  %v3995_v29 = vadd.f32 %v5809_v32, %v3994_v54 }
 0xaf3   : > { %v5811_v10 = vpop.eup %5810 }
 0xaf4   : > { %v4022_v50 = vmul.f32 %v5811_v10, %v3921_v1  ;;  %v3999_v36 = vsel %vm3998_vm9, %v5809_v32, %v3995_v29  ;;  %vm4027_vm10 = vweird.f32 %v5811_v10 }
 0xaf5   : > { %v4004_v41 = vsel %vm4001_vm11, %v4003_v27, %v3999_v36  ;;  %vm4028_vm13 = vmor %vm4026_vm12, %vm4027_vm10 }
 0xaf6   : > { %v4023_v16 = vsub.f32 1.0, %v4022_v50  ;;  %v4175_v11 = vmul.f32 %v4004_v41, %v8057_v25 }
 0xaf8   : > { %v4024_v2 = vmul.f32 %v5811_v10, %v4023_v16 }
 0xafa   : > { %v4025_v19 = vadd.f32 %v5811_v10, %v4024_v2 }
 0xafc   : > { %v4029_v26 = vsel %vm4028_vm13, %v5811_v10, %v4025_v19 }
 0xafd   : > { %v4034_v52 = vsel %vm4031_vm14, %v4033_v28, %v4029_v26 }
 0xafe   : > { %v4177_v53 = vmul.f32 %v4034_v52, %v8061_v7 }
 0xb00   : > { %v4189_v34 = vpack.c.bf16 %v4177_v53, %v4175_v11 }
 0xb02   : > { %4340 = vmatmul.bf16.gmra.mxu2 %v4189_v34 }
 0xb21   : > { %v3520_v20 = vpop.xlane.xlu1 %3519 }
 0xb22   : > { %v3555_v30 = vmul.f32 0.0078125, %v3520_v20 }
 0xb23   : > { %v3544_v43 = vpop.xlane.xlu0 %3543 }
 0xb24   : > { %v3571_v8 = vmul.f32 %v3555_v30, %v3555_v30  ;;  %v3563_v63 = vmul.f32 0.0078125, %v3544_v43  ;;  %v3587_v2 = vsub.f32 %v8009_v60, %v3555_v30 }
 0xb26   : > { %v3579_v21 = vsub.f32 %v3563_v63, %v3571_v8 }
 0xb28   : > { %v3595_v58 = vadd.f32 1e-05, %v3579_v21 }
 0xb29   : > { %v3522_v57 = vpop.xlane.xlu2 %3521 }
 0xb2a   : > { %5812 = vrsqrt.f32 %v3595_v58  ;;  %v3556_v39 = vmul.f32 0.0078125, %v3522_v57  ;;  %vm3645_vm0 = vweird.f32 %v3595_v58 }
 0xb2b   : > { %v3546_v31 = vpop.xlane.xlu1 %3545 }
 0xb2c   : > { %v3572_v62 = vmul.f32 %v3556_v39, %v3556_v39  ;;  %v3564_v5 = vmul.f32 0.0078125, %v3546_v31  ;;  %v3588_v3 = vsub.f32 %v8019_v51, %v3556_v39 }
 0xb2e   : > { %v3580_v37 = vsub.f32 %v3564_v5, %v3572_v62 }
 0xb30   : > { %v5813_v44 = vpop.eup %5812  ;;  %v3596_v25 = vadd.f32 1e-05, %v3580_v37  ;;  %v4365_v37 = vpop.f32.mrf.mxu3 }
 0xb31   : > { %v3640_v42 = vmul.f32 %v5813_v44, %v3595_v58  ;;  %v3524_v7 = vpop.xlane.xlu2 %3523  ;;  %vm3646_vm15 = vweird.f32 %v5813_v44 }
 0xb32   : > { %5814 = vrsqrt.f32 %v3596_v25  ;;  %v8067_v15 = vmul.f32 0.0078125, %v3524_v7  ;;  %vm3647_vm2 = vmor %vm3645_vm0, %vm3646_vm15  ;;  %vm3655_vm3 = vweird.f32 %v3596_v25 }
 0xb33   : > { %v3641_v12 = vmul.f32 %v5813_v44, %v3640_v42  ;;  %v3548_v59 = vpop.xlane.xlu1 %3547 }
 0xb34   : > { %v3573_v55 = vmul.f32 %v8067_v15, %v8067_v15  ;;  %v3565_v40 = vmul.f32 0.0078125, %v3548_v59  ;;  %v3589_v58 = vsub.f32 %v8030_v23, %v8067_v15 }
 0xb35   : > { %v3642_v38 = vmul.f32 0.5, %v3641_v12 }
 0xb36   : > { %v3581_v32 = vsub.f32 %v3565_v40, %v3573_v55 }
 0xb37   : > { %v3643_v1 = vsub.f32 1.5, %v3642_v38 }
 0xb38   : > { %v5815_v0 = vpop.eup %5814  ;;  %v3597_v56 = vadd.f32 1e-05, %v3581_v32  ;;  %v4367_v12 = vpop.f32.mrf.mxu3 }
 0xb39   : > { %v3650_v14 = vmul.f32 %v5815_v0, %v3596_v25  ;;  %v3526_v4 = vpop.xlane.xlu0 %3525  ;;  %v3644_v10 = vmul.f32 %v5813_v44, %v3643_v1  ;;  %vm3656_vm1 = vweird.f32 %v5815_v0 }
 0xb3a   : > { %5816 = vrsqrt.f32 %v3597_v56  ;;  %v3558_v17 = vmul.f32 0.0078125, %v3526_v4  ;;  %vm3657_vm4 = vmor %vm3655_vm3, %vm3656_vm1  ;;  %vm3665_vm6 = vweird.f32 %v3597_v56 }
 0xb3b   : > { %v3651_v47 = vmul.f32 %v5815_v0, %v3650_v14  ;;  %v3550_v35 = vpop.xlane.xlu2 %3549  ;;  %v3648_v61 = vsel %vm3647_vm2, %v5813_v44, %v3644_v10  ;;  %v8081_v44 = vld [vmem:[%s638_s15] ss:$0 sm:$0xff] }
 0xb3c   : > { %v3574_v18 = vmul.f32 %v3558_v17, %v3558_v17  ;;  %v3566_v6 = vmul.f32 0.0078125, %v3550_v35  ;;  %v3683_v41 = vmul.f32 %v3648_v61, %v3587_v2  ;;  %v3590_v57 = vsub.f32 %v8043_v46, %v3558_v17 }
 0xb3d   : > { %v3652_v54 = vmul.f32 0.5, %v3651_v47 }
 0xb3e   : > { %v3582_v29 = vsub.f32 %v3566_v6, %v3574_v18 }
 0xb3f   : > { %v3653_v50 = vsub.f32 1.5, %v3652_v54 }
 0xb40   : > { %v5817_v22 = vpop.eup %5816  ;;  %v3598_v33 = vadd.f32 1e-05, %v3582_v29  ;;  %v4370_v32 = vpop.f32.mrf.mxu3 }
 0xb41   : > { %v3660_v16 = vmul.f32 %v5817_v22, %v3597_v56  ;;  %v3654_v36 = vmul.f32 %v5815_v0, %v3653_v50  ;;  %vm3666_vm5 = vweird.f32 %v5817_v22 }
 0xb42   : > { %5818 = vrsqrt.f32 %v3598_v33  ;;  %vm3667_vm8 = vmor %vm3665_vm6, %vm3666_vm5  ;;  %vm3675_vm9 = vweird.f32 %v3598_v33 }
 0xb43   : > { %v3661_v27 = vmul.f32 %v5817_v22, %v3660_v16  ;;  %v3658_v19 = vsel %vm3657_vm4, %v5815_v0, %v3654_v36 }
 0xb44   : > { %v3684_v28 = vmul.f32 %v3658_v19, %v3588_v3 }
 0xb45   : > { %v3662_v26 = vmul.f32 0.5, %v3661_v27 }
 0xb46   : > { %v3689_v52 = vpack.c.bf16 %v3684_v28, %v3683_v41 }
 0xb47   : > { %v3663_v53 = vsub.f32 1.5, %v3662_v26 }
 0xb48   : > { %v5819_v11 = vpop.eup %5818  ;;  %3811 = vmatmul.bf16.gmra.mxu0 %v3689_v52  ;;  %3840 = vmatmul.bf16.gmra.mxu1 %v3689_v52  ;;  %v4372_v17 = vpop.f32.mrf.mxu3 }
 0xb49   : > { %v3670_v34 = vmul.f32 %v5819_v11, %v3598_v33  ;;  %v3664_v8 = vmul.f32 %v5817_v22, %v3663_v53  ;;  %vm3676_vm7 = vweird.f32 %v5819_v11 }
 0xb4a   : > { %vm3677_vm10 = vmor %vm3675_vm9, %vm3676_vm7 }
 0xb4b   : > { %v3671_v20 = vmul.f32 %v5819_v11, %v3670_v34  ;;  %v3668_v63 = vsel %vm3667_vm8, %v5817_v22, %v3664_v8 }
 0xb4c   : > { %v3685_v31 = vmul.f32 %v3668_v63, %v3589_v58 }
 0xb4d   : > { %v3672_v43 = vmul.f32 0.5, %v3671_v20 }
 0xb4f   : > { %v3673_v30 = vsub.f32 1.5, %v3672_v43 }
 0xb51   : > { %v3674_v21 = vmul.f32 %v5819_v11, %v3673_v30 }
 0xb53   : > { %v3678_v39 = vsel %vm3677_vm10, %v5819_v11, %v3674_v21 }
 0xb54   : > { %v3686_v62 = vmul.f32 %v3678_v39, %v3590_v57 }
 0xb56   : > { %v3690_v5 = vpack.c.bf16 %v3686_v62, %v3685_v31 }
 0xb58   : > { %3816 = vmatmul.bf16.gmra.mxu0 %v3690_v5  ;;  %3845 = vmatmul.bf16.gmra.mxu1 %v3690_v5 }
 0xb75   : > { %v4336_v25 = vpop.f32.mrf.mxu2 }
 0xb76   : > { %v4337_v42 = vadd.f32 %v8081_v44, %v4336_v25 }
 0xb78   : > { %v4366_v7 = vadd.f32 %v4365_v37, %v4337_v42 }
 0xb7a   : > { %v4385_v15 = vadd.f32 %v4366_v7, %v7854_v13 }
 0xb7c   : > { %4393 = vst [vmem:[%s8350_s20] sm:$0xff] %v4385_v15 }
 0xb7d   : > { %v4338_v59 = vpop.f32.mrf.mxu2 }
 0xb7e   : > { %v4339_v55 = vadd.f32 %v8081_v44, %v4338_v59 }
 0xb80   : > { %v4368_v40 = vadd.f32 %v4367_v12, %v4339_v55 }
 0xb82   : > { %v4386_v38 = vadd.f32 %v4368_v40, %v7863_v49 }
 0xb84   : > { %4394 = vst [vmem:[%s8350_s20 + $0x8] sm:$0xff] %v4386_v38 }
 0xb85   : > { %v4341_v0 = vpop.f32.mrf.mxu2 }
 0xb86   : > { %v4342_v56 = vadd.f32 %v8081_v44, %v4341_v0 }
 0xb88   : > { %v4371_v13 = vadd.f32 %v4370_v32, %v4342_v56 }
 0xb8a   : > { %v4387_v1 = vadd.f32 %v4371_v13, %v7878_v9 }
 0xb8c   : > { %4395 = vst [vmem:[%s8350_s20 + $0x10] sm:$0xff] %v4387_v1 }
 0xb8d   : > { %v4343_v14 = vpop.f32.mrf.mxu2 }
 0xb8e   : > { %v4344_v4 = vadd.f32 %v8081_v44, %v4343_v14 }
 0xb90   : > { %v4373_v49 = vadd.f32 %v4372_v17, %v4344_v4 }
 0xb92   : > { %v4388_v47 = vadd.f32 %v4373_v49, %v7888_v24 }
 0xb94   : > { %4396 = vst [vmem:[%s8350_s20 + $0x18] sm:$0xff] %v4388_v47 }
 0xbc5   : > { %v3812_v35 = vpop.f32.mrf.mxu0  ;;  %v3841_v18 = vpop.f32.mrf.mxu1 }
 0xbc6   : > { %v8104_v6 = vadd.f32 %v3812_v35, %v8040_v48  ;;  %v8107_v9 = vadd.f32 %v3841_v18, %v7979_v45 }
 0xbc8   : > { %v5258_v54 = vmul.f32 -1.702, %v8104_v6  ;;  %v5259_v10 = vmul.f32 -1.702, %v8107_v9 }
 0xbca   : > { %v3899_v29 = vmul.f32 1.442695, %v5258_v54  ;;  %v3901_v50 = vmul.f32 1.442695, %v5259_v10 }
 0xbcc   : > { %5820 = vpow2.f32 %v3899_v29 }
 0xbcd   : > { %5822 = vpow2.f32 %v3901_v50  ;;  %v3814_v24 = vpop.f32.mrf.mxu0  ;;  %v3843_v22 = vpop.f32.mrf.mxu1 }
 0xbce   : > { %v8112_v33 = vadd.f32 %v3814_v24, %v8040_v48  ;;  %v8115_v16 = vadd.f32 %v3843_v22, %v7979_v45 }
 0xbd0   : > { %v5260_v61 = vmul.f32 -1.702, %v8112_v33  ;;  %v5261_v36 = vmul.f32 -1.702, %v8115_v16 }
 0xbd2   : > { %v5821_v2 = vpop.eup %5820  ;;  %v3903_v3 = vmul.f32 1.442695, %v5260_v61  ;;  %v3905_v41 = vmul.f32 1.442695, %v5261_v36 }
 0xbd3   : > { %v5823_v27 = vpop.eup %5822  ;;  %v8119_v19 = vadd.f32 1.0, %v5821_v2 }
 0xbd4   : > { %v8121_v28 = vadd.f32 1.0, %v5823_v27  ;;  %5824 = vpow2.f32 %v3903_v3 }
 0xbd5   : > { %5826 = vrcp.f32 %v8119_v19  ;;  %v3817_v26 = vpop.f32.mrf.mxu0  ;;  %v3846_v52 = vpop.f32.mrf.mxu1  ;;  %v4060_v12 = vand.u32 2147483647, %v8119_v19  ;;  %v4062_v59 = vand.u32 2147483648, %v8119_v19  ;;  %vm4056_vm11 = vweird.f32 %v8119_v19 }
 0xbd6   : > { %5828 = vrcp.f32 %v8121_v28  ;;  %v8126_v11 = vadd.f32 %v3817_v26, %v8040_v48  ;;  %v8129_v53 = vadd.f32 %v3846_v52, %v7979_v45  ;;  %vm4071_vm12 = vweird.f32 %v8121_v28 }
 0xbd7   : > { %5830 = vpow2.f32 %v3905_v41  ;;  %v4077_v0 = vand.u32 2147483648, %v8121_v28  ;;  %vm8165_vm14 = vcmp.eq.f32.partialorder %v4060_v12, 8.507059e+37  ;;  %v4063_v4 = vor.u32 1.1754944e-38, %v4062_v59 }
 0xbd8   : > { %v5262_v34 = vmul.f32 -1.702, %v8126_v11  ;;  %v5263_v43 = vmul.f32 -1.702, %v8129_v53 }
 0xbda   : > { %v5825_v20 = vpop.eup %5824  ;;  %v3907_v63 = vmul.f32 1.442695, %v5262_v34  ;;  %v3909_v25 = vmul.f32 1.442695, %v5263_v43 }
 0xbdb   : > { %v8133_v8 = vpop.eup %5826  ;;  %v8135_v30 = vadd.f32 1.0, %v5825_v20 }
 0xbdc   : > { %v8137_v21 = vpop.eup %5828  ;;  %v4052_v58 = vmul.f32 %v8133_v8, %v8119_v19  ;;  %vm4057_vm13 = vweird.f32 %v8133_v8 }
 0xbdd   : > { %v5831_v57 = vpop.eup %5830  ;;  %v4067_v39 = vmul.f32 %v8137_v21, %v8121_v28  ;;  %5832 = vrcp.f32 %v8135_v30  ;;  %v3819_v31 = vpop.f32.mrf.mxu0  ;;  %v4092_v18 = vand.u32 2147483648, %v8135_v30  ;;  %vm4072_vm15 = vweird.f32 %v8137_v21  ;;  %vm8182_vm1 = vmor %vm4056_vm11, %vm4057_vm13 }
 0xbde   : > { %v3848_v62 = vpop.f32.mrf.mxu1  ;;  %v4053_v5 = vsub.f32 1.0, %v4052_v58  ;;  %v8144_v37 = vadd.f32 1.0, %v5831_v57  ;;  %5834 = vpow2.f32 %v3907_v63  ;;  %v8147_v42 = vadd.f32 %v3819_v31, %v8040_v48  ;;  %vm8196_vm3 = vmor %vm4071_vm12, %vm4072_vm15 }
 0xbdf   : > { %v8150_v7 = vadd.f32 %v3848_v62, %v7979_v45  ;;  %v4068_v15 = vsub.f32 1.0, %v4067_v39  ;;  %v4075_v45 = vand.u32 2147483647, %v8121_v28  ;;  %v4090_v10 = vand.u32 2147483647, %v8135_v30 }
 0xbe0   : > { %5836 = vrcp.f32 %v8144_v37  ;;  %v4054_v55 = vmul.f32 %v8133_v8, %v4053_v5  ;;  %v5264_v40 = vmul.f32 -1.702, %v8147_v42  ;;  %vm4086_vm2 = vweird.f32 %v8135_v30 }
 0xbe1   : > { %5838 = vpow2.f32 %v3909_v25  ;;  %v5265_v38 = vmul.f32 -1.702, %v8150_v7  ;;  %v4069_v48 = vmul.f32 %v8137_v21, %v4068_v15  ;;  %v4093_v41 = vor.u32 1.1754944e-38, %v4092_v18 }
 0xbe2   : > { %v3911_v13 = vmul.f32 1.442695, %v5264_v40  ;;  %v4055_v47 = vadd.f32 %v8133_v8, %v4054_v55  ;;  %v4107_v26 = vand.u32 2147483648, %v8144_v37  ;;  %v4105_v34 = vand.u32 2147483647, %v8144_v37 }
 0xbe3   : > { %v5833_v32 = vpop.eup %5832  ;;  %v3913_v17 = vmul.f32 1.442695, %v5265_v38  ;;  %v4070_v24 = vadd.f32 %v8137_v21, %v4069_v48  ;;  %v4078_v28 = vor.u32 1.1754944e-38, %v4077_v0  ;;  %vm4091_vm6 = vcmp.eq.f32.partialorder %v4090_v10, 8.507059e+37 }
 0xbe4   : > { %v4082_v56 = vmul.f32 %v5833_v32, %v8135_v30  ;;  %v5835_v1 = vpop.eup %5834  ;;  %5840 = vpow2.f32 %v3911_v13  ;;  %vm4087_vm0 = vweird.f32 %v5833_v32  ;;  %v4059_v3 = vsel %vm8182_vm1, %v8133_v8, %v4055_v47 }
 0xbe5   : > { %v8171_v54 = vadd.f32 1.0, %v5835_v1  ;;  %vm4088_vm4 = vmor %vm4086_vm2, %vm4087_vm0  ;;  %v4074_v20 = vsel %vm8196_vm3, %v8137_v21, %v4070_v24  ;;  %v4064_v30 = vsel %vm8165_vm14, %v4063_v4, %v4059_v3  ;;  %vm4101_vm7 = vweird.f32 %v8144_v37 }
 0xbe6   : > { %v5837_v49 = vpop.eup %5836  ;;  %v4083_v35 = vsub.f32 1.0, %v4082_v56  ;;  %vm4076_vm8 = vcmp.eq.f32.partialorder %v4075_v45, 8.507059e+37  ;;  %v4108_v31 = vor.u32 1.1754944e-38, %v4107_v26  ;;  %vm4106_vm10 = vcmp.eq.f32.partialorder %v4105_v34, 8.507059e+37 }
 0xbe7   : > { %v4097_v29 = vmul.f32 %v5837_v49, %v8144_v37  ;;  %v5839_v50 = vpop.eup %5838  ;;  %5842 = vrcp.f32 %v8171_v54  ;;  %vm4102_vm5 = vweird.f32 %v5837_v49  ;;  %v4079_v5 = vsel %vm4076_vm8, %v4078_v28, %v4074_v20 }
 0xbe8   : > { %v4084_v22 = vmul.f32 %v5833_v32, %v4083_v35  ;;  %v8187_v2 = vadd.f32 1.0, %v5839_v50  ;;  %5844 = vpow2.f32 %v3913_v17  ;;  %vm4103_vm9 = vmor %vm4101_vm7, %vm4102_vm5  ;;  %v4179_v12 = vmul.f32 %v4064_v30, %v8104_v6 }
 0xbe9   : > { %v4098_v36 = vsub.f32 1.0, %v4097_v29  ;;  %v4120_v13 = vand.u32 2147483647, %v8171_v54  ;;  %v4122_v6 = vand.u32 2147483648, %v8171_v54  ;;  %vm4116_vm12 = vweird.f32 %v8171_v54 }
 0xbea   : > { %v4085_v19 = vadd.f32 %v5833_v32, %v4084_v22  ;;  %5846 = vrcp.f32 %v8187_v2  ;;  %v5841_v8 = vpop.eup %5840  ;;  %v4137_v29 = vand.u32 2147483648, %v8187_v2  ;;  %vm4131_vm1 = vweird.f32 %v8187_v2 }
 0xbeb   : > { %v4099_v52 = vmul.f32 %v5837_v49, %v4098_v36  ;;  %v3929_v62 = vadd.f32 1.0, %v5841_v8  ;;  %vm8219_vm13 = vcmp.eq.f32.partialorder %v4120_v13, 8.507059e+37  ;;  %v4135_v61 = vand.u32 2147483647, %v8187_v2 }
 0xbec   : > { %v4089_v43 = vsel %vm4088_vm4, %v5833_v32, %v4085_v19 }
 0xbed   : > { %v4094_v63 = vsel %vm4091_vm6, %v4093_v41, %v4089_v43  ;;  %v4100_v58 = vadd.f32 %v5837_v49, %v4099_v52  ;;  %v5843_v57 = vpop.eup %5842  ;;  %5848 = vrcp.f32 %v3929_v62  ;;  %v4152_v35 = vand.u32 2147483648, %v3929_v62 }
 0xbee   : > { %v4181_v39 = vmul.f32 %v4094_v63, %v8112_v33  ;;  %v5845_v21 = vpop.eup %5844  ;;  %v4112_v15 = vmul.f32 %v5843_v57, %v8171_v54  ;;  %v4180_v33 = vmul.f32 %v4079_v5, %v8107_v9  ;;  %vm4117_vm11 = vweird.f32 %v5843_v57 }
 0xbef   : > { %v4104_v25 = vsel %vm4103_vm9, %v5837_v49, %v4100_v58  ;;  %v3930_v38 = vadd.f32 1.0, %v5845_v21  ;;  %v4123_v49 = vor.u32 1.1754944e-38, %v4122_v6  ;;  %vm8223_vm14 = vmor %vm4116_vm12, %vm4117_vm11  ;;  %v4150_v22 = vand.u32 2147483647, %v3929_v62 }
 0xbf0   : > { %v4109_v59 = vsel %vm4106_vm10, %v4108_v31, %v4104_v25  ;;  %v5847_v55 = vpop.eup %5846  ;;  %v4113_v40 = vsub.f32 1.0, %v4112_v15  ;;  %v4191_v45 = vpack.c.bf16 %v4181_v39, %v4179_v12  ;;  %vm4146_vm2 = vweird.f32 %v3929_v62 }
 0xbf1   : > { %v4182_v37 = vmul.f32 %v4109_v59, %v8115_v16  ;;  %v4127_v32 = vmul.f32 %v5847_v55, %v8187_v2  ;;  %5850 = vrcp.f32 %v3930_v38  ;;  %vm4132_vm15 = vweird.f32 %v5847_v55 }
 0xbf2   : > { %v4114_v48 = vmul.f32 %v5843_v57, %v4113_v40  ;;  %4345 = vmatmul.bf16.gmra.mxu2 %v4191_v45  ;;  %vm8232_vm3 = vmor %vm4131_vm1, %vm4132_vm15  ;;  %v4153_v19 = vor.u32 1.1754944e-38, %v4152_v35  ;;  %v4165_v41 = vand.u32 2147483647, %v3930_v38  ;;  %v4167_v26 = vand.u32 2147483648, %v3930_v38 }
 0xbf3   : > { %v4128_v0 = vsub.f32 1.0, %v4127_v32  ;;  %v4192_v56 = vpack.c.bf16 %v4182_v37, %v4180_v33  ;;  %v5849_v1 = vpop.eup %5848  ;;  %v4138_v2 = vor.u32 1.1754944e-38, %v4137_v29  ;;  %vm4151_vm6 = vcmp.eq.f32.partialorder %v4150_v22, 8.507059e+37 }
 0xbf4   : > { %v4115_v16 = vadd.f32 %v5843_v57, %v4114_v48  ;;  %v4142_v4 = vmul.f32 %v5849_v1, %v3929_v62  ;;  %vm4147_vm0 = vweird.f32 %v5849_v1  ;;  %vm4136_vm7 = vcmp.eq.f32.partialorder %v4135_v61, 8.507059e+37 }
 0xbf5   : > { %v4129_v14 = vmul.f32 %v5847_v55, %v4128_v0  ;;  %4374 = vmatmul.bf16.gmra.mxu3 %v4192_v56  ;;  %vm4148_vm4 = vmor %vm4146_vm2, %vm4147_vm0  ;;  %vm4161_vm8 = vweird.f32 %v3930_v38  ;;  %vm4166_vm10 = vcmp.eq.f32.partialorder %v4165_v41, 8.507059e+37 }
 0xbf6   : > { %v4143_v47 = vsub.f32 1.0, %v4142_v4  ;;  %v4119_v54 = vsel %vm8223_vm14, %v5843_v57, %v4115_v16  ;;  %v4168_v57 = vor.u32 1.1754944e-38, %v4167_v26 }
 0xbf7   : > { %v5851_v9 = vpop.eup %5850  ;;  %v4130_v10 = vadd.f32 %v5847_v55, %v4129_v14  ;;  %v4124_v52 = vsel %vm8219_vm13, %v4123_v49, %v4119_v54 }
 0xbf8   : > { %v4157_v50 = vmul.f32 %v5851_v9, %v3930_v38  ;;  %v4144_v24 = vmul.f32 %v5849_v1, %v4143_v47  ;;  %vm4162_vm5 = vweird.f32 %v5851_v9  ;;  %v4183_v30 = vmul.f32 %v4124_v52, %v8126_v11 }
 0xbf9   : > { %v4134_v34 = vsel %vm8232_vm3, %v5847_v55, %v4130_v10  ;;  %vm4163_vm9 = vmor %vm4161_vm8, %vm4162_vm5 }
 0xbfa   : > { %v4158_v36 = vsub.f32 1.0, %v4157_v50  ;;  %v4145_v27 = vadd.f32 %v5849_v1, %v4144_v24  ;;  %v4139_v63 = vsel %vm4136_vm7, %v4138_v2, %v4134_v34 }
 0xbfb   : > { %v4184_v21 = vmul.f32 %v4139_v63, %v8129_v53 }
 0xbfc   : > { %v4159_v20 = vmul.f32 %v5851_v9, %v4158_v36  ;;  %v4149_v28 = vsel %vm4148_vm4, %v5849_v1, %v4145_v27 }
 0xbfd   : > { %v4154_v43 = vsel %vm4151_vm6, %v4153_v19, %v4149_v28 }
 0xbfe   : > { %v4160_v8 = vadd.f32 %v5851_v9, %v4159_v20  ;;  %v4185_v58 = vmul.f32 %v4154_v43, %v8147_v42 }
 0xc00   : > { %v4164_v39 = vsel %vm4163_vm9, %v5851_v9, %v4160_v8  ;;  %v4193_v62 = vpack.c.bf16 %v4185_v58, %v4183_v30 }
 0xc01   : > { %v4169_v31 = vsel %vm4166_vm10, %v4168_v57, %v4164_v39 }
 0xc02   : > { %v4186_v5 = vmul.f32 %v4169_v31, %v8150_v7  ;;  %4350 = vmatmul.bf16.gmra.mxu2 %v4193_v62 }
 0xc04   : > { %v4194_v25 = vpack.c.bf16 %v4186_v5, %v4184_v21 }
 0xc06   : > { %4379 = vmatmul.bf16.gmra.mxu3 %v4194_v25 }
 0xc75   : > { %v4346_v15 = vpop.f32.mrf.mxu2 }
 0xc76   : > { %v4347_v12 = vadd.f32 %v8081_v44, %v4346_v15 }
 0xc78   : > { %v4375_v11 = vpop.f32.mrf.mxu3 }
 0xc79   : > { %v4376_v59 = vadd.f32 %v4375_v11, %v4347_v12 }
 0xc7b   : > { %v4389_v42 = vadd.f32 %v4376_v59, %v8009_v60 }
 0xc7d   : > { %4397 = vst [vmem:[%s8350_s20 + $0x20] sm:$0xff] %v4389_v42  ;;  %v4348_v55 = vpop.f32.mrf.mxu2 }
 0xc7e   : > { %v4349_v37 = vadd.f32 %v8081_v44, %v4348_v55 }
 0xc80   : > { %v4377_v53 = vpop.f32.mrf.mxu3 }
 0xc81   : > { %v4378_v40 = vadd.f32 %v4377_v53, %v4349_v37 }
 0xc83   : > { %v4390_v7 = vadd.f32 %v4378_v40, %v8019_v51 }
 0xc85   : > { %4398 = vst [vmem:[%s8350_s20 + $0x28] sm:$0xff] %v4390_v7  ;;  %v4351_v38 = vpop.f32.mrf.mxu2 }
 0xc86   : > { %v4352_v33 = vadd.f32 %v8081_v44, %v4351_v38 }
 0xc89   : > { %v4380_v32 = vpop.f32.mrf.mxu3 }
 0xc8a   : > { %v4381_v60 = vadd.f32 %v4380_v32, %v4352_v33 }
 0xc8c   : > { %v4391_v45 = vadd.f32 %v4381_v60, %v8030_v23 }
 0xc8d   : > { %v4353_v48 = vpop.f32.mrf.mxu2 }
 0xc8e   : > { %4399 = vst [vmem:[%s8350_s20 + $0x30] sm:$0xff] %v4391_v45  ;;  %v4354_v0 = vadd.f32 %v8081_v44, %v4353_v48 }
 0xc91   : > { %v4382_v56 = vpop.f32.mrf.mxu3 }
 0xc92   : > { %v4383_v51 = vadd.f32 %v4382_v56, %v4354_v0 }
 0xc94   : > { %v4392_v13 = vadd.f32 %v4383_v51, %v8043_v46 }
 0xc96   : > { %4400 = vst [vmem:[%s8350_s20 + $0x38] sm:$0xff] %v4392_v13 }
 0xc97 PF: > { %s8448_s28 = sld [smem:[#allocation13_spill]]  ;;  %s8451_s25 = smov %s6052_s26 }
 0xc98   : > { %s8449_s29 = sld [smem:[#allocation12_spill]] }
 0xc99   : > { %s8450_s27 = sld [smem:[#allocation14_spill]] }
 0xc9d   : > { %p22_p1 = scmp.ge.s32.totalorder %s8448_s28, 4  }
 0xc9e   : > { %s8452_s26 = smov %s8449_s29 }
 0xc9f   :  { %24 = sbr.rel (!%p22_p1) target bundleno = 10 (0xa), region = 156 }
 0xca4   :  { %4412 = vsyncpa [#allocation3], 1 }
 0xca5   :  { %4414 = vsyncpa [#allocation3 + $0x1], 1 }
 0xca6   :  { %4415 = vsyncpa [#allocation5], 1 }

</bundles_post_ra>
